<compile_context>
chip_gen: v5e
topology: v5e:2x2
jax: 0.10.0
libtpu: 0.0.40
codegen_flags: <defaults>
</compile_context>

<pallas_src>
import functools

import numpy as np
import jax
import jax.numpy as jnp
from jax.experimental import pallas as pl
from jax.experimental.pallas import tpu as pltpu


# ---------------------------------------------------------------------------
# Fused kernel: conv1(5x5,s5) + 3x (3x3 conv), bias+ReLU fused, all in VMEM.
# Activations are channels-last on the layer-1 (H1 x W1) grid:
#   row index = n*H1*W1 + h*W1 + w,  lane index = channel.
# Each 3x3 conv is 9 dense (Cin,Cout) matmuls against row-shifted views of the
# previous activation buffer (shift = dh*W1 + dw).
# ---------------------------------------------------------------------------
def _mapcnn_kernel(xp_ref, w1_ref, b1_ref, w2_ref, b2_ref, w3_ref, b3_ref,
                   w4_ref, b4_ref, out_ref, h1_ref, h2_ref, h3_ref,
                   *, n_rows, row_stride):
    f32 = jnp.float32
    bf16 = jnp.bfloat16

    # Deterministic padding rows (they only ever feed garbage output rows).
    h1_ref[...] = jnp.zeros_like(h1_ref)
    h2_ref[...] = jnp.zeros_like(h2_ref)
    h3_ref[...] = jnp.zeros_like(h3_ref)

    # ---- layer 1: 5x5 stride-5 conv == one dense (25,32) matmul ------------
    a1 = jnp.dot(xp_ref[...].astype(bf16), w1_ref[...],
                 preferred_element_type=f32)
    a1 = jnp.maximum(a1 + b1_ref[...], 0.0)
    h1_ref[0:n_rows, :] = a1.astype(h1_ref.dtype)

    # ---- 3x3 layers: 9 shifted dense matmuls, f32 accumulation -------------
    def conv3x3(src_ref, dst_ref, w_ref, b_ref, relu):
        cout = w_ref.shape[2]
        acc = jnp.broadcast_to(b_ref[...], (n_rows, cout)).astype(f32)
        for dh in range(3):
            for dw in range(3):
                shift = dh * row_stride + dw
                lhs = src_ref[shift:shift + n_rows, :].astype(bf16)
                acc = acc + jnp.dot(lhs, w_ref[dh * 3 + dw],
                                    preferred_element_type=f32)
        if relu:
            acc = jnp.maximum(acc, 0.0)
        dst_ref[0:n_rows, :] = acc.astype(dst_ref.dtype)

    conv3x3(h1_ref, h2_ref, w2_ref, b2_ref, True)
    conv3x3(h2_ref, h3_ref, w3_ref, b3_ref, True)
    # torch.nn.Dropout(p=0) is the identity in the forward pass -> omitted.
    conv3x3(h3_ref, out_ref, w4_ref, b4_ref, False)


# ---------------------------------------------------------------------------
# One-time parameter re-layout (hoisted out of the forward path)
# ---------------------------------------------------------------------------
def prepare_params(params):
    """Torch (Cout,Cin,kh,kw)/(Cout,) params -> channels-last matmul weights
    in bf16 and (1,Cout) f32 biases for the fused kernel."""
    (w1, b1), (w2, b2), (w3, b3), (w4, b4) = [
        (np.asarray(w, np.float32), np.asarray(b, np.float32)) for w, b in params]

    def patch5(w):                       # (32,1,5,5) -> (25,32), column = dh*5+dw
        return w.transpose(2, 3, 1, 0).reshape(25, -1)

    def taps3(w):                        # (Co,Ci,3,3) -> (9,Ci,Co), tap = dh*3+dw
        return w.transpose(2, 3, 1, 0).reshape(9, w.shape[1], w.shape[0])

    def bias(b):
        return jnp.asarray(b.reshape(1, -1), jnp.float32)

    return (jnp.asarray(patch5(w1), jnp.bfloat16), bias(b1),
            jnp.asarray(taps3(w2), jnp.bfloat16), bias(b2),
            jnp.asarray(taps3(w3), jnp.bfloat16), bias(b3),
            jnp.asarray(taps3(w4), jnp.bfloat16), bias(b4))


# ---------------------------------------------------------------------------
# Forward
# ---------------------------------------------------------------------------
def _round8(x):
    return ((x + 7) // 8) * 8


@jax.jit
def map_cnn_forward(m, prepped):
    """m: (N, 1, H, W) float32 -> (N, 256*H4*W4) float32 (torch NCHW flatten)."""
    w1b, b1b, w2b, b2b, w3b, b3b, w4b, b4b = prepped
    N, cin, H, W = m.shape
    assert cin == 1
    H1, W1 = (H - 5) // 5 + 1, (W - 5) // 5 + 1
    H4, W4 = H1 - 6, W1 - 6
    C4 = 256

    # Layer-1 patch regroup (stride == kernel -> pure relayout, no duplication).
    x = m[:, 0, :H1 * 5, :W1 * 5]
    xp = x.reshape(N, H1, 5, W1, 5).transpose(0, 1, 3, 2, 4)
    xp = xp.reshape(N * H1 * W1, 25)

    n_rows = N * H1 * W1
    rows_pad = _round8(n_rows + 2 * W1 + 2)      # shifted reads stay in bounds

    args = (xp, w1b, b1b, w2b, b2b, w3b, b3b, w4b, b4b)
    bytes_accessed = (sum(a.size * a.dtype.itemsize for a in args)
                      + n_rows * C4 * 4)
    flops = 2 * n_rows * (25 * 32 + 9 * (32 * 64 + 64 * 128 + 128 * 256))

    out = pl.pallas_call(
        functools.partial(_mapcnn_kernel, n_rows=n_rows, row_stride=W1),
        out_shape=jax.ShapeDtypeStruct((n_rows, C4), jnp.float32),
        in_specs=[pl.BlockSpec(memory_space=pltpu.MemorySpace.VMEM)] * len(args),
        out_specs=pl.BlockSpec(memory_space=pltpu.MemorySpace.VMEM),
        scratch_shapes=[
            pltpu.VMEM((rows_pad, 32), jnp.float32),     # conv1 activations
            pltpu.VMEM((rows_pad, 64), jnp.float32),     # conv2 activations
            pltpu.VMEM((rows_pad, 128), jnp.float32),    # conv3 activations
        ],
        cost_estimate=pl.CostEstimate(flops=flops, transcendentals=0,
                                      bytes_accessed=bytes_accessed),
    )(*args)

    # Valid (H4,W4) sub-grid + NCHW flatten: one tiny XLA permute on the
    # lane-dense 128 KiB kernel output (not worth an in-kernel transpose).
    out = out.reshape(N, H1, W1, C4)[:, :H4, :W4, :]
    return out.transpose(0, 3, 1, 2).reshape(N, -1)


# ---------------------------------------------------------------------------
# Param init (same shapes / fan-in scaling as torch.nn.Conv2d default) + ref
# ---------------------------------------------------------------------------
def init_params(key):
    specs = [(32, 1, 5, 5), (64, 32, 3, 3), (128, 64, 3, 3), (256, 128, 3, 3)]
    params = []
    for i, (co, ci, kh, kw) in enumerate(specs):
        k_w, k_b = jax.random.split(jax.random.fold_in(key, i))
        bound = 1.0 / float(ci * kh * kw) ** 0.5
        w = jax.random.uniform(k_w, (co, ci, kh, kw), jnp.float32, -bound, bound)
        b = jax.random.uniform(k_b, (co,), jnp.float32, -bound, bound)
        params.append((w, b))
    return params


def _ref_forward(m, params):
    """Pure-XLA reference (lax conv) used only as a correctness check."""
    x = m
    strides = [5, 1, 1, 1]
    relus = [True, True, True, False]
    for (w, b), s, r in zip(params, strides, relus):
        x = jax.lax.conv_general_dilated(
            x, w, window_strides=(s, s), padding="VALID",
            dimension_numbers=("NCHW", "OIHW", "NCHW"),
            precision=jax.lax.Precision.HIGHEST)
        x = x + b.reshape(1, -1, 1, 1)
        if r:
            x = jnp.maximum(x, 0.0)
    return x.reshape(x.shape[0], -1)


if __name__ == "__main__":
    key = jax.random.PRNGKey(0)
    k_in, k_par = jax.random.split(key)
    # 1-channel 40x40 map, batch 2:
    # 40 -> conv(5,s5): 8 -> conv3: 6 -> conv3: 4 -> conv3: 2 ; flatten 256*2*2=1024
    m = jax.random.normal(k_in, (2, 1, 40, 40), jnp.float32)
    params = init_params(k_par)
    prepped = prepare_params(params)

    out = jax.block_until_ready(map_cnn_forward(m, prepped))
    assert out.shape == (2, 1024), out.shape
    assert out.dtype == jnp.float32

    ref = jax.block_until_ready(_ref_forward(m, params))
    err = float(jnp.max(jnp.abs(out - ref)))
    scale = float(jnp.max(jnp.abs(ref)))
    assert err <= 5e-2 * max(1.0, scale), (err, scale)

    print("KERNEL_OK")
</pallas_src>

<mosaic_0001>
module attributes {stable_mosaic.version = 11 : i64} {
  func.func @_mapcnn_kernel(%arg0: memref<128x25xf32, #tpu.memory_space<vmem>>, %arg1: memref<25x32xbf16, #tpu.memory_space<vmem>>, %arg2: memref<1x32xf32, #tpu.memory_space<vmem>>, %arg3: memref<9x32x64xbf16, #tpu.memory_space<vmem>>, %arg4: memref<1x64xf32, #tpu.memory_space<vmem>>, %arg5: memref<9x64x128xbf16, #tpu.memory_space<vmem>>, %arg6: memref<1x128xf32, #tpu.memory_space<vmem>>, %arg7: memref<9x128x256xbf16, #tpu.memory_space<vmem>>, %arg8: memref<1x256xf32, #tpu.memory_space<vmem>>, %arg9: memref<128x256xf32, #tpu.memory_space<vmem>>, %arg10: memref<152x32xf32, #tpu.memory_space<vmem>>, %arg11: memref<152x64xf32, #tpu.memory_space<vmem>>, %arg12: memref<152x128xf32, #tpu.memory_space<vmem>>) attributes {dimension_semantics = [], scalar_prefetch = 0 : i64, scratch_operands = 3 : i64, tpu.core_type = #tpu.core_type<tc>} {
    %cst = arith.constant 0.000000e+00 : f32
    %0 = vector.broadcast %cst : f32 to vector<152x32xf32>
    %c0 = arith.constant 0 : index
    %c0_0 = arith.constant 0 : index
    %1 = vector.load %arg10[%c0, %c0_0] : memref<152x32xf32, #tpu.memory_space<vmem>>, vector<152x32xf32>
    tpu.vector_store %arg10[%c0, %c0_0], %0 {strides = array<i32>} : memref<152x32xf32, #tpu.memory_space<vmem>>, vector<152x32xf32>,
    %cst_1 = arith.constant 0.000000e+00 : f32
    %2 = vector.broadcast %cst_1 : f32 to vector<152x64xf32>
    %c0_2 = arith.constant 0 : index
    %c0_3 = arith.constant 0 : index
    %3 = vector.load %arg11[%c0_2, %c0_3] : memref<152x64xf32, #tpu.memory_space<vmem>>, vector<152x64xf32>
    tpu.vector_store %arg11[%c0_2, %c0_3], %2 {strides = array<i32>} : memref<152x64xf32, #tpu.memory_space<vmem>>, vector<152x64xf32>,
    %cst_4 = arith.constant 0.000000e+00 : f32
    %4 = vector.broadcast %cst_4 : f32 to vector<152x128xf32>
    %c0_5 = arith.constant 0 : index
    %c0_6 = arith.constant 0 : index
    %5 = vector.load %arg12[%c0_5, %c0_6] : memref<152x128xf32, #tpu.memory_space<vmem>>, vector<152x128xf32>
    tpu.vector_store %arg12[%c0_5, %c0_6], %4 {strides = array<i32>} : memref<152x128xf32, #tpu.memory_space<vmem>>, vector<152x128xf32>,
    %c0_7 = arith.constant 0 : index
    %c0_8 = arith.constant 0 : index
    %6 = vector.load %arg0[%c0_7, %c0_8] : memref<128x25xf32, #tpu.memory_space<vmem>>, vector<128x25xf32>
    %7 = arith.truncf %6 : vector<128x25xf32> to vector<128x25xbf16>
    %c0_9 = arith.constant 0 : index
    %c0_10 = arith.constant 0 : index
    %8 = vector.load %arg1[%c0_9, %c0_10] : memref<25x32xbf16, #tpu.memory_space<vmem>>, vector<25x32xbf16>
    %cst_11 = arith.constant dense<0.000000e+00> : vector<128x32xf32>
    %9 = tpu.matmul %7, %8, %cst_11 {dimension_numbers = #tpu.dot_dimension_numbers<[1], [0], [0], [1], [0, 0, 1, 1], [], []>} : vector<128x25xbf16>, vector<25x32xbf16>, vector<128x32xf32> -> vector<128x32xf32>
    %c0_12 = arith.constant 0 : index
    %c0_13 = arith.constant 0 : index
    %10 = vector.load %arg2[%c0_12, %c0_13] : memref<1x32xf32, #tpu.memory_space<vmem>>, vector<1x32xf32>
    %11 = vector.broadcast %10 : vector<1x32xf32> to vector<128x32xf32>
    %12 = arith.addf %9, %11 : vector<128x32xf32>
    %cst_14 = arith.constant 0.000000e+00 : f32
    %13 = vector.broadcast %cst_14 : f32 to vector<128x32xf32>
    %14 = arith.maximumf %12, %13 : vector<128x32xf32>
    %c0_15 = arith.constant 0 : index
    %c0_16 = arith.constant 0 : index
    %15 = vector.load %arg10[%c0_15, %c0_16] : memref<152x32xf32, #tpu.memory_space<vmem>>, vector<128x32xf32>
    tpu.vector_store %arg10[%c0_15, %c0_16], %14 {strides = array<i32>} : memref<152x32xf32, #tpu.memory_space<vmem>>, vector<128x32xf32>,
    %c0_17 = arith.constant 0 : index
    %c0_18 = arith.constant 0 : index
    %16 = vector.load %arg4[%c0_17, %c0_18] : memref<1x64xf32, #tpu.memory_space<vmem>>, vector<1x64xf32>
    %17 = vector.shape_cast %16 : vector<1x64xf32> to vector<1x64xf32>
    %18 = vector.broadcast %17 : vector<1x64xf32> to vector<128x64xf32>
    %c0_19 = arith.constant 0 : index
    %c0_20 = arith.constant 0 : index
    %19 = vector.load %arg10[%c0_19, %c0_20] : memref<152x32xf32, #tpu.memory_space<vmem>>, vector<128x32xf32>
    %20 = arith.truncf %19 : vector<128x32xf32> to vector<128x32xbf16>
    %c0_21 = arith.constant 0 : index
    %c0_22 = arith.constant 0 : index
    %c0_23 = arith.constant 0 : index
    %21 = vector.load %arg3[%c0_21, %c0_22, %c0_23] : memref<9x32x64xbf16, #tpu.memory_space<vmem>>, vector<1x32x64xbf16>
    %22 = vector.shape_cast %21 : vector<1x32x64xbf16> to vector<32x64xbf16>
    %cst_24 = arith.constant dense<0.000000e+00> : vector<128x64xf32>
    %23 = tpu.matmul %20, %22, %cst_24 {dimension_numbers = #tpu.dot_dimension_numbers<[1], [0], [0], [1], [0, 0, 1, 1], [], []>} : vector<128x32xbf16>, vector<32x64xbf16>, vector<128x64xf32> -> vector<128x64xf32>
    %24 = arith.addf %18, %23 : vector<128x64xf32>
    %c1 = arith.constant 1 : index
    %c0_25 = arith.constant 0 : index
    %25 = vector.load %arg10[%c1, %c0_25] : memref<152x32xf32, #tpu.memory_space<vmem>>, vector<128x32xf32>
    %26 = arith.truncf %25 : vector<128x32xf32> to vector<128x32xbf16>
    %c1_26 = arith.constant 1 : index
    %c0_27 = arith.constant 0 : index
    %c0_28 = arith.constant 0 : index
    %27 = vector.load %arg3[%c1_26, %c0_27, %c0_28] : memref<9x32x64xbf16, #tpu.memory_space<vmem>>, vector<1x32x64xbf16>
    %28 = vector.shape_cast %27 : vector<1x32x64xbf16> to vector<32x64xbf16>
    %cst_29 = arith.constant dense<0.000000e+00> : vector<128x64xf32>
    %29 = tpu.matmul %26, %28, %cst_29 {dimension_numbers = #tpu.dot_dimension_numbers<[1], [0], [0], [1], [0, 0, 1, 1], [], []>} : vector<128x32xbf16>, vector<32x64xbf16>, vector<128x64xf32> -> vector<128x64xf32>
    %30 = arith.addf %24, %29 : vector<128x64xf32>
    %c2 = arith.constant 2 : index
    %c0_30 = arith.constant 0 : index
    %31 = vector.load %arg10[%c2, %c0_30] : memref<152x32xf32, #tpu.memory_space<vmem>>, vector<128x32xf32>
    %32 = arith.truncf %31 : vector<128x32xf32> to vector<128x32xbf16>
    %c2_31 = arith.constant 2 : index
    %c0_32 = arith.constant 0 : index
    %c0_33 = arith.constant 0 : index
    %33 = vector.load %arg3[%c2_31, %c0_32, %c0_33] : memref<9x32x64xbf16, #tpu.memory_space<vmem>>, vector<1x32x64xbf16>
    %34 = vector.shape_cast %33 : vector<1x32x64xbf16> to vector<32x64xbf16>
    %cst_34 = arith.constant dense<0.000000e+00> : vector<128x64xf32>
    %35 = tpu.matmul %32, %34, %cst_34 {dimension_numbers = #tpu.dot_dimension_numbers<[1], [0], [0], [1], [0, 0, 1, 1], [], []>} : vector<128x32xbf16>, vector<32x64xbf16>, vector<128x64xf32> -> vector<128x64xf32>
    %36 = arith.addf %30, %35 : vector<128x64xf32>
    %c8 = arith.constant 8 : index
    %c0_35 = arith.constant 0 : index
    %37 = vector.load %arg10[%c8, %c0_35] : memref<152x32xf32, #tpu.memory_space<vmem>>, vector<128x32xf32>
    %38 = arith.truncf %37 : vector<128x32xf32> to vector<128x32xbf16>
    %c3 = arith.constant 3 : index
    %c0_36 = arith.constant 0 : index
    %c0_37 = arith.constant 0 : index
    %39 = vector.load %arg3[%c3, %c0_36, %c0_37] : memref<9x32x64xbf16, #tpu.memory_space<vmem>>, vector<1x32x64xbf16>
    %40 = vector.shape_cast %39 : vector<1x32x64xbf16> to vector<32x64xbf16>
    %cst_38 = arith.constant dense<0.000000e+00> : vector<128x64xf32>
    %41 = tpu.matmul %38, %40, %cst_38 {dimension_numbers = #tpu.dot_dimension_numbers<[1], [0], [0], [1], [0, 0, 1, 1], [], []>} : vector<128x32xbf16>, vector<32x64xbf16>, vector<128x64xf32> -> vector<128x64xf32>
    %42 = arith.addf %36, %41 : vector<128x64xf32>
    %c9 = arith.constant 9 : index
    %c0_39 = arith.constant 0 : index
    %43 = vector.load %arg10[%c9, %c0_39] : memref<152x32xf32, #tpu.memory_space<vmem>>, vector<128x32xf32>
    %44 = arith.truncf %43 : vector<128x32xf32> to vector<128x32xbf16>
    %c4 = arith.constant 4 : index
    %c0_40 = arith.constant 0 : index
    %c0_41 = arith.constant 0 : index
    %45 = vector.load %arg3[%c4, %c0_40, %c0_41] : memref<9x32x64xbf16, #tpu.memory_space<vmem>>, vector<1x32x64xbf16>
    %46 = vector.shape_cast %45 : vector<1x32x64xbf16> to vector<32x64xbf16>
    %cst_42 = arith.constant dense<0.000000e+00> : vector<128x64xf32>
    %47 = tpu.matmul %44, %46, %cst_42 {dimension_numbers = #tpu.dot_dimension_numbers<[1], [0], [0], [1], [0, 0, 1, 1], [], []>} : vector<128x32xbf16>, vector<32x64xbf16>, vector<128x64xf32> -> vector<128x64xf32>
    %48 = arith.addf %42, %47 : vector<128x64xf32>
    %c10 = arith.constant 10 : index
    %c0_43 = arith.constant 0 : index
    %49 = vector.load %arg10[%c10, %c0_43] : memref<152x32xf32, #tpu.memory_space<vmem>>, vector<128x32xf32>
    %50 = arith.truncf %49 : vector<128x32xf32> to vector<128x32xbf16>
    %c5 = arith.constant 5 : index
    %c0_44 = arith.constant 0 : index
    %c0_45 = arith.constant 0 : index
    %51 = vector.load %arg3[%c5, %c0_44, %c0_45] : memref<9x32x64xbf16, #tpu.memory_space<vmem>>, vector<1x32x64xbf16>
    %52 = vector.shape_cast %51 : vector<1x32x64xbf16> to vector<32x64xbf16>
    %cst_46 = arith.constant dense<0.000000e+00> : vector<128x64xf32>
    %53 = tpu.matmul %50, %52, %cst_46 {dimension_numbers = #tpu.dot_dimension_numbers<[1], [0], [0], [1], [0, 0, 1, 1], [], []>} : vector<128x32xbf16>, vector<32x64xbf16>, vector<128x64xf32> -> vector<128x64xf32>
    %54 = arith.addf %48, %53 : vector<128x64xf32>
    %c16 = arith.constant 16 : index
    %c0_47 = arith.constant 0 : index
    %55 = vector.load %arg10[%c16, %c0_47] : memref<152x32xf32, #tpu.memory_space<vmem>>, vector<128x32xf32>
    %56 = arith.truncf %55 : vector<128x32xf32> to vector<128x32xbf16>
    %c6 = arith.constant 6 : index
    %c0_48 = arith.constant 0 : index
    %c0_49 = arith.constant 0 : index
    %57 = vector.load %arg3[%c6, %c0_48, %c0_49] : memref<9x32x64xbf16, #tpu.memory_space<vmem>>, vector<1x32x64xbf16>
    %58 = vector.shape_cast %57 : vector<1x32x64xbf16> to vector<32x64xbf16>
    %cst_50 = arith.constant dense<0.000000e+00> : vector<128x64xf32>
    %59 = tpu.matmul %56, %58, %cst_50 {dimension_numbers = #tpu.dot_dimension_numbers<[1], [0], [0], [1], [0, 0, 1, 1], [], []>} : vector<128x32xbf16>, vector<32x64xbf16>, vector<128x64xf32> -> vector<128x64xf32>
    %60 = arith.addf %54, %59 : vector<128x64xf32>
    %c17 = arith.constant 17 : index
    %c0_51 = arith.constant 0 : index
    %61 = vector.load %arg10[%c17, %c0_51] : memref<152x32xf32, #tpu.memory_space<vmem>>, vector<128x32xf32>
    %62 = arith.truncf %61 : vector<128x32xf32> to vector<128x32xbf16>
    %c7 = arith.constant 7 : index
    %c0_52 = arith.constant 0 : index
    %c0_53 = arith.constant 0 : index
    %63 = vector.load %arg3[%c7, %c0_52, %c0_53] : memref<9x32x64xbf16, #tpu.memory_space<vmem>>, vector<1x32x64xbf16>
    %64 = vector.shape_cast %63 : vector<1x32x64xbf16> to vector<32x64xbf16>
    %cst_54 = arith.constant dense<0.000000e+00> : vector<128x64xf32>
    %65 = tpu.matmul %62, %64, %cst_54 {dimension_numbers = #tpu.dot_dimension_numbers<[1], [0], [0], [1], [0, 0, 1, 1], [], []>} : vector<128x32xbf16>, vector<32x64xbf16>, vector<128x64xf32> -> vector<128x64xf32>
    %66 = arith.addf %60, %65 : vector<128x64xf32>
    %c18 = arith.constant 18 : index
    %c0_55 = arith.constant 0 : index
    %67 = vector.load %arg10[%c18, %c0_55] : memref<152x32xf32, #tpu.memory_space<vmem>>, vector<128x32xf32>
    %68 = arith.truncf %67 : vector<128x32xf32> to vector<128x32xbf16>
    %c8_56 = arith.constant 8 : index
    %c0_57 = arith.constant 0 : index
    %c0_58 = arith.constant 0 : index
    %69 = vector.load %arg3[%c8_56, %c0_57, %c0_58] : memref<9x32x64xbf16, #tpu.memory_space<vmem>>, vector<1x32x64xbf16>
    %70 = vector.shape_cast %69 : vector<1x32x64xbf16> to vector<32x64xbf16>
    %cst_59 = arith.constant dense<0.000000e+00> : vector<128x64xf32>
    %71 = tpu.matmul %68, %70, %cst_59 {dimension_numbers = #tpu.dot_dimension_numbers<[1], [0], [0], [1], [0, 0, 1, 1], [], []>} : vector<128x32xbf16>, vector<32x64xbf16>, vector<128x64xf32> -> vector<128x64xf32>
    %72 = arith.addf %66, %71 : vector<128x64xf32>
    %cst_60 = arith.constant 0.000000e+00 : f32
    %73 = vector.broadcast %cst_60 : f32 to vector<128x64xf32>
    %74 = arith.maximumf %72, %73 : vector<128x64xf32>
    %c0_61 = arith.constant 0 : index
    %c0_62 = arith.constant 0 : index
    %75 = vector.load %arg11[%c0_61, %c0_62] : memref<152x64xf32, #tpu.memory_space<vmem>>, vector<128x64xf32>
    tpu.vector_store %arg11[%c0_61, %c0_62], %74 {strides = array<i32>} : memref<152x64xf32, #tpu.memory_space<vmem>>, vector<128x64xf32>,
    %c0_63 = arith.constant 0 : index
    %c0_64 = arith.constant 0 : index
    %76 = vector.load %arg6[%c0_63, %c0_64] : memref<1x128xf32, #tpu.memory_space<vmem>>, vector<1x128xf32>
    %77 = vector.shape_cast %76 : vector<1x128xf32> to vector<1x128xf32>
    %78 = vector.broadcast %77 : vector<1x128xf32> to vector<128x128xf32>
    %c0_65 = arith.constant 0 : index
    %c0_66 = arith.constant 0 : index
    %79 = vector.load %arg11[%c0_65, %c0_66] : memref<152x64xf32, #tpu.memory_space<vmem>>, vector<128x64xf32>
    %80 = arith.truncf %79 : vector<128x64xf32> to vector<128x64xbf16>
    %c0_67 = arith.constant 0 : index
    %c0_68 = arith.constant 0 : index
    %c0_69 = arith.constant 0 : index
    %81 = vector.load %arg5[%c0_67, %c0_68, %c0_69] : memref<9x64x128xbf16, #tpu.memory_space<vmem>>, vector<1x64x128xbf16>
    %82 = vector.shape_cast %81 : vector<1x64x128xbf16> to vector<64x128xbf16>
    %cst_70 = arith.constant dense<0.000000e+00> : vector<128x128xf32>
    %83 = tpu.matmul %80, %82, %cst_70 {dimension_numbers = #tpu.dot_dimension_numbers<[1], [0], [0], [1], [0, 0, 1, 1], [], []>} : vector<128x64xbf16>, vector<64x128xbf16>, vector<128x128xf32> -> vector<128x128xf32>
    %84 = arith.addf %78, %83 : vector<128x128xf32>
    %c1_71 = arith.constant 1 : index
    %c0_72 = arith.constant 0 : index
    %85 = vector.load %arg11[%c1_71, %c0_72] : memref<152x64xf32, #tpu.memory_space<vmem>>, vector<128x64xf32>
    %86 = arith.truncf %85 : vector<128x64xf32> to vector<128x64xbf16>
    %c1_73 = arith.constant 1 : index
    %c0_74 = arith.constant 0 : index
    %c0_75 = arith.constant 0 : index
    %87 = vector.load %arg5[%c1_73, %c0_74, %c0_75] : memref<9x64x128xbf16, #tpu.memory_space<vmem>>, vector<1x64x128xbf16>
    %88 = vector.shape_cast %87 : vector<1x64x128xbf16> to vector<64x128xbf16>
    %cst_76 = arith.constant dense<0.000000e+00> : vector<128x128xf32>
    %89 = tpu.matmul %86, %88, %cst_76 {dimension_numbers = #tpu.dot_dimension_numbers<[1], [0], [0], [1], [0, 0, 1, 1], [], []>} : vector<128x64xbf16>, vector<64x128xbf16>, vector<128x128xf32> -> vector<128x128xf32>
    %90 = arith.addf %84, %89 : vector<128x128xf32>
    %c2_77 = arith.constant 2 : index
    %c0_78 = arith.constant 0 : index
    %91 = vector.load %arg11[%c2_77, %c0_78] : memref<152x64xf32, #tpu.memory_space<vmem>>, vector<128x64xf32>
    %92 = arith.truncf %91 : vector<128x64xf32> to vector<128x64xbf16>
    %c2_79 = arith.constant 2 : index
    %c0_80 = arith.constant 0 : index
    %c0_81 = arith.constant 0 : index
    %93 = vector.load %arg5[%c2_79, %c0_80, %c0_81] : memref<9x64x128xbf16, #tpu.memory_space<vmem>>, vector<1x64x128xbf16>
    %94 = vector.shape_cast %93 : vector<1x64x128xbf16> to vector<64x128xbf16>
    %cst_82 = arith.constant dense<0.000000e+00> : vector<128x128xf32>
    %95 = tpu.matmul %92, %94, %cst_82 {dimension_numbers = #tpu.dot_dimension_numbers<[1], [0], [0], [1], [0, 0, 1, 1], [], []>} : vector<128x64xbf16>, vector<64x128xbf16>, vector<128x128xf32> -> vector<128x128xf32>
    %96 = arith.addf %90, %95 : vector<128x128xf32>
    %c8_83 = arith.constant 8 : index
    %c0_84 = arith.constant 0 : index
    %97 = vector.load %arg11[%c8_83, %c0_84] : memref<152x64xf32, #tpu.memory_space<vmem>>, vector<128x64xf32>
    %98 = arith.truncf %97 : vector<128x64xf32> to vector<128x64xbf16>
    %c3_85 = arith.constant 3 : index
    %c0_86 = arith.constant 0 : index
    %c0_87 = arith.constant 0 : index
    %99 = vector.load %arg5[%c3_85, %c0_86, %c0_87] : memref<9x64x128xbf16, #tpu.memory_space<vmem>>, vector<1x64x128xbf16>
    %100 = vector.shape_cast %99 : vector<1x64x128xbf16> to vector<64x128xbf16>
    %cst_88 = arith.constant dense<0.000000e+00> : vector<128x128xf32>
    %101 = tpu.matmul %98, %100, %cst_88 {dimension_numbers = #tpu.dot_dimension_numbers<[1], [0], [0], [1], [0, 0, 1, 1], [], []>} : vector<128x64xbf16>, vector<64x128xbf16>, vector<128x128xf32> -> vector<128x128xf32>
    %102 = arith.addf %96, %101 : vector<128x128xf32>
    %c9_89 = arith.constant 9 : index
    %c0_90 = arith.constant 0 : index
    %103 = vector.load %arg11[%c9_89, %c0_90] : memref<152x64xf32, #tpu.memory_space<vmem>>, vector<128x64xf32>
    %104 = arith.truncf %103 : vector<128x64xf32> to vector<128x64xbf16>
    %c4_91 = arith.constant 4 : index
    %c0_92 = arith.constant 0 : index
    %c0_93 = arith.constant 0 : index
    %105 = vector.load %arg5[%c4_91, %c0_92, %c0_93] : memref<9x64x128xbf16, #tpu.memory_space<vmem>>, vector<1x64x128xbf16>
    %106 = vector.shape_cast %105 : vector<1x64x128xbf16> to vector<64x128xbf16>
    %cst_94 = arith.constant dense<0.000000e+00> : vector<128x128xf32>
    %107 = tpu.matmul %104, %106, %cst_94 {dimension_numbers = #tpu.dot_dimension_numbers<[1], [0], [0], [1], [0, 0, 1, 1], [], []>} : vector<128x64xbf16>, vector<64x128xbf16>, vector<128x128xf32> -> vector<128x128xf32>
    %108 = arith.addf %102, %107 : vector<128x128xf32>
    %c10_95 = arith.constant 10 : index
    %c0_96 = arith.constant 0 : index
    %109 = vector.load %arg11[%c10_95, %c0_96] : memref<152x64xf32, #tpu.memory_space<vmem>>, vector<128x64xf32>
    %110 = arith.truncf %109 : vector<128x64xf32> to vector<128x64xbf16>
    %c5_97 = arith.constant 5 : index
    %c0_98 = arith.constant 0 : index
    %c0_99 = arith.constant 0 : index
    %111 = vector.load %arg5[%c5_97, %c0_98, %c0_99] : memref<9x64x128xbf16, #tpu.memory_space<vmem>>, vector<1x64x128xbf16>
    %112 = vector.shape_cast %111 : vector<1x64x128xbf16> to vector<64x128xbf16>
    %cst_100 = arith.constant dense<0.000000e+00> : vector<128x128xf32>
    %113 = tpu.matmul %110, %112, %cst_100 {dimension_numbers = #tpu.dot_dimension_numbers<[1], [0], [0], [1], [0, 0, 1, 1], [], []>} : vector<128x64xbf16>, vector<64x128xbf16>, vector<128x128xf32> -> vector<128x128xf32>
    %114 = arith.addf %108, %113 : vector<128x128xf32>
    %c16_101 = arith.constant 16 : index
    %c0_102 = arith.constant 0 : index
    %115 = vector.load %arg11[%c16_101, %c0_102] : memref<152x64xf32, #tpu.memory_space<vmem>>, vector<128x64xf32>
    %116 = arith.truncf %115 : vector<128x64xf32> to vector<128x64xbf16>
    %c6_103 = arith.constant 6 : index
    %c0_104 = arith.constant 0 : index
    %c0_105 = arith.constant 0 : index
    %117 = vector.load %arg5[%c6_103, %c0_104, %c0_105] : memref<9x64x128xbf16, #tpu.memory_space<vmem>>, vector<1x64x128xbf16>
    %118 = vector.shape_cast %117 : vector<1x64x128xbf16> to vector<64x128xbf16>
    %cst_106 = arith.constant dense<0.000000e+00> : vector<128x128xf32>
    %119 = tpu.matmul %116, %118, %cst_106 {dimension_numbers = #tpu.dot_dimension_numbers<[1], [0], [0], [1], [0, 0, 1, 1], [], []>} : vector<128x64xbf16>, vector<64x128xbf16>, vector<128x128xf32> -> vector<128x128xf32>
    %120 = arith.addf %114, %119 : vector<128x128xf32>
    %c17_107 = arith.constant 17 : index
    %c0_108 = arith.constant 0 : index
    %121 = vector.load %arg11[%c17_107, %c0_108] : memref<152x64xf32, #tpu.memory_space<vmem>>, vector<128x64xf32>
    %122 = arith.truncf %121 : vector<128x64xf32> to vector<128x64xbf16>
    %c7_109 = arith.constant 7 : index
    %c0_110 = arith.constant 0 : index
    %c0_111 = arith.constant 0 : index
    %123 = vector.load %arg5[%c7_109, %c0_110, %c0_111] : memref<9x64x128xbf16, #tpu.memory_space<vmem>>, vector<1x64x128xbf16>
    %124 = vector.shape_cast %123 : vector<1x64x128xbf16> to vector<64x128xbf16>
    %cst_112 = arith.constant dense<0.000000e+00> : vector<128x128xf32>
    %125 = tpu.matmul %122, %124, %cst_112 {dimension_numbers = #tpu.dot_dimension_numbers<[1], [0], [0], [1], [0, 0, 1, 1], [], []>} : vector<128x64xbf16>, vector<64x128xbf16>, vector<128x128xf32> -> vector<128x128xf32>
    %126 = arith.addf %120, %125 : vector<128x128xf32>
    %c18_113 = arith.constant 18 : index
    %c0_114 = arith.constant 0 : index
    %127 = vector.load %arg11[%c18_113, %c0_114] : memref<152x64xf32, #tpu.memory_space<vmem>>, vector<128x64xf32>
    %128 = arith.truncf %127 : vector<128x64xf32> to vector<128x64xbf16>
    %c8_115 = arith.constant 8 : index
    %c0_116 = arith.constant 0 : index
    %c0_117 = arith.constant 0 : index
    %129 = vector.load %arg5[%c8_115, %c0_116, %c0_117] : memref<9x64x128xbf16, #tpu.memory_space<vmem>>, vector<1x64x128xbf16>
    %130 = vector.shape_cast %129 : vector<1x64x128xbf16> to vector<64x128xbf16>
    %cst_118 = arith.constant dense<0.000000e+00> : vector<128x128xf32>
    %131 = tpu.matmul %128, %130, %cst_118 {dimension_numbers = #tpu.dot_dimension_numbers<[1], [0], [0], [1], [0, 0, 1, 1], [], []>} : vector<128x64xbf16>, vector<64x128xbf16>, vector<128x128xf32> -> vector<128x128xf32>
    %132 = arith.addf %126, %131 : vector<128x128xf32>
    %cst_119 = arith.constant 0.000000e+00 : f32
    %133 = vector.broadcast %cst_119 : f32 to vector<128x128xf32>
    %134 = arith.maximumf %132, %133 : vector<128x128xf32>
    %c0_120 = arith.constant 0 : index
    %c0_121 = arith.constant 0 : index
    %135 = vector.load %arg12[%c0_120, %c0_121] : memref<152x128xf32, #tpu.memory_space<vmem>>, vector<128x128xf32>
    tpu.vector_store %arg12[%c0_120, %c0_121], %134 {strides = array<i32>} : memref<152x128xf32, #tpu.memory_space<vmem>>, vector<128x128xf32>,
    %c0_122 = arith.constant 0 : index
    %c0_123 = arith.constant 0 : index
    %136 = vector.load %arg8[%c0_122, %c0_123] : memref<1x256xf32, #tpu.memory_space<vmem>>, vector<1x256xf32>
    %137 = vector.shape_cast %136 : vector<1x256xf32> to vector<1x256xf32>
    %138 = vector.broadcast %137 : vector<1x256xf32> to vector<128x256xf32>
    %c0_124 = arith.constant 0 : index
    %c0_125 = arith.constant 0 : index
    %139 = vector.load %arg12[%c0_124, %c0_125] : memref<152x128xf32, #tpu.memory_space<vmem>>, vector<128x128xf32>
    %140 = arith.truncf %139 : vector<128x128xf32> to vector<128x128xbf16>
    %c0_126 = arith.constant 0 : index
    %c0_127 = arith.constant 0 : index
    %c0_128 = arith.constant 0 : index
    %141 = vector.load %arg7[%c0_126, %c0_127, %c0_128] : memref<9x128x256xbf16, #tpu.memory_space<vmem>>, vector<1x128x256xbf16>
    %142 = vector.shape_cast %141 : vector<1x128x256xbf16> to vector<128x256xbf16>
    %cst_129 = arith.constant dense<0.000000e+00> : vector<128x256xf32>
    %143 = tpu.matmul %140, %142, %cst_129 {dimension_numbers = #tpu.dot_dimension_numbers<[1], [0], [0], [1], [0, 0, 1, 1], [], []>} : vector<128x128xbf16>, vector<128x256xbf16>, vector<128x256xf32> -> vector<128x256xf32>
    %144 = arith.addf %138, %143 : vector<128x256xf32>
    %c1_130 = arith.constant 1 : index
    %c0_131 = arith.constant 0 : index
    %145 = vector.load %arg12[%c1_130, %c0_131] : memref<152x128xf32, #tpu.memory_space<vmem>>, vector<128x128xf32>
    %146 = arith.truncf %145 : vector<128x128xf32> to vector<128x128xbf16>
    %c1_132 = arith.constant 1 : index
    %c0_133 = arith.constant 0 : index
    %c0_134 = arith.constant 0 : index
    %147 = vector.load %arg7[%c1_132, %c0_133, %c0_134] : memref<9x128x256xbf16, #tpu.memory_space<vmem>>, vector<1x128x256xbf16>
    %148 = vector.shape_cast %147 : vector<1x128x256xbf16> to vector<128x256xbf16>
    %cst_135 = arith.constant dense<0.000000e+00> : vector<128x256xf32>
    %149 = tpu.matmul %146, %148, %cst_135 {dimension_numbers = #tpu.dot_dimension_numbers<[1], [0], [0], [1], [0, 0, 1, 1], [], []>} : vector<128x128xbf16>, vector<128x256xbf16>, vector<128x256xf32> -> vector<128x256xf32>
    %150 = arith.addf %144, %149 : vector<128x256xf32>
    %c2_136 = arith.constant 2 : index
    %c0_137 = arith.constant 0 : index
    %151 = vector.load %arg12[%c2_136, %c0_137] : memref<152x128xf32, #tpu.memory_space<vmem>>, vector<128x128xf32>
    %152 = arith.truncf %151 : vector<128x128xf32> to vector<128x128xbf16>
    %c2_138 = arith.constant 2 : index
    %c0_139 = arith.constant 0 : index
    %c0_140 = arith.constant 0 : index
    %153 = vector.load %arg7[%c2_138, %c0_139, %c0_140] : memref<9x128x256xbf16, #tpu.memory_space<vmem>>, vector<1x128x256xbf16>
    %154 = vector.shape_cast %153 : vector<1x128x256xbf16> to vector<128x256xbf16>
    %cst_141 = arith.constant dense<0.000000e+00> : vector<128x256xf32>
    %155 = tpu.matmul %152, %154, %cst_141 {dimension_numbers = #tpu.dot_dimension_numbers<[1], [0], [0], [1], [0, 0, 1, 1], [], []>} : vector<128x128xbf16>, vector<128x256xbf16>, vector<128x256xf32> -> vector<128x256xf32>
    %156 = arith.addf %150, %155 : vector<128x256xf32>
    %c8_142 = arith.constant 8 : index
    %c0_143 = arith.constant 0 : index
    %157 = vector.load %arg12[%c8_142, %c0_143] : memref<152x128xf32, #tpu.memory_space<vmem>>, vector<128x128xf32>
    %158 = arith.truncf %157 : vector<128x128xf32> to vector<128x128xbf16>
    %c3_144 = arith.constant 3 : index
    %c0_145 = arith.constant 0 : index
    %c0_146 = arith.constant 0 : index
    %159 = vector.load %arg7[%c3_144, %c0_145, %c0_146] : memref<9x128x256xbf16, #tpu.memory_space<vmem>>, vector<1x128x256xbf16>
    %160 = vector.shape_cast %159 : vector<1x128x256xbf16> to vector<128x256xbf16>
    %cst_147 = arith.constant dense<0.000000e+00> : vector<128x256xf32>
    %161 = tpu.matmul %158, %160, %cst_147 {dimension_numbers = #tpu.dot_dimension_numbers<[1], [0], [0], [1], [0, 0, 1, 1], [], []>} : vector<128x128xbf16>, vector<128x256xbf16>, vector<128x256xf32> -> vector<128x256xf32>
    %162 = arith.addf %156, %161 : vector<128x256xf32>
    %c9_148 = arith.constant 9 : index
    %c0_149 = arith.constant 0 : index
    %163 = vector.load %arg12[%c9_148, %c0_149] : memref<152x128xf32, #tpu.memory_space<vmem>>, vector<128x128xf32>
    %164 = arith.truncf %163 : vector<128x128xf32> to vector<128x128xbf16>
    %c4_150 = arith.constant 4 : index
    %c0_151 = arith.constant 0 : index
    %c0_152 = arith.constant 0 : index
    %165 = vector.load %arg7[%c4_150, %c0_151, %c0_152] : memref<9x128x256xbf16, #tpu.memory_space<vmem>>, vector<1x128x256xbf16>
    %166 = vector.shape_cast %165 : vector<1x128x256xbf16> to vector<128x256xbf16>
    %cst_153 = arith.constant dense<0.000000e+00> : vector<128x256xf32>
    %167 = tpu.matmul %164, %166, %cst_153 {dimension_numbers = #tpu.dot_dimension_numbers<[1], [0], [0], [1], [0, 0, 1, 1], [], []>} : vector<128x128xbf16>, vector<128x256xbf16>, vector<128x256xf32> -> vector<128x256xf32>
    %168 = arith.addf %162, %167 : vector<128x256xf32>
    %c10_154 = arith.constant 10 : index
    %c0_155 = arith.constant 0 : index
    %169 = vector.load %arg12[%c10_154, %c0_155] : memref<152x128xf32, #tpu.memory_space<vmem>>, vector<128x128xf32>
    %170 = arith.truncf %169 : vector<128x128xf32> to vector<128x128xbf16>
    %c5_156 = arith.constant 5 : index
    %c0_157 = arith.constant 0 : index
    %c0_158 = arith.constant 0 : index
    %171 = vector.load %arg7[%c5_156, %c0_157, %c0_158] : memref<9x128x256xbf16, #tpu.memory_space<vmem>>, vector<1x128x256xbf16>
    %172 = vector.shape_cast %171 : vector<1x128x256xbf16> to vector<128x256xbf16>
    %cst_159 = arith.constant dense<0.000000e+00> : vector<128x256xf32>
    %173 = tpu.matmul %170, %172, %cst_159 {dimension_numbers = #tpu.dot_dimension_numbers<[1], [0], [0], [1], [0, 0, 1, 1], [], []>} : vector<128x128xbf16>, vector<128x256xbf16>, vector<128x256xf32> -> vector<128x256xf32>
    %174 = arith.addf %168, %173 : vector<128x256xf32>
    %c16_160 = arith.constant 16 : index
    %c0_161 = arith.constant 0 : index
    %175 = vector.load %arg12[%c16_160, %c0_161] : memref<152x128xf32, #tpu.memory_space<vmem>>, vector<128x128xf32>
    %176 = arith.truncf %175 : vector<128x128xf32> to vector<128x128xbf16>
    %c6_162 = arith.constant 6 : index
    %c0_163 = arith.constant 0 : index
    %c0_164 = arith.constant 0 : index
    %177 = vector.load %arg7[%c6_162, %c0_163, %c0_164] : memref<9x128x256xbf16, #tpu.memory_space<vmem>>, vector<1x128x256xbf16>
    %178 = vector.shape_cast %177 : vector<1x128x256xbf16> to vector<128x256xbf16>
    %cst_165 = arith.constant dense<0.000000e+00> : vector<128x256xf32>
    %179 = tpu.matmul %176, %178, %cst_165 {dimension_numbers = #tpu.dot_dimension_numbers<[1], [0], [0], [1], [0, 0, 1, 1], [], []>} : vector<128x128xbf16>, vector<128x256xbf16>, vector<128x256xf32> -> vector<128x256xf32>
    %180 = arith.addf %174, %179 : vector<128x256xf32>
    %c17_166 = arith.constant 17 : index
    %c0_167 = arith.constant 0 : index
    %181 = vector.load %arg12[%c17_166, %c0_167] : memref<152x128xf32, #tpu.memory_space<vmem>>, vector<128x128xf32>
    %182 = arith.truncf %181 : vector<128x128xf32> to vector<128x128xbf16>
    %c7_168 = arith.constant 7 : index
    %c0_169 = arith.constant 0 : index
    %c0_170 = arith.constant 0 : index
    %183 = vector.load %arg7[%c7_168, %c0_169, %c0_170] : memref<9x128x256xbf16, #tpu.memory_space<vmem>>, vector<1x128x256xbf16>
    %184 = vector.shape_cast %183 : vector<1x128x256xbf16> to vector<128x256xbf16>
    %cst_171 = arith.constant dense<0.000000e+00> : vector<128x256xf32>
    %185 = tpu.matmul %182, %184, %cst_171 {dimension_numbers = #tpu.dot_dimension_numbers<[1], [0], [0], [1], [0, 0, 1, 1], [], []>} : vector<128x128xbf16>, vector<128x256xbf16>, vector<128x256xf32> -> vector<128x256xf32>
    %186 = arith.addf %180, %185 : vector<128x256xf32>
    %c18_172 = arith.constant 18 : index
    %c0_173 = arith.constant 0 : index
    %187 = vector.load %arg12[%c18_172, %c0_173] : memref<152x128xf32, #tpu.memory_space<vmem>>, vector<128x128xf32>
    %188 = arith.truncf %187 : vector<128x128xf32> to vector<128x128xbf16>
    %c8_174 = arith.constant 8 : index
    %c0_175 = arith.constant 0 : index
    %c0_176 = arith.constant 0 : index
    %189 = vector.load %arg7[%c8_174, %c0_175, %c0_176] : memref<9x128x256xbf16, #tpu.memory_space<vmem>>, vector<1x128x256xbf16>
    %190 = vector.shape_cast %189 : vector<1x128x256xbf16> to vector<128x256xbf16>
    %cst_177 = arith.constant dense<0.000000e+00> : vector<128x256xf32>
    %191 = tpu.matmul %188, %190, %cst_177 {dimension_numbers = #tpu.dot_dimension_numbers<[1], [0], [0], [1], [0, 0, 1, 1], [], []>} : vector<128x128xbf16>, vector<128x256xbf16>, vector<128x256xf32> -> vector<128x256xf32>
    %192 = arith.addf %186, %191 : vector<128x256xf32>
    %c0_178 = arith.constant 0 : index
    %c0_179 = arith.constant 0 : index
    %193 = vector.load %arg9[%c0_178, %c0_179] : memref<128x256xf32, #tpu.memory_space<vmem>>, vector<128x256xf32>
    tpu.vector_store %arg9[%c0_178, %c0_179], %192 {strides = array<i32>} : memref<128x256xf32, #tpu.memory_space<vmem>>, vector<128x256xf32>,
    return
  }
}

</mosaic_0001>

<bundles_post_ra>
// kernel: squeeze.1
= control target key start
LH: loop header
LB: loop body
LE: loop exit
PB: predicated region body
PF: predicated region fallthrough
CT: control target
= control target key end

     0   :  { %2 = vsyncpa [#allocation1], 0  ;;  %s897_s8 = smov [#allocation0]   ;;  %s1708_s0 = inlined_call_operand.hbm [shape: f32[2,1,40,40], index: 0, kind: input, shape index: {}]   ;;  %s1709_s1 = inlined_call_operand.vmem [shape: f32[2,8,5,8,5], index: 1, kind: output, shape index: {}]  }
   0x1   :  { %s6_s0 = sshll.u32 %s1708_s0, 4  ;;  %s8_s9 = sshll.u32 %s897_s8, 4  ;;  %s7_s0 = int_to_ptr.hbm [resolvable:$true] %s6_s0  ;;  %s9_s9 = int_to_ptr.vmem [resolvable:$true] %s8_s9 }
   0x2   :  { %11 = dma.hbm_to_vmem [thread:$0]  %s7_s0, 1280, %s9_s9, [#allocation1]  }
   0x3   :  { %895 = dma.done.wait [#allocation1], 1280  }
   0x4   :  { %896 = vsyncadd [#allocation1], 4294966016  ;;  %v918_v0 = vld [vmem:[#allocation0] sm:$0xff]   ;;  %v920_v1 = vld [vmem:[#allocation0 + $0x10] sm:$0xff]   ;;  %s898_s10 = smov 123   ;;  %s899_s11 = smov 118  }
   0x5   :  { %82 = vrot.lane.b32.xlu0 %v918_v0, %s898_s10  ;;  %100 = vrot.lane.b32.xlu1 %v920_v1, %s898_s10  ;;  %v924_v2 = vld [vmem:[#allocation0 + $0x20] sm:$0xff]   ;;  %v927_v3 = vld [vmem:[#allocation0 + $0x8] sm:$0xff]   ;;  %v929_v4 = vld [vmem:[#allocation0 + $0x18] sm:$0xff]   ;;  %s900_s12 = smov 113   ;;  %s901_s13 = smov 108   ;;  %vm15_vm0 = vcmask 39936  }
   0x6   :  { %118 = vrot.lane.b32.xlu2 %v924_v2, %s898_s10  ;;  %v931_v5 = vld [vmem:[#allocation0 + $0x28] sm:$0xff]   ;;  %v936_v6 = vld [vmem:[#allocation0 + $0x30] sm:$0xff]   ;;  %v938_v7 = vld [vmem:[#allocation0 + $0x38] sm:$0xff]   ;;  %16 = vst.msk [vmem:[%s1709_s1] ss:$8 sm:$0xf] %vm15_vm0, %v918_v0  }
   0x7   :  { %v940_v8 = vld [vmem:[#allocation0 + $0x40] sm:$0xff]   ;;  %v945_v9 = vld [vmem:[#allocation0 + $0x48] sm:$0xff]   ;;  %17 = vst.msk [vmem:[%s1709_s1] ss:$8 sm:$0xf0] %vm15_vm0, %v918_v0   ;;  %s903_s2 = smov 98  }
   0x8   :  { %705 = vst.msk [vmem:[%s1709_s1 + $0x40] ss:$8 sm:$0xf] %vm15_vm0, %v927_v3   ;;  %s904_s19 = smov 93  }
   0x9   :  { %706 = vst.msk [vmem:[%s1709_s1 + $0x40] ss:$8 sm:$0xf0] %vm15_vm0, %v927_v3  }
   0xa   :  { %707 = vst.msk [vmem:[%s1709_s1 + $0x80] ss:$8 sm:$0xf] %vm15_vm0, %v920_v1  }
   0xb   :  { %708 = vst.msk [vmem:[%s1709_s1 + $0x80] ss:$8 sm:$0xf0] %vm15_vm0, %v920_v1  }
   0xc   :  { %709 = vst.msk [vmem:[%s1709_s1 + $0xc0] ss:$8 sm:$0xf] %vm15_vm0, %v929_v4  }
   0xd   :  { %91 = vrot.lane.b32.xlu0 %v927_v3, %s898_s10  ;;  %109 = vrot.lane.b32.xlu1 %v929_v4, %s898_s10  ;;  %710 = vst.msk [vmem:[%s1709_s1 + $0xc0] ss:$8 sm:$0xf0] %vm15_vm0, %v929_v4  }
   0xe   :  { %127 = vrot.lane.b32.xlu2 %v931_v5, %s898_s10  ;;  %711 = vst.msk [vmem:[%s1709_s1 + $0x100] ss:$8 sm:$0xf] %vm15_vm0, %v924_v2  }
   0xf   :  { %712 = vst.msk [vmem:[%s1709_s1 + $0x100] ss:$8 sm:$0xf0] %vm15_vm0, %v924_v2  }
  0x10   :  { %713 = vst.msk [vmem:[%s1709_s1 + $0x140] ss:$8 sm:$0xf] %vm15_vm0, %v931_v5  }
  0x11   :  { %714 = vst.msk [vmem:[%s1709_s1 + $0x140] ss:$8 sm:$0xf0] %vm15_vm0, %v931_v5  }
  0x12   :  { %715 = vst.msk [vmem:[%s1709_s1 + $0x180] ss:$8 sm:$0xf] %vm15_vm0, %v936_v6  }
  0x13   :  { %716 = vst.msk [vmem:[%s1709_s1 + $0x180] ss:$8 sm:$0xf0] %vm15_vm0, %v936_v6  }
  0x14   :  { %717 = vst.msk [vmem:[%s1709_s1 + $0x1c0] ss:$8 sm:$0xf] %vm15_vm0, %v938_v7  }
  0x15   :  { %136 = vrot.lane.b32.xlu0 %v936_v6, %s898_s10  ;;  %145 = vrot.lane.b32.xlu1 %v938_v7, %s898_s10  ;;  %718 = vst.msk [vmem:[%s1709_s1 + $0x1c0] ss:$8 sm:$0xf0] %vm15_vm0, %v938_v7  }
  0x16   :  { %154 = vrot.lane.b32.xlu2 %v940_v8, %s898_s10  ;;  %719 = vst.msk [vmem:[%s1709_s1 + $0x200] ss:$8 sm:$0xf] %vm15_vm0, %v940_v8  }
  0x17   :  { %720 = vst.msk [vmem:[%s1709_s1 + $0x200] ss:$8 sm:$0xf0] %vm15_vm0, %v940_v8  }
  0x18   :  { %721 = vst.msk [vmem:[%s1709_s1 + $0x240] ss:$8 sm:$0xf] %vm15_vm0, %v945_v9  }
  0x19   :  { %722 = vst.msk [vmem:[%s1709_s1 + $0x240] ss:$8 sm:$0xf0] %vm15_vm0, %v945_v9  }
  0x1d   :  { %163 = vrot.lane.b32.xlu0 %v945_v9, %s898_s10  ;;  %171 = vrot.lane.b32.xlu1 %v918_v0, %s899_s11 }
  0x1e   :  { %180 = vrot.lane.b32.xlu2 %v927_v3, %s899_s11 }
  0x25   :  { %189 = vrot.lane.b32.xlu0 %v920_v1, %s899_s11  ;;  %198 = vrot.lane.b32.xlu1 %v929_v4, %s899_s11 }
  0x26   :  { %207 = vrot.lane.b32.xlu2 %v924_v2, %s899_s11 }
  0x2d   :  { %216 = vrot.lane.b32.xlu0 %v931_v5, %s899_s11  ;;  %225 = vrot.lane.b32.xlu1 %v936_v6, %s899_s11 }
  0x2e   :  { %234 = vrot.lane.b32.xlu2 %v938_v7, %s899_s11 }
  0x35   :  { %243 = vrot.lane.b32.xlu0 %v940_v8, %s899_s11  ;;  %252 = vrot.lane.b32.xlu1 %v945_v9, %s899_s11 }
  0x36   :  { %260 = vrot.lane.b32.xlu2 %v918_v0, %s900_s12 }
  0x3d   :  { %269 = vrot.lane.b32.xlu0 %v927_v3, %s900_s12  ;;  %278 = vrot.lane.b32.xlu1 %v920_v1, %s900_s12 }
  0x3e   :  { %287 = vrot.lane.b32.xlu2 %v929_v4, %s900_s12 }
  0x45   :  { %296 = vrot.lane.b32.xlu0 %v924_v2, %s900_s12  ;;  %305 = vrot.lane.b32.xlu1 %v931_v5, %s900_s12 }
  0x46   :  { %314 = vrot.lane.b32.xlu2 %v936_v6, %s900_s12 }
  0x4d   :  { %323 = vrot.lane.b32.xlu0 %v938_v7, %s900_s12  ;;  %332 = vrot.lane.b32.xlu1 %v940_v8, %s900_s12 }
  0x4e   :  { %341 = vrot.lane.b32.xlu2 %v945_v9, %s900_s12 }
  0x55   :  { %349 = vrot.lane.b32.xlu0 %v918_v0, %s901_s13  ;;  %358 = vrot.lane.b32.xlu1 %v927_v3, %s901_s13 }
  0x56   :  { %367 = vrot.lane.b32.xlu2 %v920_v1, %s901_s13 }
  0x5d   :  { %376 = vrot.lane.b32.xlu0 %v929_v4, %s901_s13  ;;  %385 = vrot.lane.b32.xlu1 %v924_v2, %s901_s13 }
  0x5e   :  { %394 = vrot.lane.b32.xlu2 %v931_v5, %s901_s13 }
  0x60   :  { %v119_v10 = vpop.permute.xlu2 %118  }
  0x61   :  { %731 = vst.msk [vmem:[%s1709_s1 + $0x101] ss:$8 sm:$0xf] %vm15_vm0, %v119_v10  }
  0x62   :  { %732 = vst.msk [vmem:[%s1709_s1 + $0x101] ss:$8 sm:$0xf0] %vm15_vm0, %v119_v10  }
  0x65   :  { %403 = vrot.lane.b32.xlu0 %v936_v6, %s901_s13  ;;  %412 = vrot.lane.b32.xlu1 %v938_v7, %s901_s13 }
  0x66   :  { %421 = vrot.lane.b32.xlu2 %v940_v8, %s901_s13 }
  0x68   :  { %v128_v11 = vpop.permute.xlu2 %127  }
  0x69   :  { %733 = vst.msk [vmem:[%s1709_s1 + $0x141] ss:$8 sm:$0xf] %vm15_vm0, %v128_v11  }
  0x6a   :  { %734 = vst.msk [vmem:[%s1709_s1 + $0x141] ss:$8 sm:$0xf0] %vm15_vm0, %v128_v11  }
  0x6d   :  { %430 = vrot.lane.b32.xlu0 %v945_v9, %s901_s13  ;;  %s902_s13 = smov 103  }
  0x6e   :  { %438 = vrot.lane.b32.xlu1 %v918_v0, %s902_s13  ;;  %447 = vrot.lane.b32.xlu2 %v927_v3, %s902_s13 }
  0x70   :  { %v155_v12 = vpop.permute.xlu2 %154  }
  0x71   :  { %739 = vst.msk [vmem:[%s1709_s1 + $0x201] ss:$8 sm:$0xf] %vm15_vm0, %v155_v12  }
  0x72   :  { %740 = vst.msk [vmem:[%s1709_s1 + $0x201] ss:$8 sm:$0xf0] %vm15_vm0, %v155_v12  }
  0x75   :  { %456 = vrot.lane.b32.xlu0 %v920_v1, %s902_s13 }
  0x76   :  { %465 = vrot.lane.b32.xlu1 %v929_v4, %s902_s13  ;;  %474 = vrot.lane.b32.xlu2 %v924_v2, %s902_s13 }
  0x77   :  { %v83_v13 = vpop.permute.xlu0 %82   ;;  %v101_v14 = vpop.permute.xlu1 %100  }
  0x78   :  { %723 = vst.msk [vmem:[%s1709_s1 + $0x1] ss:$8 sm:$0xf] %vm15_vm0, %v83_v13   ;;  %v181_v15 = vpop.permute.xlu2 %180  }
  0x79   :  { %724 = vst.msk [vmem:[%s1709_s1 + $0x1] ss:$8 sm:$0xf0] %vm15_vm0, %v83_v13  }
  0x7a   :  { %727 = vst.msk [vmem:[%s1709_s1 + $0x81] ss:$8 sm:$0xf] %vm15_vm0, %v101_v14  }
  0x7b   :  { %728 = vst.msk [vmem:[%s1709_s1 + $0x81] ss:$8 sm:$0xf0] %vm15_vm0, %v101_v14  }
  0x7c   :  { %745 = vst.msk [vmem:[%s1709_s1 + $0x42] ss:$8 sm:$0xf] %vm15_vm0, %v181_v15  }
  0x7d   :  { %483 = vrot.lane.b32.xlu0 %v931_v5, %s902_s13  ;;  %746 = vst.msk [vmem:[%s1709_s1 + $0x42] ss:$8 sm:$0xf0] %vm15_vm0, %v181_v15  }
  0x7e   :  { %492 = vrot.lane.b32.xlu1 %v936_v6, %s902_s13  ;;  %501 = vrot.lane.b32.xlu2 %v938_v7, %s902_s13 }
  0x7f   :  { %v92_v16 = vpop.permute.xlu0 %91   ;;  %v110_v17 = vpop.permute.xlu1 %109  }
  0x80   :  { %725 = vst.msk [vmem:[%s1709_s1 + $0x41] ss:$8 sm:$0xf] %vm15_vm0, %v92_v16   ;;  %v208_v18 = vpop.permute.xlu2 %207  }
  0x81   :  { %726 = vst.msk [vmem:[%s1709_s1 + $0x41] ss:$8 sm:$0xf0] %vm15_vm0, %v92_v16  }
  0x82   :  { %729 = vst.msk [vmem:[%s1709_s1 + $0xc1] ss:$8 sm:$0xf] %vm15_vm0, %v110_v17  }
  0x83   :  { %730 = vst.msk [vmem:[%s1709_s1 + $0xc1] ss:$8 sm:$0xf0] %vm15_vm0, %v110_v17  }
  0x84   :  { %751 = vst.msk [vmem:[%s1709_s1 + $0x102] ss:$8 sm:$0xf] %vm15_vm0, %v208_v18  }
  0x85   :  { %510 = vrot.lane.b32.xlu0 %v940_v8, %s902_s13  ;;  %752 = vst.msk [vmem:[%s1709_s1 + $0x102] ss:$8 sm:$0xf0] %vm15_vm0, %v208_v18  }
  0x86   :  { %519 = vrot.lane.b32.xlu1 %v945_v9, %s902_s13  ;;  %527 = vrot.lane.b32.xlu2 %v918_v0, %s903_s2 }
  0x87   :  { %v137_v19 = vpop.permute.xlu0 %136   ;;  %v146_v20 = vpop.permute.xlu1 %145  }
  0x88   :  { %735 = vst.msk [vmem:[%s1709_s1 + $0x181] ss:$8 sm:$0xf] %vm15_vm0, %v137_v19   ;;  %v235_v21 = vpop.permute.xlu2 %234  }
  0x89   :  { %736 = vst.msk [vmem:[%s1709_s1 + $0x181] ss:$8 sm:$0xf0] %vm15_vm0, %v137_v19  }
  0x8a   :  { %737 = vst.msk [vmem:[%s1709_s1 + $0x1c1] ss:$8 sm:$0xf] %vm15_vm0, %v146_v20  }
  0x8b   :  { %738 = vst.msk [vmem:[%s1709_s1 + $0x1c1] ss:$8 sm:$0xf0] %vm15_vm0, %v146_v20  }
  0x8c   :  { %757 = vst.msk [vmem:[%s1709_s1 + $0x1c2] ss:$8 sm:$0xf] %vm15_vm0, %v235_v21  }
  0x8d   :  { %536 = vrot.lane.b32.xlu0 %v927_v3, %s903_s2  ;;  %758 = vst.msk [vmem:[%s1709_s1 + $0x1c2] ss:$8 sm:$0xf0] %vm15_vm0, %v235_v21  }
  0x8e   :  { %545 = vrot.lane.b32.xlu1 %v920_v1, %s903_s2  ;;  %554 = vrot.lane.b32.xlu2 %v929_v4, %s903_s2 }
  0x8f   :  { %v164_v22 = vpop.permute.xlu0 %163   ;;  %v172_v23 = vpop.permute.xlu1 %171  }
  0x90   :  { %741 = vst.msk [vmem:[%s1709_s1 + $0x241] ss:$8 sm:$0xf] %vm15_vm0, %v164_v22   ;;  %v261_v24 = vpop.permute.xlu2 %260  }
  0x91   :  { %742 = vst.msk [vmem:[%s1709_s1 + $0x241] ss:$8 sm:$0xf0] %vm15_vm0, %v164_v22  }
  0x92   :  { %743 = vst.msk [vmem:[%s1709_s1 + $0x2] ss:$8 sm:$0xf] %vm15_vm0, %v172_v23  }
  0x93   :  { %744 = vst.msk [vmem:[%s1709_s1 + $0x2] ss:$8 sm:$0xf0] %vm15_vm0, %v172_v23  }
  0x94   :  { %763 = vst.msk [vmem:[%s1709_s1 + $0x3] ss:$8 sm:$0xf] %vm15_vm0, %v261_v24  }
  0x95   :  { %563 = vrot.lane.b32.xlu0 %v924_v2, %s903_s2  ;;  %764 = vst.msk [vmem:[%s1709_s1 + $0x3] ss:$8 sm:$0xf0] %vm15_vm0, %v261_v24  }
  0x96   :  { %572 = vrot.lane.b32.xlu1 %v931_v5, %s903_s2  ;;  %581 = vrot.lane.b32.xlu2 %v936_v6, %s903_s2 }
  0x97   :  { %v190_v25 = vpop.permute.xlu0 %189   ;;  %v199_v26 = vpop.permute.xlu1 %198  }
  0x98   :  { %747 = vst.msk [vmem:[%s1709_s1 + $0x82] ss:$8 sm:$0xf] %vm15_vm0, %v190_v25   ;;  %v288_v27 = vpop.permute.xlu2 %287  }
  0x99   :  { %748 = vst.msk [vmem:[%s1709_s1 + $0x82] ss:$8 sm:$0xf0] %vm15_vm0, %v190_v25  }
  0x9a   :  { %749 = vst.msk [vmem:[%s1709_s1 + $0xc2] ss:$8 sm:$0xf] %vm15_vm0, %v199_v26  }
  0x9b   :  { %750 = vst.msk [vmem:[%s1709_s1 + $0xc2] ss:$8 sm:$0xf0] %vm15_vm0, %v199_v26  }
  0x9c   :  { %769 = vst.msk [vmem:[%s1709_s1 + $0xc3] ss:$8 sm:$0xf] %vm15_vm0, %v288_v27  }
  0x9d   :  { %590 = vrot.lane.b32.xlu0 %v938_v7, %s903_s2  ;;  %770 = vst.msk [vmem:[%s1709_s1 + $0xc3] ss:$8 sm:$0xf0] %vm15_vm0, %v288_v27  }
  0x9e   :  { %599 = vrot.lane.b32.xlu1 %v940_v8, %s903_s2  ;;  %608 = vrot.lane.b32.xlu2 %v945_v9, %s903_s2 }
  0x9f   :  { %v217_v28 = vpop.permute.xlu0 %216   ;;  %v226_v29 = vpop.permute.xlu1 %225  }
  0xa0   :  { %753 = vst.msk [vmem:[%s1709_s1 + $0x142] ss:$8 sm:$0xf] %vm15_vm0, %v217_v28   ;;  %v315_v30 = vpop.permute.xlu2 %314  }
  0xa1   :  { %754 = vst.msk [vmem:[%s1709_s1 + $0x142] ss:$8 sm:$0xf0] %vm15_vm0, %v217_v28  }
  0xa2   :  { %755 = vst.msk [vmem:[%s1709_s1 + $0x182] ss:$8 sm:$0xf] %vm15_vm0, %v226_v29  }
  0xa3   :  { %756 = vst.msk [vmem:[%s1709_s1 + $0x182] ss:$8 sm:$0xf0] %vm15_vm0, %v226_v29  }
  0xa4   :  { %775 = vst.msk [vmem:[%s1709_s1 + $0x183] ss:$8 sm:$0xf] %vm15_vm0, %v315_v30  }
  0xa5   :  { %616 = vrot.lane.b32.xlu0 %v918_v0, %s904_s19  ;;  %776 = vst.msk [vmem:[%s1709_s1 + $0x183] ss:$8 sm:$0xf0] %vm15_vm0, %v315_v30  }
  0xa6   :  { %625 = vrot.lane.b32.xlu1 %v927_v3, %s904_s19  ;;  %634 = vrot.lane.b32.xlu2 %v920_v1, %s904_s19 }
  0xa7   :  { %v244_v31 = vpop.permute.xlu0 %243   ;;  %v253_v32 = vpop.permute.xlu1 %252  }
  0xa8   :  { %759 = vst.msk [vmem:[%s1709_s1 + $0x202] ss:$8 sm:$0xf] %vm15_vm0, %v244_v31   ;;  %v342_v33 = vpop.permute.xlu2 %341  }
  0xa9   :  { %760 = vst.msk [vmem:[%s1709_s1 + $0x202] ss:$8 sm:$0xf0] %vm15_vm0, %v244_v31  }
  0xaa   :  { %761 = vst.msk [vmem:[%s1709_s1 + $0x242] ss:$8 sm:$0xf] %vm15_vm0, %v253_v32  }
  0xab   :  { %762 = vst.msk [vmem:[%s1709_s1 + $0x242] ss:$8 sm:$0xf0] %vm15_vm0, %v253_v32  }
  0xac   :  { %781 = vst.msk [vmem:[%s1709_s1 + $0x243] ss:$8 sm:$0xf] %vm15_vm0, %v342_v33  }
  0xad   :  { %643 = vrot.lane.b32.xlu0 %v929_v4, %s904_s19  ;;  %782 = vst.msk [vmem:[%s1709_s1 + $0x243] ss:$8 sm:$0xf0] %vm15_vm0, %v342_v33  }
  0xae   :  { %652 = vrot.lane.b32.xlu1 %v924_v2, %s904_s19  ;;  %661 = vrot.lane.b32.xlu2 %v931_v5, %s904_s19 }
  0xaf   :  { %v270_v34 = vpop.permute.xlu0 %269   ;;  %v279_v35 = vpop.permute.xlu1 %278  }
  0xb0   :  { %765 = vst.msk [vmem:[%s1709_s1 + $0x43] ss:$8 sm:$0xf] %vm15_vm0, %v270_v34   ;;  %v368_v36 = vpop.permute.xlu2 %367  }
  0xb1   :  { %766 = vst.msk [vmem:[%s1709_s1 + $0x43] ss:$8 sm:$0xf0] %vm15_vm0, %v270_v34  }
  0xb2   :  { %767 = vst.msk [vmem:[%s1709_s1 + $0x83] ss:$8 sm:$0xf] %vm15_vm0, %v279_v35  }
  0xb3   :  { %768 = vst.msk [vmem:[%s1709_s1 + $0x83] ss:$8 sm:$0xf0] %vm15_vm0, %v279_v35  }
  0xb4   :  { %787 = vst.msk [vmem:[%s1709_s1 + $0x84] ss:$8 sm:$0xf] %vm15_vm0, %v368_v36  }
  0xb5   :  { %670 = vrot.lane.b32.xlu0 %v936_v6, %s904_s19  ;;  %788 = vst.msk [vmem:[%s1709_s1 + $0x84] ss:$8 sm:$0xf0] %vm15_vm0, %v368_v36  }
  0xb6   :  { %679 = vrot.lane.b32.xlu1 %v938_v7, %s904_s19  ;;  %688 = vrot.lane.b32.xlu2 %v940_v8, %s904_s19 }
  0xb7   :  { %v297_v37 = vpop.permute.xlu0 %296   ;;  %v306_v38 = vpop.permute.xlu1 %305  }
  0xb8   :  { %771 = vst.msk [vmem:[%s1709_s1 + $0x103] ss:$8 sm:$0xf] %vm15_vm0, %v297_v37   ;;  %v395_v39 = vpop.permute.xlu2 %394  }
  0xb9   :  { %772 = vst.msk [vmem:[%s1709_s1 + $0x103] ss:$8 sm:$0xf0] %vm15_vm0, %v297_v37  }
  0xba   :  { %773 = vst.msk [vmem:[%s1709_s1 + $0x143] ss:$8 sm:$0xf] %vm15_vm0, %v306_v38  }
  0xbb   :  { %774 = vst.msk [vmem:[%s1709_s1 + $0x143] ss:$8 sm:$0xf0] %vm15_vm0, %v306_v38  }
  0xbc   :  { %793 = vst.msk [vmem:[%s1709_s1 + $0x144] ss:$8 sm:$0xf] %vm15_vm0, %v395_v39  }
  0xbd   :  { %697 = vrot.lane.b32.xlu0 %v945_v9, %s904_s19  ;;  %794 = vst.msk [vmem:[%s1709_s1 + $0x144] ss:$8 sm:$0xf0] %vm15_vm0, %v395_v39  }
  0xbf   :  { %v324_v40 = vpop.permute.xlu0 %323   ;;  %v333_v41 = vpop.permute.xlu1 %332  }
  0xc0   :  { %777 = vst.msk [vmem:[%s1709_s1 + $0x1c3] ss:$8 sm:$0xf] %vm15_vm0, %v324_v40   ;;  %v422_v42 = vpop.permute.xlu2 %421  }
  0xc1   :  { %778 = vst.msk [vmem:[%s1709_s1 + $0x1c3] ss:$8 sm:$0xf0] %vm15_vm0, %v324_v40  }
  0xc2   :  { %779 = vst.msk [vmem:[%s1709_s1 + $0x203] ss:$8 sm:$0xf] %vm15_vm0, %v333_v41  }
  0xc3   :  { %780 = vst.msk [vmem:[%s1709_s1 + $0x203] ss:$8 sm:$0xf0] %vm15_vm0, %v333_v41  }
  0xc4   :  { %799 = vst.msk [vmem:[%s1709_s1 + $0x204] ss:$8 sm:$0xf] %vm15_vm0, %v422_v42  }
  0xc5   :  { %800 = vst.msk [vmem:[%s1709_s1 + $0x204] ss:$8 sm:$0xf0] %vm15_vm0, %v422_v42  }
  0xc7   :  { %v350_v43 = vpop.permute.xlu0 %349   ;;  %v359_v44 = vpop.permute.xlu1 %358  }
  0xc8   :  { %783 = vst.msk [vmem:[%s1709_s1 + $0x4] ss:$8 sm:$0xf] %vm15_vm0, %v350_v43   ;;  %v448_v45 = vpop.permute.xlu2 %447  }
  0xc9   :  { %784 = vst.msk [vmem:[%s1709_s1 + $0x4] ss:$8 sm:$0xf0] %vm15_vm0, %v350_v43  }
  0xca   :  { %785 = vst.msk [vmem:[%s1709_s1 + $0x44] ss:$8 sm:$0xf] %vm15_vm0, %v359_v44  }
  0xcb   :  { %786 = vst.msk [vmem:[%s1709_s1 + $0x44] ss:$8 sm:$0xf0] %vm15_vm0, %v359_v44  }
  0xcc   :  { %805 = vst.msk [vmem:[%s1709_s1 + $0x45] ss:$8 sm:$0xf] %vm15_vm0, %v448_v45  }
  0xcd   :  { %806 = vst.msk [vmem:[%s1709_s1 + $0x45] ss:$8 sm:$0xf0] %vm15_vm0, %v448_v45  }
  0xcf   :  { %v377_v46 = vpop.permute.xlu0 %376   ;;  %v386_v47 = vpop.permute.xlu1 %385  }
  0xd0   :  { %789 = vst.msk [vmem:[%s1709_s1 + $0xc4] ss:$8 sm:$0xf] %vm15_vm0, %v377_v46   ;;  %v475_v48 = vpop.permute.xlu2 %474  }
  0xd1   :  { %790 = vst.msk [vmem:[%s1709_s1 + $0xc4] ss:$8 sm:$0xf0] %vm15_vm0, %v377_v46  }
  0xd2   :  { %791 = vst.msk [vmem:[%s1709_s1 + $0x104] ss:$8 sm:$0xf] %vm15_vm0, %v386_v47  }
  0xd3   :  { %792 = vst.msk [vmem:[%s1709_s1 + $0x104] ss:$8 sm:$0xf0] %vm15_vm0, %v386_v47  }
  0xd4   :  { %811 = vst.msk [vmem:[%s1709_s1 + $0x105] ss:$8 sm:$0xf] %vm15_vm0, %v475_v48  }
  0xd5   :  { %812 = vst.msk [vmem:[%s1709_s1 + $0x105] ss:$8 sm:$0xf0] %vm15_vm0, %v475_v48  }
  0xd7   :  { %v404_v49 = vpop.permute.xlu0 %403   ;;  %v413_v50 = vpop.permute.xlu1 %412  }
  0xd8   :  { %795 = vst.msk [vmem:[%s1709_s1 + $0x184] ss:$8 sm:$0xf] %vm15_vm0, %v404_v49   ;;  %v502_v51 = vpop.permute.xlu2 %501  }
  0xd9   :  { %796 = vst.msk [vmem:[%s1709_s1 + $0x184] ss:$8 sm:$0xf0] %vm15_vm0, %v404_v49  }
  0xda   :  { %797 = vst.msk [vmem:[%s1709_s1 + $0x1c4] ss:$8 sm:$0xf] %vm15_vm0, %v413_v50  }
  0xdb   :  { %798 = vst.msk [vmem:[%s1709_s1 + $0x1c4] ss:$8 sm:$0xf0] %vm15_vm0, %v413_v50  }
  0xdc   :  { %817 = vst.msk [vmem:[%s1709_s1 + $0x1c5] ss:$8 sm:$0xf] %vm15_vm0, %v502_v51  }
  0xdd   :  { %818 = vst.msk [vmem:[%s1709_s1 + $0x1c5] ss:$8 sm:$0xf0] %vm15_vm0, %v502_v51  }
  0xdf   :  { %v431_v52 = vpop.permute.xlu0 %430  }
  0xe0   :  { %v439_v53 = vpop.permute.xlu1 %438   ;;  %801 = vst.msk [vmem:[%s1709_s1 + $0x244] ss:$8 sm:$0xf] %vm15_vm0, %v431_v52   ;;  %v528_v54 = vpop.permute.xlu2 %527  }
  0xe1   :  { %802 = vst.msk [vmem:[%s1709_s1 + $0x244] ss:$8 sm:$0xf0] %vm15_vm0, %v431_v52  }
  0xe2   :  { %803 = vst.msk [vmem:[%s1709_s1 + $0x5] ss:$8 sm:$0xf] %vm15_vm0, %v439_v53  }
  0xe3   :  { %804 = vst.msk [vmem:[%s1709_s1 + $0x5] ss:$8 sm:$0xf0] %vm15_vm0, %v439_v53  }
  0xe4   :  { %823 = vst.msk [vmem:[%s1709_s1 + $0x6] ss:$8 sm:$0xf] %vm15_vm0, %v528_v54  }
  0xe5   :  { %824 = vst.msk [vmem:[%s1709_s1 + $0x6] ss:$8 sm:$0xf0] %vm15_vm0, %v528_v54  }
  0xe7   :  { %v457_v55 = vpop.permute.xlu0 %456  }
  0xe8   :  { %v466_v56 = vpop.permute.xlu1 %465   ;;  %807 = vst.msk [vmem:[%s1709_s1 + $0x85] ss:$8 sm:$0xf] %vm15_vm0, %v457_v55   ;;  %v555_v57 = vpop.permute.xlu2 %554  }
  0xe9   :  { %808 = vst.msk [vmem:[%s1709_s1 + $0x85] ss:$8 sm:$0xf0] %vm15_vm0, %v457_v55  }
  0xea   :  { %809 = vst.msk [vmem:[%s1709_s1 + $0xc5] ss:$8 sm:$0xf] %vm15_vm0, %v466_v56  }
  0xeb   :  { %810 = vst.msk [vmem:[%s1709_s1 + $0xc5] ss:$8 sm:$0xf0] %vm15_vm0, %v466_v56  }
  0xec   :  { %829 = vst.msk [vmem:[%s1709_s1 + $0xc6] ss:$8 sm:$0xf] %vm15_vm0, %v555_v57  }
  0xed   :  { %830 = vst.msk [vmem:[%s1709_s1 + $0xc6] ss:$8 sm:$0xf0] %vm15_vm0, %v555_v57  }
  0xef   :  { %v484_v58 = vpop.permute.xlu0 %483  }
  0xf0   :  { %v493_v59 = vpop.permute.xlu1 %492   ;;  %813 = vst.msk [vmem:[%s1709_s1 + $0x145] ss:$8 sm:$0xf] %vm15_vm0, %v484_v58   ;;  %v582_v60 = vpop.permute.xlu2 %581  }
  0xf1   :  { %814 = vst.msk [vmem:[%s1709_s1 + $0x145] ss:$8 sm:$0xf0] %vm15_vm0, %v484_v58  }
  0xf2   :  { %815 = vst.msk [vmem:[%s1709_s1 + $0x185] ss:$8 sm:$0xf] %vm15_vm0, %v493_v59  }
  0xf3   :  { %816 = vst.msk [vmem:[%s1709_s1 + $0x185] ss:$8 sm:$0xf0] %vm15_vm0, %v493_v59  }
  0xf4   :  { %835 = vst.msk [vmem:[%s1709_s1 + $0x186] ss:$8 sm:$0xf] %vm15_vm0, %v582_v60  }
  0xf5   :  { %836 = vst.msk [vmem:[%s1709_s1 + $0x186] ss:$8 sm:$0xf0] %vm15_vm0, %v582_v60  }
  0xf7   :  { %v511_v61 = vpop.permute.xlu0 %510  }
  0xf8   :  { %v520_v62 = vpop.permute.xlu1 %519   ;;  %819 = vst.msk [vmem:[%s1709_s1 + $0x205] ss:$8 sm:$0xf] %vm15_vm0, %v511_v61   ;;  %v609_v63 = vpop.permute.xlu2 %608  }
  0xf9   :  { %820 = vst.msk [vmem:[%s1709_s1 + $0x205] ss:$8 sm:$0xf0] %vm15_vm0, %v511_v61  }
  0xfa   :  { %821 = vst.msk [vmem:[%s1709_s1 + $0x245] ss:$8 sm:$0xf] %vm15_vm0, %v520_v62  }
  0xfb   :  { %822 = vst.msk [vmem:[%s1709_s1 + $0x245] ss:$8 sm:$0xf0] %vm15_vm0, %v520_v62  }
  0xfc   :  { %841 = vst.msk [vmem:[%s1709_s1 + $0x246] ss:$8 sm:$0xf] %vm15_vm0, %v609_v63  }
  0xfd   :  { %842 = vst.msk [vmem:[%s1709_s1 + $0x246] ss:$8 sm:$0xf0] %vm15_vm0, %v609_v63  }
  0xff   :  { %v537_v0 = vpop.permute.xlu0 %536  }
 0x100   :  { %v546_v1 = vpop.permute.xlu1 %545   ;;  %825 = vst.msk [vmem:[%s1709_s1 + $0x46] ss:$8 sm:$0xf] %vm15_vm0, %v537_v0   ;;  %v635_v2 = vpop.permute.xlu2 %634  }
 0x101   :  { %826 = vst.msk [vmem:[%s1709_s1 + $0x46] ss:$8 sm:$0xf0] %vm15_vm0, %v537_v0  }
 0x102   :  { %827 = vst.msk [vmem:[%s1709_s1 + $0x86] ss:$8 sm:$0xf] %vm15_vm0, %v546_v1  }
 0x103   :  { %828 = vst.msk [vmem:[%s1709_s1 + $0x86] ss:$8 sm:$0xf0] %vm15_vm0, %v546_v1  }
 0x104   :  { %847 = vst.msk [vmem:[%s1709_s1 + $0x87] ss:$8 sm:$0xf] %vm15_vm0, %v635_v2  }
 0x105   :  { %848 = vst.msk [vmem:[%s1709_s1 + $0x87] ss:$8 sm:$0xf0] %vm15_vm0, %v635_v2  }
 0x107   :  { %v564_v3 = vpop.permute.xlu0 %563  }
 0x108   :  { %v573_v4 = vpop.permute.xlu1 %572   ;;  %831 = vst.msk [vmem:[%s1709_s1 + $0x106] ss:$8 sm:$0xf] %vm15_vm0, %v564_v3   ;;  %v662_v5 = vpop.permute.xlu2 %661  }
 0x109   :  { %832 = vst.msk [vmem:[%s1709_s1 + $0x106] ss:$8 sm:$0xf0] %vm15_vm0, %v564_v3  }
 0x10a   :  { %833 = vst.msk [vmem:[%s1709_s1 + $0x146] ss:$8 sm:$0xf] %vm15_vm0, %v573_v4  }
 0x10b   :  { %834 = vst.msk [vmem:[%s1709_s1 + $0x146] ss:$8 sm:$0xf0] %vm15_vm0, %v573_v4  }
 0x10c   :  { %853 = vst.msk [vmem:[%s1709_s1 + $0x147] ss:$8 sm:$0xf] %vm15_vm0, %v662_v5  }
 0x10d   :  { %854 = vst.msk [vmem:[%s1709_s1 + $0x147] ss:$8 sm:$0xf0] %vm15_vm0, %v662_v5  }
 0x10f   :  { %v591_v6 = vpop.permute.xlu0 %590  }
 0x110   :  { %v600_v7 = vpop.permute.xlu1 %599   ;;  %837 = vst.msk [vmem:[%s1709_s1 + $0x1c6] ss:$8 sm:$0xf] %vm15_vm0, %v591_v6   ;;  %v689_v8 = vpop.permute.xlu2 %688  }
 0x111   :  { %838 = vst.msk [vmem:[%s1709_s1 + $0x1c6] ss:$8 sm:$0xf0] %vm15_vm0, %v591_v6  }
 0x112   :  { %839 = vst.msk [vmem:[%s1709_s1 + $0x206] ss:$8 sm:$0xf] %vm15_vm0, %v600_v7  }
 0x113   :  { %840 = vst.msk [vmem:[%s1709_s1 + $0x206] ss:$8 sm:$0xf0] %vm15_vm0, %v600_v7  }
 0x114   :  { %859 = vst.msk [vmem:[%s1709_s1 + $0x207] ss:$8 sm:$0xf] %vm15_vm0, %v689_v8  }
 0x115   :  { %860 = vst.msk [vmem:[%s1709_s1 + $0x207] ss:$8 sm:$0xf0] %vm15_vm0, %v689_v8  }
 0x117   :  { %v617_v9 = vpop.permute.xlu0 %616  }
 0x118   :  { %v626_v10 = vpop.permute.xlu1 %625   ;;  %843 = vst.msk [vmem:[%s1709_s1 + $0x7] ss:$8 sm:$0xf] %vm15_vm0, %v617_v9  }
 0x119   :  { %844 = vst.msk [vmem:[%s1709_s1 + $0x7] ss:$8 sm:$0xf0] %vm15_vm0, %v617_v9  }
 0x11a   :  { %845 = vst.msk [vmem:[%s1709_s1 + $0x47] ss:$8 sm:$0xf] %vm15_vm0, %v626_v10  }
 0x11b   :  { %846 = vst.msk [vmem:[%s1709_s1 + $0x47] ss:$8 sm:$0xf0] %vm15_vm0, %v626_v10  }
 0x11f   :  { %v644_v11 = vpop.permute.xlu0 %643  }
 0x120   :  { %v653_v12 = vpop.permute.xlu1 %652   ;;  %849 = vst.msk [vmem:[%s1709_s1 + $0xc7] ss:$8 sm:$0xf] %vm15_vm0, %v644_v11  }
 0x121   :  { %850 = vst.msk [vmem:[%s1709_s1 + $0xc7] ss:$8 sm:$0xf0] %vm15_vm0, %v644_v11  }
 0x122   :  { %851 = vst.msk [vmem:[%s1709_s1 + $0x107] ss:$8 sm:$0xf] %vm15_vm0, %v653_v12  }
 0x123   :  { %852 = vst.msk [vmem:[%s1709_s1 + $0x107] ss:$8 sm:$0xf0] %vm15_vm0, %v653_v12  }
 0x127   :  { %v671_v13 = vpop.permute.xlu0 %670  }
 0x128   :  { %v680_v14 = vpop.permute.xlu1 %679   ;;  %855 = vst.msk [vmem:[%s1709_s1 + $0x187] ss:$8 sm:$0xf] %vm15_vm0, %v671_v13  }
 0x129   :  { %856 = vst.msk [vmem:[%s1709_s1 + $0x187] ss:$8 sm:$0xf0] %vm15_vm0, %v671_v13  }
 0x12a   :  { %857 = vst.msk [vmem:[%s1709_s1 + $0x1c7] ss:$8 sm:$0xf] %vm15_vm0, %v680_v14  }
 0x12b   :  { %858 = vst.msk [vmem:[%s1709_s1 + $0x1c7] ss:$8 sm:$0xf0] %vm15_vm0, %v680_v14  }
 0x12f   :  { %v698_v15 = vpop.permute.xlu0 %697  }
 0x130   :  { %861 = vst.msk [vmem:[%s1709_s1 + $0x247] ss:$8 sm:$0xf] %vm15_vm0, %v698_v15  }
 0x131   :  { %862 = vst.msk [vmem:[%s1709_s1 + $0x247] ss:$8 sm:$0xf0] %vm15_vm0, %v698_v15  }
 0x132   :  { %704 = vsyncpa [#allocation1], 1 }

// kernel: map_cnn_forward.1
= control target key start
LH: loop header
LB: loop body
LE: loop exit
PB: predicated region body
PF: predicated region fallthrough
CT: control target
= control target key end

     0   :  { %vm160_vm0 = vcmask 1043456   ;;  %vm161_vm1 = vcmask 1044480   ;;  %v6504_v2 = vmov 65535   ;;  %vm33_vm2 = vcmask 261120   ;;  %s9479_s1 = inlined_call_operand.vmem [shape: bf16[25,32], index: 1, kind: input, shape index: {}]   ;;  %s9480_s0 = inlined_call_operand.vmem [shape: f32[128,25], index: 0, kind: input, shape index: {}]   ;;  %s9481_s3 = inlined_call_operand.vmem [shape: bf16[9,32,64], index: 3, kind: input, shape index: {}]   ;;  %s9482_s2 = inlined_call_operand.vmem [shape: f32[1,32], index: 2, kind: input, shape index: {}]   ;;  %s9483_s4 = inlined_call_operand.vmem [shape: f32[1,64], index: 4, kind: input, shape index: {}]   ;;  %s9484_s5 = inlined_call_operand.vmem [shape: bf16[9,64,128], index: 5, kind: input, shape index: {}]   ;;  %s9485_s6 = inlined_call_operand.vmem [shape: f32[1,128], index: 6, kind: input, shape index: {}]   ;;  %s9486_s7 = inlined_call_operand.vmem [shape: bf16[9,128,256], index: 7, kind: input, shape index: {}]   ;;  %s9487_s8 = inlined_call_operand.vmem [shape: f32[1,256], index: 8, kind: input, shape index: {}]   ;;  %s9488_s9 = inlined_call_operand.vmem [shape: f32[128,256], index: 9, kind: output, shape index: {}]  }
   0x1   :  { %v5108_v0 = vld [vmem:[%s9479_s1 + $0x8] sm:$0xf]  ;;  %v6279_v1 = vld [vmem:[%s9479_s1 + $0x8] sm:$0x10]  ;;  %v162_v3 = vsel %vm160_vm0, 4294967295, %v6504_v2  ;;  %v9489_v6 = vmov 0.0  }
   0x2   :  { %v5109_v4 = vor.u32 %v6279_v1, %v5108_v0  ;;  %v163_v5 = vsel %vm161_vm1, %v162_v3, 0  ;;  %34 = vst.msk [vmem:[#allocation2] sm:$0xff] %vm33_vm2, %v9489_v6  ;;  %v6278_v8 = vld [vmem:[%s9479_s1] sm:$0xff]  ;;  %v93_v10 = vld [vmem:[%s9480_s0 + $0x8] sm:$0xff]  ;;  %vm135_vm3 = vcmask 203776   ;;  %v94_v22 = vld [vmem:[%s9480_s0 + $0x10] sm:$0xff] }
   0x3   :  { %35 = vst.msk [vmem:[#allocation2 + $0x8] sm:$0xff] %vm33_vm2, %v9489_v6  ;;  %v92_v9 = vld [vmem:[%s9480_s0] sm:$0xff]  ;;  %v97_v12 = vld [vmem:[%s9480_s0 + $0x28] sm:$0xff]  ;;  %v95_v23 = vld [vmem:[%s9480_s0 + $0x18] sm:$0xff]  ;;  %vm53_vm4 = vcmask 523264  }
   0x4   :  { %v165_v7 = vand.u32 %v5109_v4, %v163_v5  ;;  %v96_v11 = vld [vmem:[%s9480_s0 + $0x20] sm:$0xff]  ;;  %36 = vst.msk [vmem:[#allocation2 + $0x10] sm:$0xff] %vm33_vm2, %v9489_v6  ;;  %v101_v14 = vld [vmem:[%s9480_s0 + $0x48] sm:$0xff]  ;;  %v108_v18 = vpack.c.bf16 %v93_v10, %v92_v9  ;;  %v98_v24 = vld [vmem:[%s9480_s0 + $0x30] sm:$0xff]  ;;  %v109_v30 = vpack.c.bf16 %v95_v23, %v94_v22 }
   0x5   :  { %v100_v13 = vld [vmem:[%s9480_s0 + $0x40] sm:$0xff]  ;;  %37 = vst.msk [vmem:[#allocation2 + $0x18] sm:$0xff] %vm33_vm2, %v9489_v6  ;;  %v105_v16 = vld [vmem:[%s9480_s0 + $0x68] sm:$0xff]  ;;  %v110_v19 = vpack.c.bf16 %v97_v12, %v96_v11  ;;  %v99_v25 = vld [vmem:[%s9480_s0 + $0x38] sm:$0xff] }
   0x6   :  { %173 = vmatpush.bf16.msra.mxu0 %v165_v7  ;;  %6478 = vmatpush.bf16.msra.mxu1 %v165_v7  ;;  %v104_v15 = vld [vmem:[%s9480_s0 + $0x60] sm:$0xff]  ;;  %38 = vst.msk [vmem:[#allocation2 + $0x20] sm:$0xff] %vm33_vm2, %v9489_v6  ;;  %v6281_v17 = vld [vmem:[%s9481_s3 + $0x8] sm:$0xff]  ;;  %v112_v20 = vpack.c.bf16 %v101_v14, %v100_v13  ;;  %v102_v26 = vld [vmem:[%s9480_s0 + $0x50] sm:$0xff]  ;;  %v111_v31 = vpack.c.bf16 %v99_v25, %v98_v24 }
   0x7   :  { %6479 = vmatpush.bf16.msra.mxu2 %v165_v7  ;;  %6480 = vmatpush.bf16.msra.mxu3 %v165_v7  ;;  %39 = vst.msk [vmem:[#allocation2 + $0x28] sm:$0xff] %vm33_vm2, %v9489_v6  ;;  %v114_v21 = vpack.c.bf16 %v105_v16, %v104_v15  ;;  %v103_v27 = vld [vmem:[%s9480_s0 + $0x58] sm:$0xff]  ;;  %v106_v28 = vld [vmem:[%s9480_s0 + $0x70] sm:$0xff]  ;;  %v6280_v34 = vld [vmem:[%s9481_s3] sm:$0xff] }
   0x8   :  { %40 = vst.msk [vmem:[#allocation2 + $0x30] sm:$0xff] %vm33_vm2, %v9489_v6  ;;  %v107_v29 = vld [vmem:[%s9480_s0 + $0x78] sm:$0xff]  ;;  %v113_v32 = vpack.c.bf16 %v103_v27, %v102_v26  ;;  %v6285_v36 = vld [vmem:[%s9481_s3 + $0x28] sm:$0xff]  ;;  %v6282_v39 = vld [vmem:[%s9481_s3 + $0x10] sm:$0xff] }
   0x9   :  { %41 = vst.msk [vmem:[#allocation2 + $0x38] sm:$0xff] %vm33_vm2, %v9489_v6  ;;  %v115_v33 = vpack.c.bf16 %v107_v29, %v106_v28  ;;  %v6283_v35 = vld [vmem:[%s9481_s3 + $0x18] sm:$0xff]  ;;  %v6289_v38 = vld [vmem:[%s9481_s3 + $0x48] sm:$0xff]  ;;  %v6284_v40 = vld [vmem:[%s9481_s3 + $0x20] sm:$0xff] }
   0xa   :  { %174 = vmatpush.bf16.msra.mxu0 %v6278_v8  ;;  %6481 = vmatpush.bf16.msra.mxu1 %v6278_v8  ;;  %42 = vst.msk [vmem:[#allocation2 + $0x40] sm:$0xff] %vm33_vm2, %v9489_v6  ;;  %v6287_v37 = vld [vmem:[%s9481_s3 + $0x38] sm:$0xff]  ;;  %v6286_v41 = vld [vmem:[%s9481_s3 + $0x30] sm:$0xff]  ;;  %v6692_v42 = vld [vmem:[%s9482_s2] ss:$0 sm:$0xff] }
   0xb   :  { %6482 = vmatpush.bf16.msra.mxu2 %v6278_v8  ;;  %6483 = vmatpush.bf16.msra.mxu3 %v6278_v8  ;;  %43 = vst.msk [vmem:[#allocation2 + $0x48] sm:$0xff] %vm33_vm2, %v9489_v6 }
   0xc   :  { %44 = vst.msk [vmem:[#allocation2 + $0x50] sm:$0xff] %vm33_vm2, %v9489_v6 }
   0xd   :  { %5110 = vmatmul.msk.bf16.vlgmr.msra.gmra.mxu0 %vm135_vm3, %v108_v18  ;;  %5112 = vmatmul.msk.bf16.vlgmr.msra.gmra.mxu1 %vm135_vm3, %v110_v19  ;;  %45 = vst.msk [vmem:[#allocation2 + $0x58] sm:$0xff] %vm33_vm2, %v9489_v6 }
   0xe   :  { %322 = vmatpush.bf16.msrb.mxu1 %v6281_v17  ;;  %5114 = vmatmul.msk.bf16.vlgmr.msra.gmra.mxu2 %vm135_vm3, %v112_v20  ;;  %46 = vst.msk [vmem:[#allocation2 + $0x60] sm:$0xff] %vm33_vm2, %v9489_v6 }
   0xf   :  { %5116 = vmatmul.msk.bf16.vlgmr.msra.gmra.mxu3 %vm135_vm3, %v114_v21  ;;  %47 = vst.msk [vmem:[#allocation2 + $0x68] sm:$0xff] %vm33_vm2, %v9489_v6  ;;  %452 = vmatpush.bf16.msrb.mxu2 %v6283_v35 }
  0x10   :  { %48 = vst.msk [vmem:[#allocation2 + $0x70] sm:$0xff] %vm33_vm2, %v9489_v6  ;;  %582 = vmatpush.bf16.msrb.mxu3 %v6285_v36  ;;  %712 = vmatpush.bf16.msrb.mxu0 %v6287_v37 }
  0x11   :  { %49 = vst.msk [vmem:[#allocation2 + $0x78] sm:$0xff] %vm33_vm2, %v9489_v6 }
  0x12   :  { %50 = vst.msk [vmem:[#allocation2 + $0x80] sm:$0xff] %vm33_vm2, %v9489_v6  ;;  %323 = vmatpush.bf16.msrb.mxu1 %v6280_v34 }
  0x13   :  { %51 = vst.msk [vmem:[#allocation2 + $0x88] sm:$0xff] %vm33_vm2, %v9489_v6  ;;  %453 = vmatpush.bf16.msrb.mxu2 %v6282_v39 }
  0x14   :  { %52 = vst.msk [vmem:[#allocation2 + $0x90] sm:$0xff] %vm33_vm2, %v9489_v6  ;;  %583 = vmatpush.bf16.msrb.mxu3 %v6284_v40  ;;  %713 = vmatpush.bf16.msrb.mxu0 %v6286_v41 }
  0x15   :  { %89 = vst [vmem:[#allocation4 + $0x80] sm:$0xff] %v9489_v6 }
  0x16   :  { %90 = vst [vmem:[#allocation4 + $0x88] sm:$0xff] %v9489_v6  ;;  %842 = vmatpush.bf16.msra.mxu1 %v6289_v38 }
  0x17   :  { %91 = vst [vmem:[#allocation4 + $0x90] sm:$0xff] %v9489_v6 }
  0x1d   :  { %5111 = vmatmul.msk.bf16.gmra.mxu0 %vm135_vm3, %v109_v30  ;;  %5113 = vmatmul.msk.bf16.gmra.mxu1 %vm135_vm3, %v111_v31 }
  0x1e   :  { %5115 = vmatmul.msk.bf16.gmra.mxu2 %vm135_vm3, %v113_v32 }
  0x1f   :  { %5117 = vmatmul.msk.bf16.gmra.mxu3 %vm135_vm3, %v115_v33 }
  0x8a   :  { %v176_v43 = vpop.f32.mrf.mxu0  ;;  %v186_v44 = vpop.f32.mrf.mxu1 }
  0x8b   :  { %v177_v45 = vadd.f32 %v6692_v42, %v176_v43  ;;  %v187_v46 = vadd.f32 %v6692_v42, %v186_v44 }
  0x8d   :  { %v216_v47 = vmax.f32 %v177_v45, 0.0  ;;  %v220_v48 = vmax.f32 %v187_v46, 0.0 }
  0x8f   :  { %232 = vst.msk [vmem:[#allocation2] sm:$0xff] %vm33_vm2, %v216_v47 }
  0x90   :  { %236 = vst.msk [vmem:[#allocation2 + $0x20] sm:$0xff] %vm33_vm2, %v220_v48 }
  0x91   :  { %v196_v49 = vpop.f32.mrf.mxu2 }
  0x92   :  { %v178_v50 = vpop.f32.mrf.mxu0  ;;  %v188_v51 = vpop.f32.mrf.mxu1  ;;  %v197_v52 = vadd.f32 %v6692_v42, %v196_v49 }
  0x93   :  { %v179_v53 = vadd.f32 %v6692_v42, %v178_v50  ;;  %v189_v54 = vadd.f32 %v6692_v42, %v188_v51  ;;  %v206_v45 = vpop.f32.mrf.mxu3 }
  0x94   :  { %v224_v55 = vmax.f32 %v197_v52, 0.0  ;;  %v207_v50 = vadd.f32 %v6692_v42, %v206_v45 }
  0x95   :  { %v217_v56 = vmax.f32 %v179_v53, 0.0  ;;  %v221_v57 = vmax.f32 %v189_v54, 0.0  ;;  %v6973_v53 = vld [vmem:[%s9483_s4] ss:$0 sm:$0xff] }
  0x96   :  { %240 = vst.msk [vmem:[#allocation2 + $0x40] sm:$0xff] %vm33_vm2, %v224_v55  ;;  %v252_v2 = vld [vmem:[#allocation2] sm:$0xff]  ;;  %v228_v54 = vmax.f32 %v207_v50, 0.0 }
  0x97   :  { %233 = vst.msk [vmem:[#allocation2 + $0x8] sm:$0xff] %vm33_vm2, %v217_v56  ;;  %v644_v55 = vld [vmem:[#allocation2 + $0x20] sm:$0xff] }
  0x98   :  { %237 = vst.msk [vmem:[#allocation2 + $0x28] sm:$0xff] %vm33_vm2, %v221_v57 }
  0x99   :  { %v198_v62 = vpop.f32.mrf.mxu2  ;;  %244 = vst.msk [vmem:[#allocation2 + $0x60] sm:$0xff] %vm33_vm2, %v228_v54 }
  0x9a   :  { %v181_v58 = vpop.f32.mrf.mxu0  ;;  %v191_v59 = vpop.f32.mrf.mxu1  ;;  %v199_v63 = vadd.f32 %v6692_v42, %v198_v62 }
  0x9b   :  { %v182_v60 = vadd.f32 %v6692_v42, %v181_v58  ;;  %v192_v61 = vadd.f32 %v6692_v42, %v191_v59 }
  0x9c   :  { %v225_v4 = vmax.f32 %v199_v63, 0.0 }
  0x9d   :  { %v218_v0 = vmax.f32 %v182_v60, 0.0  ;;  %v222_v1 = vmax.f32 %v192_v61, 0.0  ;;  %v648_v45 = vld [vmem:[#allocation2 + $0x40] sm:$0xff] }
  0x9e   :  { %v253_v3 = vld [vmem:[#allocation2 + $0x8] sm:$0xff]  ;;  %241 = vst.msk [vmem:[#allocation2 + $0x48] sm:$0xff] %vm33_vm2, %v225_v4 }
  0x9f   :  { %234 = vst.msk [vmem:[#allocation2 + $0x10] sm:$0xff] %vm33_vm2, %v218_v0  ;;  %v268_v5 = vpack.c.bf16 %v253_v3, %v252_v2  ;;  %v381_v14 = vld [vmem:[#allocation2 + $0x1] sm:$0xff] }
  0xa0   :  { %238 = vst.msk [vmem:[#allocation2 + $0x30] sm:$0xff] %vm33_vm2, %v222_v1  ;;  %v511_v15 = vld [vmem:[#allocation2 + $0x2] sm:$0xff]  ;;  %v208_v1 = vpop.f32.mrf.mxu3 }
  0xa1   :  { %5126 = vmatmul.msk.bf16.vlgmr.msrb.gmra.mxu1 %vm33_vm2, %v268_v5  ;;  %v201_v11 = vpop.f32.mrf.mxu2  ;;  %v6726_v25 = vld [vmem:[#allocation2 + $0x21] sm:$0xff]  ;;  %v209_v2 = vadd.f32 %v6692_v42, %v208_v1 }
  0xa2   :  { %v183_v7 = vpop.f32.mrf.mxu0  ;;  %v193_v8 = vpop.f32.mrf.mxu1  ;;  %v202_v12 = vadd.f32 %v6692_v42, %v201_v11  ;;  %v6728_v26 = vld [vmem:[#allocation2 + $0x22] sm:$0xff] }
  0xa3   :  { %v184_v9 = vadd.f32 %v6692_v42, %v183_v7  ;;  %v194_v10 = vadd.f32 %v6692_v42, %v193_v8  ;;  %v229_v4 = vmax.f32 %v209_v2, 0.0  ;;  %v6288_v7 = vld [vmem:[%s9481_s3 + $0x40] sm:$0xff] }
  0xa4   :  { %v226_v20 = vmax.f32 %v202_v12, 0.0  ;;  %843 = vmatpush.bf16.msra.mxu1 %v6288_v7 }
  0xa5   :  { %v219_v13 = vmax.f32 %v184_v9, 0.0  ;;  %v223_v16 = vmax.f32 %v194_v10, 0.0  ;;  %v6735_v30 = vld [vmem:[#allocation2 + $0x41] sm:$0xff]  ;;  %245 = vst.msk [vmem:[#allocation2 + $0x68] sm:$0xff] %vm33_vm2, %v229_v4  ;;  %v6294_v4 = vld [vmem:[%s9481_s3 + $0x70] sm:$0xff] }
  0xa6   :  { %v6714_v17 = vld [vmem:[#allocation2 + $0x9] sm:$0xff]  ;;  %242 = vst.msk [vmem:[#allocation2 + $0x50] sm:$0xff] %vm33_vm2, %v226_v20 }
  0xa7   :  { %v6716_v18 = vld [vmem:[#allocation2 + $0xa] sm:$0xff]  ;;  %235 = vst.msk [vmem:[#allocation2 + $0x18] sm:$0xff] %vm33_vm2, %v219_v13  ;;  %v397_v21 = vpack.c.bf16 %v6714_v17, %v381_v14  ;;  %v6747_v38 = vld [vmem:[#allocation2 + $0x42] sm:$0xff] }
  0xa8   :  { %v642_v19 = vld [vmem:[#allocation2 + $0x10] sm:$0xff]  ;;  %v527_v22 = vpack.c.bf16 %v6716_v18, %v511_v15  ;;  %239 = vst.msk [vmem:[#allocation2 + $0x38] sm:$0xff] %vm33_vm2, %v223_v16  ;;  %v211_v8 = vpop.f32.mrf.mxu3  ;;  %v261_v7 = vld [vmem:[#allocation2 + $0x48] sm:$0xff] }
  0xa9   :  { %v657_v23 = vpack.c.bf16 %v642_v19, %v253_v3  ;;  %5146 = vmatmul.msk.bf16.vlgmr.msrb.gmra.mxu2 %vm33_vm2, %v397_v21  ;;  %v203_v24 = vpop.f32.mrf.mxu2  ;;  %v6731_v28 = vld [vmem:[#allocation2 + $0x29] sm:$0xff]  ;;  %v212_v9 = vadd.f32 %v6692_v42, %v211_v8  ;;  %v6870_v8 = vpack.c.bf16 %v261_v7, %v648_v45 }
  0xaa   :  { %5166 = vmatmul.msk.bf16.vlgmr.msrb.gmra.mxu3 %vm33_vm2, %v527_v22  ;;  %v204_v27 = vadd.f32 %v6692_v42, %v203_v24  ;;  %v6733_v29 = vld [vmem:[#allocation2 + $0x2a] sm:$0xff]  ;;  %v6815_v12 = vpack.c.bf16 %v6731_v28, %v6726_v25 }
  0xab   :  { %5186 = vmatmul.msk.bf16.vlgmr.msrb.gmra.mxu0 %vm33_vm2, %v657_v23  ;;  %v257_v3 = vld [vmem:[#allocation2 + $0x28] sm:$0xff]  ;;  %v646_v10 = vld [vmem:[#allocation2 + $0x30] sm:$0xff]  ;;  %v230_v11 = vmax.f32 %v212_v9, 0.0  ;;  %v6819_v13 = vpack.c.bf16 %v6733_v29, %v6728_v26 }
  0xac   :  { %v227_v34 = vmax.f32 %v204_v27, 0.0  ;;  %v6804_v5 = vpack.c.bf16 %v257_v3, %v644_v55  ;;  %v659_v16 = vpack.c.bf16 %v646_v10, %v257_v3  ;;  %v6828_v20 = vld [vmem:[#allocation2 + $0x62] sm:$0xff] }
  0xad   :  { %v6786_v58 = vld [vmem:[#allocation2 + $0x49] sm:$0xff]  ;;  %246 = vst.msk [vmem:[#allocation2 + $0x70] sm:$0xff] %vm33_vm2, %v230_v11 }
  0xae   :  { %v255_v31 = vld [vmem:[#allocation2 + $0x18] sm:$0xff]  ;;  %243 = vst.msk [vmem:[#allocation2 + $0x58] sm:$0xff] %vm33_vm2, %v227_v34  ;;  %v6788_v59 = vld [vmem:[#allocation2 + $0x4a] sm:$0xff] }
  0xaf   :  { %v6737_v32 = vld [vmem:[#allocation2 + $0x11] sm:$0xff]  ;;  %v6739_v33 = vld [vmem:[#allocation2 + $0x19] sm:$0xff]  ;;  %v6741_v35 = vpack.c.bf16 %v255_v31, %v642_v19  ;;  %v658_v60 = vpack.c.bf16 %v644_v55, %v255_v31  ;;  %v6826_v19 = vld [vmem:[#allocation2 + $0x61] sm:$0xff]  ;;  %v6880_v11 = vpack.c.bf16 %v6788_v59, %v6747_v38 }
  0xb0   :  { %v6743_v36 = vld [vmem:[#allocation2 + $0x12] sm:$0xff]  ;;  %v6745_v37 = vld [vmem:[#allocation2 + $0x1a] sm:$0xff]  ;;  %v787_v39 = vpack.c.bf16 %v6737_v32, %v6714_v17  ;;  %v788_v47 = vpack.c.bf16 %v6726_v25, %v6739_v33  ;;  %v6780_v56 = vpack.c.bf16 %v6739_v33, %v6737_v32  ;;  %v213_v23 = vpop.f32.mrf.mxu3 }
  0xb1   :  { %v6752_v40 = vld [vmem:[#allocation2 + $0x31] sm:$0xff]  ;;  %v6754_v41 = vld [vmem:[#allocation2 + $0x39] sm:$0xff]  ;;  %v917_v44 = vpack.c.bf16 %v6743_v36, %v6716_v18  ;;  %5127 = vmatmul.msk.bf16.gmra.mxu1 %vm33_vm2, %v6741_v35  ;;  %v6784_v57 = vpack.c.bf16 %v6745_v37, %v6743_v36  ;;  %v214_v24 = vadd.f32 %v6692_v42, %v213_v23 }
  0xb2   :  { %v6756_v43 = vld [vmem:[#allocation2 + $0x32] sm:$0xff]  ;;  %v6762_v46 = vld [vmem:[#allocation2 + $0x3a] sm:$0xff]  ;;  %v6847_v50 = vpack.c.bf16 %v6754_v41, %v6752_v40 }
  0xb3   :  { %v259_v27 = vld [vmem:[#allocation2 + $0x38] sm:$0xff]  ;;  %v231_v31 = vmax.f32 %v214_v24, 0.0  ;;  %v6851_v54 = vpack.c.bf16 %v6762_v46, %v6756_v43  ;;  %v650_v9 = vld [vmem:[#allocation2 + $0x50] sm:$0xff] }
  0xb4   :  { %v6840_v34 = vpack.c.bf16 %v259_v27, %v646_v10  ;;  %v6853_v55 = vld [vmem:[#allocation2 + $0x69] sm:$0xff]  ;;  %v6876_v10 = vpack.c.bf16 %v6786_v58, %v6735_v30 }
  0xb5   :  { %v6790_v61 = vld [vmem:[#allocation2 + $0x51] sm:$0xff]  ;;  %v6822_v14 = vld [vmem:[#allocation2 + $0x59] sm:$0xff]  ;;  %247 = vst.msk [vmem:[#allocation2 + $0x78] sm:$0xff] %vm33_vm2, %v231_v31  ;;  %v6293_v31 = vld [vmem:[%s9481_s3 + $0x68] sm:$0xff] }
  0xb6   :  { %v6792_v62 = vld [vmem:[#allocation2 + $0x52] sm:$0xff]  ;;  %v6824_v15 = vld [vmem:[#allocation2 + $0x5a] sm:$0xff]  ;;  %v6855_v42 = vld [vmem:[#allocation2 + $0x6a] sm:$0xff]  ;;  %1102 = vmatpush.bf16.msra.mxu3 %v6293_v31 }
  0xb7   :  { %v263_v23 = vld [vmem:[#allocation2 + $0x58] sm:$0xff]  ;;  %v654_v6 = vld [vmem:[#allocation2 + $0x70] sm:$0xff] }
  0xb8   :  { %v6887_v24 = vpack.c.bf16 %v263_v23, %v650_v9  ;;  %v6295_v31 = vld [vmem:[%s9481_s3 + $0x78] sm:$0xff] }
  0xb9   :  { %5147 = vmatmul.msk.bf16.gmra.mxu2 %vm33_vm2, %v6780_v56  ;;  %1232 = vmatpush.bf16.msra.mxu0 %v6295_v31  ;;  %v6931_v31 = vpack.c.bf16 %v6853_v55, %v6826_v19 }
  0xba   :  { %5167 = vmatmul.msk.bf16.gmra.mxu3 %vm33_vm2, %v6784_v57 }
  0xbb   :  { %5187 = vmatmul.msk.bf16.gmra.mxu0 %vm33_vm2, %v658_v60  ;;  %v660_v60 = vpack.c.bf16 %v648_v45, %v259_v27  ;;  %v6291_v27 = vld [vmem:[%s9481_s3 + $0x58] sm:$0xff]  ;;  %v652_v45 = vld [vmem:[#allocation2 + $0x60] sm:$0xff] }
  0xbc   :  { %v6857_v1 = vld [vmem:[#allocation2 + $0x71] sm:$0xff]  ;;  %972 = vmatpush.bf16.msra.mxu2 %v6291_v27  ;;  %v6946_v0 = vld [vmem:[#allocation2 + $0x79] sm:$0xff] }
  0xbd   :  { %v6859_v2 = vld [vmem:[#allocation2 + $0x72] sm:$0xff]  ;;  %1233 = vmatpush.bf16.msra.mxu0 %v6294_v4  ;;  %v6954_v4 = vpack.c.bf16 %v6946_v0, %v6857_v1 }
  0xbe   :  { %v267_v22 = vld [vmem:[#allocation2 + $0x78] sm:$0xff] }
  0xbf   :  { %v6942_v21 = vpack.c.bf16 %v267_v22, %v654_v6 }
  0xc1   :  { %5128 = vmatmul.msk.bf16.gmra.mxu1 %vm33_vm2, %v6804_v5 }
  0xc9   :  { %5148 = vmatmul.msk.bf16.gmra.mxu2 %vm33_vm2, %v6815_v12 }
  0xca   :  { %5168 = vmatmul.msk.bf16.gmra.mxu3 %vm33_vm2, %v6819_v13 }
  0xcb   :  { %5188 = vmatmul.msk.bf16.gmra.mxu0 %vm33_vm2, %v659_v16  ;;  %v661_v16 = vpack.c.bf16 %v650_v9, %v261_v7  ;;  %v6903_v7 = vpack.c.bf16 %v6824_v15, %v6792_v62  ;;  %v662_v9 = vpack.c.bf16 %v652_v45, %v263_v23  ;;  %v6297_v23 = vld [vmem:[%s9481_s3 + $0x88] sm:$0xff] }
  0xcc   :  { %1362 = vmatpush.bf16.msrb.mxu1 %v6297_v23  ;;  %v6935_v23 = vpack.c.bf16 %v6855_v42, %v6828_v20 }
  0xd1   :  { %5129 = vmatmul.msk.bf16.gmra.mxu1 %vm33_vm2, %v6840_v34 }
  0xd9   :  { %5149 = vmatmul.msk.bf16.gmra.mxu2 %vm33_vm2, %v6847_v50 }
  0xda   :  { %5169 = vmatmul.msk.bf16.gmra.mxu3 %vm33_vm2, %v6851_v54 }
  0xdb   :  { %5189 = vmatmul.msk.bf16.gmra.mxu0 %vm33_vm2, %v660_v60  ;;  %v6899_v60 = vpack.c.bf16 %v6822_v14, %v6790_v61 }
  0xe1   :  { %5130 = vmatmul.msk.bf16.gmra.mxu1 %vm33_vm2, %v6870_v8 }
  0xe9   :  { %5150 = vmatmul.msk.bf16.gmra.mxu2 %vm33_vm2, %v6876_v10 }
  0xea   :  { %5170 = vmatmul.msk.bf16.gmra.mxu3 %vm33_vm2, %v6880_v11 }
  0xeb   :  { %5190 = vmatmul.msk.bf16.gmra.mxu0 %vm33_vm2, %v661_v16  ;;  %v265_v16 = vld [vmem:[#allocation2 + $0x68] sm:$0xff] }
  0xec   :  { %v6910_v27 = vpack.c.bf16 %v265_v16, %v652_v45  ;;  %v6292_v45 = vld [vmem:[%s9481_s3 + $0x60] sm:$0xff]  ;;  %v663_v3 = vpack.c.bf16 %v654_v6, %v265_v16 }
  0xed   :  { %1103 = vmatpush.bf16.msra.mxu3 %v6292_v45  ;;  %v6950_v16 = vld [vmem:[#allocation2 + $0x80] sm:$0xff] }
  0xee   :  { %v664_v6 = vpack.c.bf16 %v6950_v16, %v267_v22 }
  0xf1   :  { %5131 = vmatmul.msk.bf16.gmra.mxu1 %vm33_vm2, %v6887_v24 }
  0xf9   :  { %5151 = vmatmul.msk.bf16.gmra.mxu2 %vm33_vm2, %v6899_v60 }
  0xfa   :  { %5171 = vmatmul.msk.bf16.gmra.mxu3 %vm33_vm2, %v6903_v7 }
  0xfb   :  { %5191 = vmatmul.msk.bf16.gmra.mxu0 %vm33_vm2, %v662_v9  ;;  %v6290_v9 = vld [vmem:[%s9481_s3 + $0x50] sm:$0xff] }
  0xfc   :  { %973 = vmatpush.bf16.msra.mxu2 %v6290_v9  ;;  %v6948_v9 = vld [vmem:[#allocation2 + $0x7a] sm:$0xff] }
  0xfd   :  { %v6958_v45 = vpack.c.bf16 %v6948_v9, %v6859_v2 }
  0xff   :  { %9496 = vst [vmem:[#allocation5_spill] sm:$0xff] %v6958_v45 }
 0x101   :  { %5132 = vmatmul.msk.bf16.gmra.mxu1 %vm33_vm2, %v6910_v27 }
 0x109   :  { %5152 = vmatmul.msk.bf16.gmra.mxu2 %vm33_vm2, %v6931_v31 }
 0x10a   :  { %5172 = vmatmul.msk.bf16.gmra.mxu3 %vm33_vm2, %v6935_v23 }
 0x10b   :  { %5192 = vmatmul.msk.bf16.gmra.mxu0 %vm33_vm2, %v663_v3 }
 0x111   :  { %5133 = vmatmul.msk.bf16.gmra.mxu1 %vm33_vm2, %v6942_v21 }
 0x119   :  { %5153 = vmatmul.msk.bf16.gmra.mxu2 %vm33_vm2, %v6954_v4 }
 0x11a   :  { %5173 = vmatmul.msk.bf16.gmra.mxu3 %vm33_vm2, %v6958_v45 }
 0x11b   :  { %5193 = vmatmul.msk.bf16.gmra.mxu0 %vm33_vm2, %v664_v6 }
 0x11e   :  { %v325_v3 = vpop.f32.mrf.mxu1 }
 0x11f   :  { %v365_v17 = vadd.f32 %v6973_v53, %v325_v3 }
 0x121   :  { %5206 = vmatmul.msk.bf16.vlgmr.msra.gmra.mxu1 %vm33_vm2, %v787_v39 }
 0x126   :  { %v327_v63 = vpop.f32.mrf.mxu1 }
 0x128   :  { %v715_v22 = vpop.f32.mrf.mxu0 }
 0x129   :  { %5226 = vmatmul.msk.bf16.vlgmr.msra.gmra.mxu2 %vm33_vm2, %v917_v44 }
 0x12a   :  { %5246 = vmatmul.msk.bf16.vlgmr.msra.gmra.mxu3 %vm33_vm2, %v6741_v35  ;;  %v366_v35 = vadd.f32 %v6973_v53, %v327_v63 }
 0x12b   :  { %5266 = vmatmul.msk.bf16.vlgmr.msra.gmra.mxu0 %vm33_vm2, %v6780_v56 }
 0x12c   :  { %v455_v32 = vpop.f32.mrf.mxu2 }
 0x12d   :  { %v585_v39 = vpop.f32.mrf.mxu3  ;;  %v495_v6 = vadd.f32 %v455_v32, %v365_v17  ;;  %v9497_v17 = vpack.c.bf16 %v6728_v26, %v6745_v37  ;;  %v9498_v26 = vpack.c.bf16 %v6752_v40, %v6731_v28  ;;  %v6296_v37 = vld [vmem:[%s9481_s3 + $0x80] sm:$0xff]  ;;  %v9499_v28 = vpack.c.bf16 %v6756_v43, %v6733_v29 }
 0x12e   :  { %v330_v52 = vpop.f32.mrf.mxu1  ;;  %1363 = vmatpush.bf16.msrb.mxu1 %v6296_v37  ;;  %v9500_v29 = vpack.c.bf16 %v6735_v30, %v6754_v41 }
 0x12f   :  { %v625_v51 = vadd.f32 %v585_v39, %v495_v6  ;;  %v367_v33 = vadd.f32 %v6973_v53, %v330_v52 }
 0x130   :  { %v717_v49 = vpop.f32.mrf.mxu0 }
 0x131   :  { %5207 = vmatmul.msk.bf16.gmra.mxu1 %vm33_vm2, %v788_v47  ;;  %v6988_v18 = vadd.f32 %v715_v22, %v625_v51 }
 0x134   :  { %v457_v36 = vpop.f32.mrf.mxu2 }
 0x135   :  { %v587_v44 = vpop.f32.mrf.mxu3  ;;  %v496_v56 = vadd.f32 %v457_v36, %v366_v35 }
 0x136   :  { %v332_v48 = vpop.f32.mrf.mxu1 }
 0x137   :  { %v626_v3 = vadd.f32 %v587_v44, %v496_v56 }
 0x138   :  { %v720_v45 = vpop.f32.mrf.mxu0 }
 0x139   :  { %5227 = vmatmul.msk.bf16.gmra.mxu2 %vm33_vm2, %v9497_v17  ;;  %v6997_v25 = vadd.f32 %v717_v49, %v626_v3 }
 0x13a   :  { %5247 = vmatmul.msk.bf16.gmra.mxu3 %vm33_vm2, %v6804_v5  ;;  %v368_v5 = vadd.f32 %v6973_v53, %v332_v48 }
 0x13b   :  { %5267 = vmatmul.msk.bf16.gmra.mxu0 %vm33_vm2, %v6815_v12 }
 0x13c   :  { %v460_v47 = vpop.f32.mrf.mxu2 }
 0x13d   :  { %v590_v51 = vpop.f32.mrf.mxu3  ;;  %v497_v63 = vadd.f32 %v460_v47, %v367_v33 }
 0x13e   :  { %v335_v22 = vpop.f32.mrf.mxu1 }
 0x13f   :  { %v627_v32 = vadd.f32 %v590_v51, %v497_v63  ;;  %v369_v48 = vadd.f32 %v6973_v53, %v335_v22 }
 0x140   :  { %v722_v39 = vpop.f32.mrf.mxu0 }
 0x141   :  { %5208 = vmatmul.msk.bf16.gmra.mxu1 %vm33_vm2, %v9498_v26  ;;  %v7009_v49 = vadd.f32 %v720_v45, %v627_v32  ;;  %v9501_v26 = vpack.c.bf16 %v6747_v38, %v6762_v46  ;;  %v9502_v38 = vpack.c.bf16 %v6790_v61, %v6786_v58 }
 0x144   :  { %v462_v52 = vpop.f32.mrf.mxu2 }
 0x145   :  { %v592_v12 = vpop.f32.mrf.mxu3  ;;  %v498_v6 = vadd.f32 %v462_v52, %v368_v5 }
 0x146   :  { %v337_v35 = vpop.f32.mrf.mxu1 }
 0x147   :  { %v628_v36 = vadd.f32 %v592_v12, %v498_v6 }
 0x148   :  { %v725_v44 = vpop.f32.mrf.mxu0 }
 0x149   :  { %5228 = vmatmul.msk.bf16.gmra.mxu2 %vm33_vm2, %v9499_v28  ;;  %v7018_v40 = vadd.f32 %v722_v39, %v628_v36 }
 0x14a   :  { %5248 = vmatmul.msk.bf16.gmra.mxu3 %vm33_vm2, %v6840_v34  ;;  %v370_v34 = vadd.f32 %v6973_v53, %v337_v35 }
 0x14b   :  { %5268 = vmatmul.msk.bf16.gmra.mxu0 %vm33_vm2, %v6847_v50 }
 0x14c   :  { %v465_v45 = vpop.f32.mrf.mxu2 }
 0x14d   :  { %v595_v56 = vpop.f32.mrf.mxu3  ;;  %v499_v3 = vadd.f32 %v465_v45, %v369_v48 }
 0x14e   :  { %v340_v17 = vpop.f32.mrf.mxu1 }
 0x14f   :  { %v629_v33 = vadd.f32 %v595_v56, %v499_v3  ;;  %v371_v41 = vadd.f32 %v6973_v53, %v340_v17  ;;  %v9503_v56 = vpack.c.bf16 %v6792_v62, %v6788_v59  ;;  %v9504_v59 = vpack.c.bf16 %v6826_v19, %v6822_v14 }
 0x150   :  { %v727_v47 = vpop.f32.mrf.mxu0 }
 0x151   :  { %5209 = vmatmul.msk.bf16.gmra.mxu1 %vm33_vm2, %v9500_v29  ;;  %v7027_v43 = vadd.f32 %v725_v44, %v629_v33 }
 0x154   :  { %v467_v51 = vpop.f32.mrf.mxu2 }
 0x155   :  { %v597_v63 = vpop.f32.mrf.mxu3  ;;  %v500_v50 = vadd.f32 %v467_v51, %v370_v34 }
 0x156   :  { %v342_v32 = vpop.f32.mrf.mxu1 }
 0x157   :  { %v630_v22 = vadd.f32 %v597_v63, %v500_v50  ;;  %v9505_v50 = vpack.c.bf16 %v6828_v20, %v6824_v15  ;;  %v9506_v15 = vpack.c.bf16 %v6857_v1, %v6853_v55 }
 0x158   :  { %v730_v39 = vpop.f32.mrf.mxu0 }
 0x159   :  { %5229 = vmatmul.msk.bf16.gmra.mxu2 %vm33_vm2, %v9501_v26  ;;  %v7036_v30 = vadd.f32 %v727_v47, %v630_v22 }
 0x15a   :  { %5249 = vmatmul.msk.bf16.gmra.mxu3 %vm33_vm2, %v6870_v8  ;;  %v372_v8 = vadd.f32 %v6973_v53, %v342_v32 }
 0x15b   :  { %5269 = vmatmul.msk.bf16.gmra.mxu0 %vm33_vm2, %v6876_v10 }
 0x15c   :  { %v470_v37 = vpop.f32.mrf.mxu2 }
 0x15d   :  { %v600_v5 = vpop.f32.mrf.mxu3  ;;  %v501_v52 = vadd.f32 %v470_v37, %v371_v41 }
 0x15e   :  { %v345_v12 = vpop.f32.mrf.mxu1 }
 0x15f   :  { %v631_v6 = vadd.f32 %v600_v5, %v501_v52  ;;  %v373_v61 = vadd.f32 %v6973_v53, %v345_v12  ;;  %v9507_v5 = vpack.c.bf16 %v6859_v2, %v6855_v42  ;;  %v1046_v2 = vld [vmem:[#allocation2 + $0x88] sm:$0xff] }
 0x160   :  { %v732_v35 = vpop.f32.mrf.mxu0 }
 0x161   :  { %5210 = vmatmul.msk.bf16.gmra.mxu1 %vm33_vm2, %v9502_v38  ;;  %v7045_v46 = vadd.f32 %v730_v39, %v631_v6  ;;  %v786_v6 = vld [vmem:[#allocation2 + $0x81] sm:$0xff] }
 0x164   :  { %v472_v36 = vpop.f32.mrf.mxu2 }
 0x165   :  { %v602_v44 = vpop.f32.mrf.mxu3  ;;  %v502_v10 = vadd.f32 %v472_v36, %v372_v8  ;;  %v794_v36 = vpack.c.bf16 %v786_v6, %v6946_v0 }
 0x166   :  { %v7048_v28 = vpop.f32.mrf.mxu1 }
 0x167   :  { %v632_v48 = vadd.f32 %v602_v44, %v502_v10  ;;  %v7115_v10 = vld [vmem:[#allocation2 + $0x82] sm:$0xff] }
 0x168   :  { %v735_v45 = vpop.f32.mrf.mxu0  ;;  %v924_v0 = vpack.c.bf16 %v7115_v10, %v6948_v9 }
 0x169   :  { %5230 = vmatmul.msk.bf16.gmra.mxu2 %vm33_vm2, %v9503_v56  ;;  %v7056_v58 = vadd.f32 %v732_v35, %v632_v48  ;;  %v1054_v48 = vpack.c.bf16 %v1046_v2, %v6950_v16  ;;  %v9509_v2 = vld [vmem:[#allocation5_spill] sm:$0xff] }
 0x16a   :  { %5250 = vmatmul.msk.bf16.gmra.mxu3 %vm33_vm2, %v6887_v24 }
 0x16b   :  { %5270 = vmatmul.msk.bf16.gmra.mxu0 %vm33_vm2, %v6899_v60 }
 0x16c   :  { %v475_v3 = vpop.f32.mrf.mxu2 }
 0x16d   :  { %v605_v17 = vpop.f32.mrf.mxu3  ;;  %v503_v33 = vadd.f32 %v475_v3, %v373_v61  ;;  %v6301_v3 = vld [vmem:[%s9484_s5 + $0x18] sm:$0xff] }
 0x16e   :  { %v350_v47 = vpop.f32.mrf.mxu1  ;;  %1541 = vmatpush.bf16.msrb.mxu2 %v6301_v3 }
 0x16f   :  { %v633_v29 = vadd.f32 %v605_v17, %v503_v33  ;;  %v375_v14 = vadd.f32 %v6973_v53, %v350_v47 }
 0x170   :  { %v7061_v34 = vpop.f32.mrf.mxu0 }
 0x171   :  { %5211 = vmatmul.msk.bf16.gmra.mxu1 %vm33_vm2, %v9504_v59  ;;  %v7067_v62 = vadd.f32 %v735_v45, %v633_v29 }
 0x174   :  { %v7069_v24 = vpop.f32.mrf.mxu2 }
 0x175   :  { %v7071_v51 = vpop.f32.mrf.mxu3 }
 0x176   :  { %v7073_v60 = vpop.f32.mrf.mxu1 }
 0x178   :  { %v740_v63 = vpop.f32.mrf.mxu0 }
 0x179   :  { %5231 = vmatmul.msk.bf16.gmra.mxu2 %vm33_vm2, %v9505_v50 }
 0x17a   :  { %5251 = vmatmul.msk.bf16.gmra.mxu3 %vm33_vm2, %v6910_v27 }
 0x17b   :  { %5271 = vmatmul.msk.bf16.gmra.mxu0 %vm33_vm2, %v6931_v31 }
 0x17c   :  { %v480_v19 = vpop.f32.mrf.mxu2 }
 0x17d   :  { %v610_v32 = vpop.f32.mrf.mxu3  ;;  %v505_v22 = vadd.f32 %v480_v19, %v375_v14 }
 0x17e   :  { %v355_v39 = vpop.f32.mrf.mxu1 }
 0x17f   :  { %v635_v26 = vadd.f32 %v610_v32, %v505_v22  ;;  %v377_v55 = vadd.f32 %v6973_v53, %v355_v39 }
 0x180   :  { %v7084_v41 = vpop.f32.mrf.mxu0 }
 0x181   :  { %5212 = vmatmul.msk.bf16.gmra.mxu1 %vm33_vm2, %v9506_v15  ;;  %v7090_v20 = vadd.f32 %v740_v63, %v635_v26 }
 0x184   :  { %v7092_v27 = vpop.f32.mrf.mxu2 }
 0x185   :  { %v7094_v37 = vpop.f32.mrf.mxu3 }
 0x186   :  { %v7096_v31 = vpop.f32.mrf.mxu1 }
 0x188   :  { %v745_v1 = vpop.f32.mrf.mxu0 }
 0x189   :  { %5232 = vmatmul.msk.bf16.gmra.mxu2 %vm33_vm2, %v9507_v5 }
 0x18a   :  { %5252 = vmatmul.msk.bf16.gmra.mxu3 %vm33_vm2, %v6942_v21  ;;  %v1176_v21 = vld [vmem:[#allocation2 + $0x89] sm:$0xff] }
 0x18b   :  { %5272 = vmatmul.msk.bf16.gmra.mxu0 %vm33_vm2, %v6954_v4  ;;  %v1184_v61 = vpack.c.bf16 %v1176_v21, %v786_v6 }
 0x18c   :  { %v485_v52 = vpop.f32.mrf.mxu2 }
 0x18d   :  { %v615_v12 = vpop.f32.mrf.mxu3  ;;  %v507_v35 = vadd.f32 %v485_v52, %v377_v55 }
 0x18e   :  { %v360_v38 = vpop.f32.mrf.mxu1 }
 0x18f   :  { %v637_v8 = vadd.f32 %v615_v12, %v507_v35  ;;  %v379_v16 = vadd.f32 %v6973_v53, %v360_v38 }
 0x190   :  { %v7118_v45 = vpop.f32.mrf.mxu0 }
 0x191   :  { %5213 = vmatmul.msk.bf16.gmra.mxu1 %vm33_vm2, %v794_v36  ;;  %v7109_v42 = vadd.f32 %v745_v1, %v637_v8 }
 0x194   :  { %v7111_v44 = vpop.f32.mrf.mxu2 }
 0x195   :  { %v7113_v4 = vpop.f32.mrf.mxu3 }
 0x196   :  { %v7120_v56 = vpop.f32.mrf.mxu1 }
 0x198   :  { %v750_v63 = vpop.f32.mrf.mxu0 }
 0x199   :  { %5233 = vmatmul.msk.bf16.gmra.mxu2 %vm33_vm2, %v924_v0  ;;  %v1306_v0 = vld [vmem:[#allocation2 + $0x8a] sm:$0xff] }
 0x19a   :  { %5253 = vmatmul.msk.bf16.gmra.mxu3 %vm33_vm2, %v1054_v48  ;;  %v1314_v3 = vpack.c.bf16 %v1306_v0, %v7115_v10  ;;  %v6313_v10 = vld [vmem:[%s9484_s5 + $0x78] sm:$0xff] }
 0x19b   :  { %5273 = vmatmul.msk.bf16.gmra.mxu0 %vm33_vm2, %v1184_v61  ;;  %1979 = vmatpush.bf16.msra.mxu1 %v6313_v10 }
 0x19c   :  { %v490_v17 = vpop.f32.mrf.mxu2 }
 0x19d   :  { %v509_v33 = vadd.f32 %v490_v17, %v379_v16  ;;  %v620_v47 = vpop.f32.mrf.mxu3 }
 0x19e   :  { %v845_v29 = vpop.f32.mrf.mxu1 }
 0x19f   :  { %v639_v59 = vadd.f32 %v620_v47, %v509_v33  ;;  %v7132_v9 = vadd.f32 %v845_v29, %v6988_v18  ;;  %v6305_v33 = vld [vmem:[%s9484_s5 + $0x38] sm:$0xff] }
 0x1a0   :  { %v7187_v12 = vpop.f32.mrf.mxu0  ;;  %v6309_v47 = vld [vmem:[%s9484_s5 + $0x58] sm:$0xff]  ;;  %1687 = vmatpush.bf16.msrb.mxu3 %v6305_v33 }
 0x1a1   :  { %5286 = vmatmul.msk.bf16.vlgmr.msrb.gmra.mxu1 %vm33_vm2, %v6784_v57  ;;  %v7136_v50 = vadd.f32 %v750_v63, %v639_v59  ;;  %v6300_v57 = vld [vmem:[%s9484_s5 + $0x10] sm:$0xff]  ;;  %1833 = vmatpush.bf16.msrb.mxu0 %v6309_v47 }
 0x1a2   :  { %1542 = vmatpush.bf16.msrb.mxu2 %v6300_v57  ;;  %v6317_v57 = vld [vmem:[%s9484_s5 + $0x98] sm:$0xff] }
 0x1a4   :  { %v7178_v1 = vpop.f32.mrf.mxu2 }
 0x1a5   :  { %v7183_v52 = vpop.f32.mrf.mxu3 }
 0x1a6   :  { %v847_v14 = vpop.f32.mrf.mxu1 }
 0x1a7   :  { %v7139_v19 = vadd.f32 %v847_v14, %v6997_v25  ;;  %v6308_v14 = vld [vmem:[%s9484_s5 + $0x50] sm:$0xff] }
 0x1a8   :  { %v7194_v38 = vpop.f32.mrf.mxu0  ;;  %1834 = vmatpush.bf16.msrb.mxu0 %v6308_v14 }
 0x1ad   :  { %v1105_v35 = vpop.f32.mrf.mxu3 }
 0x1ae   :  { %v850_v32 = vpop.f32.mrf.mxu1 }
 0x1af   :  { %v7142_v22 = vadd.f32 %v850_v32, %v7009_v49  ;;  %v6312_v32 = vld [vmem:[%s9484_s5 + $0x70] sm:$0xff] }
 0x1b0   :  { %v7221_v48 = vpop.f32.mrf.mxu0  ;;  %1980 = vmatpush.bf16.msra.mxu1 %v6312_v32 }
 0x1b1   :  { %5287 = vmatmul.msk.bf16.gmra.mxu1 %vm33_vm2, %v6819_v13 }
 0x1b5   :  { %v7211_v21 = vpop.f32.mrf.mxu3 }
 0x1b6   :  { %v852_v39 = vpop.f32.mrf.mxu1 }
 0x1b7   :  { %v7147_v18 = vadd.f32 %v852_v39, %v7018_v40 }
 0x1b8   :  { %v1240_v59 = vpop.f32.mrf.mxu0 }
 0x1bd   :  { %v1110_v16 = vpop.f32.mrf.mxu3 }
 0x1be   :  { %v855_v26 = vpop.f32.mrf.mxu1 }
 0x1bf   :  { %v7153_v25 = vadd.f32 %v855_v26, %v7027_v43  ;;  %v6299_v43 = vld [vmem:[%s9484_s5 + $0x8] sm:$0xff] }
 0x1c0   :  { %1543 = vmatpush.bf16.msrb.mxu2 %v6299_v43 }
 0x1c1   :  { %5288 = vmatmul.msk.bf16.gmra.mxu1 %vm33_vm2, %v6851_v54 }
 0x1c6   :  { %v857_v49 = vpop.f32.mrf.mxu1 }
 0x1c7   :  { %v7158_v15 = vadd.f32 %v857_v49, %v7036_v30  ;;  %v6303_v49 = vld [vmem:[%s9484_s5 + $0x28] sm:$0xff] }
 0x1ce   :  { %v860_v13 = vpop.f32.mrf.mxu1 }
 0x1cf   :  { %v7161_v40 = vadd.f32 %v860_v13, %v7045_v46  ;;  %v6307_v13 = vld [vmem:[%s9484_s5 + $0x48] sm:$0xff] }
 0x1d0   :  { %1835 = vmatpush.bf16.msrb.mxu0 %v6307_v13 }
 0x1d1   :  { %5289 = vmatmul.msk.bf16.gmra.mxu1 %vm33_vm2, %v6880_v11 }
 0x1d6   :  { %v862_v5 = vpop.f32.mrf.mxu1 }
 0x1d7   :  { %v7166_v55 = vadd.f32 %v862_v5, %v7056_v58  ;;  %v6311_v5 = vld [vmem:[%s9484_s5 + $0x68] sm:$0xff] }
 0x1d8   :  { %1981 = vmatpush.bf16.msra.mxu1 %v6311_v5 }
 0x1de   :  { %v865_v54 = vpop.f32.mrf.mxu1 }
 0x1df   :  { %v7172_v30 = vadd.f32 %v865_v54, %v7067_v62  ;;  %v975_v62 = vpop.f32.mrf.mxu2  ;;  %v6302_v54 = vld [vmem:[%s9484_s5 + $0x20] sm:$0xff] }
 0x1e0   :  { %v1015_v39 = vadd.f32 %v975_v62, %v7132_v9  ;;  %v1112_v9 = vpop.f32.mrf.mxu3  ;;  %v6310_v62 = vld [vmem:[%s9484_s5 + $0x60] sm:$0xff] }
 0x1e1   :  { %5290 = vmatmul.msk.bf16.gmra.mxu1 %vm33_vm2, %v6903_v7  ;;  %v6298_v7 = vld [vmem:[%s9484_s5] sm:$0xff] }
 0x1e2   :  { %1544 = vmatpush.bf16.msrb.mxu2 %v6298_v7  ;;  %v1145_v43 = vadd.f32 %v1105_v35, %v1015_v39  ;;  %v1242_v7 = vpop.f32.mrf.mxu0  ;;  %1982 = vmatpush.bf16.msra.mxu1 %v6310_v62 }
 0x1e6   :  { %v7176_v46 = vpop.f32.mrf.mxu1  ;;  %2125 = vmatpush.bf16.msra.mxu2 %v6317_v57 }
 0x1e8   :  { %v1115_v33 = vpop.f32.mrf.mxu3 }
 0x1ea   :  { %v1245_v10 = vpop.f32.mrf.mxu0 }
 0x1ee   :  { %v870_v11 = vpop.f32.mrf.mxu1 }
 0x1ef   :  { %v7181_v58 = vadd.f32 %v870_v11, %v7090_v20  ;;  %v7196_v20 = vpop.f32.mrf.mxu2  ;;  %v6306_v11 = vld [vmem:[%s9484_s5 + $0x40] sm:$0xff] }
 0x1f0   :  { %1836 = vmatpush.bf16.msrb.mxu0 %v6306_v11  ;;  %v1016_v35 = vadd.f32 %v7196_v20, %v7139_v19 }
 0x1f1   :  { %5291 = vmatmul.msk.bf16.gmra.mxu1 %vm33_vm2, %v6935_v23  ;;  %v9508_v23 = vmov 0.0  }
 0x1f2   :  { %54 = vst.msk [vmem:[#allocation3] sm:$0xff] %vm53_vm4, %v9508_v23  ;;  %v1247_v13 = vpop.f32.mrf.mxu0 }
 0x1f3   :  { %55 = vst.msk [vmem:[#allocation3 + $0x8] sm:$0xff] %vm53_vm4, %v9508_v23 }
 0x1f4   :  { %56 = vst.msk [vmem:[#allocation3 + $0x10] sm:$0xff] %vm53_vm4, %v9508_v23 }
 0x1f5   :  { %57 = vst.msk [vmem:[#allocation3 + $0x18] sm:$0xff] %vm53_vm4, %v9508_v23 }
 0x1f6   :  { %v7189_v6 = vpop.f32.mrf.mxu1  ;;  %58 = vst.msk [vmem:[#allocation3 + $0x20] sm:$0xff] %vm53_vm4, %v9508_v23 }
 0x1f7   :  { %59 = vst.msk [vmem:[#allocation3 + $0x28] sm:$0xff] %vm53_vm4, %v9508_v23  ;;  %v980_v61 = vpop.f32.mrf.mxu2 }
 0x1f8   :  { %60 = vst.msk [vmem:[#allocation3 + $0x30] sm:$0xff] %vm53_vm4, %v9508_v23  ;;  %v1017_v47 = vadd.f32 %v980_v61, %v7142_v22 }
 0x1f9   :  { %61 = vst.msk [vmem:[#allocation3 + $0x38] sm:$0xff] %vm53_vm4, %v9508_v23 }
 0x1fa   :  { %62 = vst.msk [vmem:[#allocation3 + $0x40] sm:$0xff] %vm53_vm4, %v9508_v23  ;;  %v1147_v19 = vadd.f32 %v1110_v16, %v1017_v47 }
 0x1fb   :  { %63 = vst.msk [vmem:[#allocation3 + $0x48] sm:$0xff] %vm53_vm4, %v9508_v23 }
 0x1fc   :  { %64 = vst.msk [vmem:[#allocation3 + $0x50] sm:$0xff] %vm53_vm4, %v9508_v23 }
 0x1fd   :  { %65 = vst.msk [vmem:[#allocation3 + $0x58] sm:$0xff] %vm53_vm4, %v9508_v23 }
 0x1fe   :  { %v875_v8 = vpop.f32.mrf.mxu1  ;;  %66 = vst.msk [vmem:[#allocation3 + $0x60] sm:$0xff] %vm53_vm4, %v9508_v23 }
 0x1ff   :  { %v7199_v36 = vadd.f32 %v875_v8, %v7109_v42  ;;  %67 = vst.msk [vmem:[#allocation3 + $0x68] sm:$0xff] %vm53_vm4, %v9508_v23  ;;  %v982_v63 = vpop.f32.mrf.mxu2 }
 0x200   :  { %68 = vst.msk [vmem:[#allocation3 + $0x70] sm:$0xff] %vm53_vm4, %v9508_v23  ;;  %v1018_v57 = vadd.f32 %v982_v63, %v7147_v18  ;;  %v6316_v18 = vld [vmem:[%s9484_s5 + $0x90] sm:$0xff] }
 0x201   :  { %5292 = vmatmul.msk.bf16.gmra.mxu1 %vm33_vm2, %v9509_v2  ;;  %69 = vst.msk [vmem:[#allocation3 + $0x78] sm:$0xff] %vm53_vm4, %v9508_v23  ;;  %2126 = vmatpush.bf16.msra.mxu2 %v6316_v18 }
 0x202   :  { %70 = vst.msk [vmem:[#allocation3 + $0x80] sm:$0xff] %vm53_vm4, %v9508_v23 }
 0x203   :  { %71 = vst.msk [vmem:[#allocation3 + $0x88] sm:$0xff] %vm53_vm4, %v9508_v23 }
 0x204   :  { %72 = vst.msk [vmem:[#allocation3 + $0x90] sm:$0xff] %vm53_vm4, %v9508_v23  ;;  %v1275_v23 = vadd.f32 %v7194_v38, %v1145_v43  ;;  %v1117_v38 = vpop.f32.mrf.mxu3 }
 0x206   :  { %v7217_v42 = vpop.f32.mrf.mxu1 }
 0x207   :  { %v985_v8 = vpop.f32.mrf.mxu2 }
 0x208   :  { %v1019_v16 = vadd.f32 %v985_v8, %v7153_v25 }
 0x20e   :  { %v880_v17 = vpop.f32.mrf.mxu1 }
 0x20f   :  { %v7250_v29 = vadd.f32 %v880_v17, %v7136_v50  ;;  %v6304_v50 = vld [vmem:[%s9484_s5 + $0x30] sm:$0xff]  ;;  %v987_v14 = vpop.f32.mrf.mxu2 }
 0x210   :  { %1688 = vmatpush.bf16.msrb.mxu3 %v6304_v50 }
 0x211   :  { %5293 = vmatmul.msk.bf16.gmra.mxu1 %vm33_vm2, %v1314_v3  ;;  %v1146_v3 = vadd.f32 %v7211_v21, %v1016_v35  ;;  %v1277_v21 = vadd.f32 %v1240_v59, %v1147_v19  ;;  %v1120_v59 = vpop.f32.mrf.mxu3 }
 0x213   :  { %v1276_v50 = vadd.f32 %v7221_v48, %v1146_v3 }
 0x214   :  { %1689 = vmatpush.bf16.msrb.mxu3 %v6303_v49 }
 0x216   :  { %v7274_v26 = vpop.f32.mrf.mxu1 }
 0x217   :  { %v990_v43 = vpop.f32.mrf.mxu2 }
 0x218   :  { %1690 = vmatpush.bf16.msrb.mxu3 %v6302_v54  ;;  %v1148_v54 = vadd.f32 %v1112_v9, %v1018_v57  ;;  %v1149_v9 = vadd.f32 %v1115_v33, %v1019_v16 }
 0x219   :  { %v1122_v57 = vpop.f32.mrf.mxu3 }
 0x21a   :  { %v1278_v62 = vadd.f32 %v1242_v7, %v1148_v54  ;;  %v1279_v33 = vadd.f32 %v1245_v10, %v1149_v9 }
 0x21e   :  { %v1365_v2 = vpop.f32.mrf.mxu1 }
 0x21f   :  { %v1405_v0 = vadd.f32 %v1365_v2, %v1275_v23  ;;  %v1250_v23 = vpop.f32.mrf.mxu0 }
 0x221   :  { %v1421_v17 = vmax.f32 %v1405_v0, 0.0 }
 0x223   :  { %1437 = vst.msk [vmem:[#allocation3] sm:$0xff] %vm53_vm4, %v1421_v17  ;;  %v992_v17 = vpop.f32.mrf.mxu2 }
 0x226   :  { %v1367_v32 = vpop.f32.mrf.mxu1 }
 0x227   :  { %v1406_v39 = vadd.f32 %v1367_v32, %v1276_v50 }
 0x229   :  { %v1422_v20 = vmax.f32 %v1406_v39, 0.0  ;;  %v1020_v39 = vadd.f32 %v987_v14, %v7158_v15 }
 0x22a   :  { %v1457_v61 = vld [vmem:[#allocation3] sm:$0xff] }
 0x22b   :  { %1438 = vst.msk [vmem:[#allocation3 + $0x8] sm:$0xff] %vm53_vm4, %v1422_v20 }
 0x22e   :  { %v1370_v49 = vpop.f32.mrf.mxu1 }
 0x22f   :  { %v1407_v5 = vadd.f32 %v1370_v49, %v1277_v21  ;;  %v1150_v21 = vadd.f32 %v1117_v38, %v1020_v39  ;;  %v1021_v38 = vadd.f32 %v990_v43, %v7161_v40  ;;  %v1022_v43 = vadd.f32 %v992_v17, %v7166_v55 }
 0x231   :  { %v1423_v22 = vmax.f32 %v1407_v5, 0.0  ;;  %v1151_v18 = vadd.f32 %v1120_v59, %v1021_v38 }
 0x232   :  { %v1458_v11 = vld [vmem:[#allocation3 + $0x8] sm:$0xff] }
 0x233   :  { %1439 = vst.msk [vmem:[#allocation3 + $0x10] sm:$0xff] %vm53_vm4, %v1423_v22  ;;  %v1473_v48 = vpack.c.bf16 %v1458_v11, %v1457_v61  ;;  %v1602_v0 = vld [vmem:[#allocation3 + $0x1] sm:$0xff]  ;;  %v1252_v61 = vpop.f32.mrf.mxu0 }
 0x234   :  { %v1748_v3 = vld [vmem:[#allocation3 + $0x2] sm:$0xff] }
 0x235   :  { %5310 = vmatmul.msk.bf16.vlgmr.msrb.gmra.mxu2 %vm53_vm4, %v1473_v48  ;;  %v1280_v48 = vadd.f32 %v1247_v13, %v1150_v21 }
 0x236   :  { %v1372_v63 = vpop.f32.mrf.mxu1 }
 0x237   :  { %v1408_v35 = vadd.f32 %v1372_v63, %v1278_v62 }
 0x239   :  { %v1424_v2 = vmax.f32 %v1408_v35, 0.0  ;;  %v1125_v35 = vpop.f32.mrf.mxu3 }
 0x23a   :  { %v7309_v47 = vld [vmem:[#allocation3 + $0x9] sm:$0xff] }
 0x23b   :  { %v7311_v25 = vld [vmem:[#allocation3 + $0xa] sm:$0xff]  ;;  %1440 = vst.msk [vmem:[#allocation3 + $0x18] sm:$0xff] %vm53_vm4, %v1424_v2  ;;  %v1618_v7 = vpack.c.bf16 %v7309_v47, %v1602_v0  ;;  %v1255_v59 = vpop.f32.mrf.mxu0 }
 0x23c   :  { %v1895_v8 = vld [vmem:[#allocation3 + $0x10] sm:$0xff]  ;;  %v1764_v50 = vpack.c.bf16 %v7311_v25, %v1748_v3 }
 0x23d   :  { %v1910_v32 = vpack.c.bf16 %v1895_v8, %v1458_v11  ;;  %5342 = vmatmul.msk.bf16.vlgmr.msrb.gmra.mxu3 %vm53_vm4, %v1618_v7  ;;  %v995_v11 = vpop.f32.mrf.mxu2 }
 0x23e   :  { %5374 = vmatmul.msk.bf16.vlgmr.msrb.gmra.mxu0 %vm53_vm4, %v1764_v50  ;;  %v1375_v19 = vpop.f32.mrf.mxu1 }
 0x23f   :  { %5406 = vmatmul.msk.bf16.vlgmr.msra.gmra.mxu1 %vm53_vm4, %v1910_v32  ;;  %v1409_v20 = vadd.f32 %v1375_v19, %v1279_v33  ;;  %v374_v32 = vadd.f32 %v6973_v53, %v7048_v28  ;;  %v1152_v19 = vadd.f32 %v1122_v57, %v1022_v43  ;;  %v1023_v57 = vadd.f32 %v995_v11, %v7172_v30 }
 0x241   :  { %v1425_v49 = vmax.f32 %v1409_v20, 0.0  ;;  %v504_v33 = vadd.f32 %v7069_v24, %v374_v32  ;;  %v1282_v38 = vadd.f32 %v1252_v61, %v1152_v19 }
 0x242   :  { %v1460_v5 = vld [vmem:[#allocation3 + $0x18] sm:$0xff] }
 0x243   :  { %v7320_v54 = vld [vmem:[#allocation3 + $0x11] sm:$0xff]  ;;  %1441 = vst.msk [vmem:[#allocation3 + $0x20] sm:$0xff] %vm53_vm4, %v1425_v49  ;;  %v7325_v15 = vpack.c.bf16 %v1460_v5, %v1895_v8  ;;  %v1281_v8 = vadd.f32 %v1250_v23, %v1151_v18  ;;  %v634_v24 = vadd.f32 %v7071_v51, %v504_v33  ;;  %v376_v33 = vadd.f32 %v6973_v53, %v7073_v60 }
 0x244   :  { %v7322_v22 = vld [vmem:[#allocation3 + $0x12] sm:$0xff]  ;;  %v2056_v10 = vpack.c.bf16 %v7320_v54, %v7309_v47 }
 0x245   :  { %v2202_v14 = vpack.c.bf16 %v7322_v22, %v7311_v25  ;;  %5311 = vmatmul.msk.bf16.gmra.mxu2 %vm53_vm4, %v7325_v15  ;;  %v997_v7 = vpop.f32.mrf.mxu2 }
 0x246   :  { %v1377_v16 = vpop.f32.mrf.mxu1 }
 0x247   :  { %v1410_v62 = vadd.f32 %v1377_v16, %v1280_v48  ;;  %v6315_v48 = vld [vmem:[%s9484_s5 + $0x88] sm:$0xff] }
 0x248   :  { %2127 = vmatpush.bf16.msra.mxu2 %v6315_v48 }
 0x249   :  { %v1426_v63 = vmax.f32 %v1410_v62, 0.0  ;;  %v1257_v62 = vpop.f32.mrf.mxu0 }
 0x24a   :  { %v7334_v9 = vld [vmem:[#allocation3 + $0x19] sm:$0xff] }
 0x24b   :  { %v7336_v2 = vld [vmem:[#allocation3 + $0x1a] sm:$0xff]  ;;  %1442 = vst.msk [vmem:[#allocation3 + $0x28] sm:$0xff] %vm53_vm4, %v1426_v63  ;;  %v7341_v3 = vpack.c.bf16 %v7334_v9, %v7320_v54 }
 0x24c   :  { %v1897_v0 = vld [vmem:[#allocation3 + $0x20] sm:$0xff]  ;;  %v7345_v40 = vpack.c.bf16 %v7336_v2, %v7322_v22 }
 0x24d   :  { %v1911_v13 = vpack.c.bf16 %v1897_v0, %v1460_v5  ;;  %5343 = vmatmul.msk.bf16.gmra.mxu3 %vm53_vm4, %v7341_v3  ;;  %v1127_v5 = vpop.f32.mrf.mxu3  ;;  %v1000_v63 = vpop.f32.mrf.mxu2 }
 0x24e   :  { %5375 = vmatmul.msk.bf16.gmra.mxu0 %vm53_vm4, %v7345_v40  ;;  %v1380_v50 = vpop.f32.mrf.mxu1 }
 0x24f   :  { %5407 = vmatmul.msk.bf16.gmra.mxu1 %vm53_vm4, %v1911_v13  ;;  %v1411_v39 = vadd.f32 %v1380_v50, %v1281_v8  ;;  %v1153_v13 = vadd.f32 %v1125_v35, %v1023_v57 }
 0x251   :  { %v1427_v55 = vmax.f32 %v1411_v39, 0.0  ;;  %v1283_v32 = vadd.f32 %v1255_v59, %v1153_v13 }
 0x252   :  { %v1462_v17 = vld [vmem:[#allocation3 + $0x28] sm:$0xff] }
 0x253   :  { %v7356_v20 = vld [vmem:[#allocation3 + $0x21] sm:$0xff]  ;;  %1443 = vst.msk [vmem:[#allocation3 + $0x30] sm:$0xff] %vm53_vm4, %v1427_v55  ;;  %v7361_v23 = vpack.c.bf16 %v1462_v17, %v1897_v0  ;;  %v764_v0 = vadd.f32 %v7061_v34, %v634_v24  ;;  %v506_v55 = vadd.f32 %v7092_v27, %v376_v33 }
 0x254   :  { %v7358_v21 = vld [vmem:[#allocation3 + $0x22] sm:$0xff]  ;;  %v2057_v49 = vpack.c.bf16 %v7356_v20, %v7334_v9 }
 0x255   :  { %5312 = vmatmul.msk.bf16.gmra.mxu2 %vm53_vm4, %v7361_v23  ;;  %v894_v61 = vadd.f32 %v7176_v46, %v764_v0  ;;  %v1130_v46 = vpop.f32.mrf.mxu3  ;;  %v1002_v57 = vpop.f32.mrf.mxu2  ;;  %v636_v27 = vadd.f32 %v7094_v37, %v506_v55 }
 0x256   :  { %v1382_v16 = vpop.f32.mrf.mxu1 }
 0x257   :  { %v1412_v18 = vadd.f32 %v1382_v16, %v1282_v38  ;;  %v1024_v35 = vadd.f32 %v997_v7, %v894_v61 }
 0x259   :  { %v1428_v43 = vmax.f32 %v1412_v18, 0.0  ;;  %v1154_v24 = vadd.f32 %v1127_v5, %v1024_v35  ;;  %v1025_v5 = vadd.f32 %v1000_v63, %v7181_v58 }
 0x25a   :  { %v7375_v51 = vld [vmem:[#allocation3 + $0x29] sm:$0xff] }
 0x25b   :  { %v7377_v30 = vld [vmem:[#allocation3 + $0x2a] sm:$0xff]  ;;  %1444 = vst.msk [vmem:[#allocation3 + $0x38] sm:$0xff] %vm53_vm4, %v1428_v43  ;;  %v7383_v8 = vpack.c.bf16 %v7375_v51, %v7356_v20  ;;  %v1284_v0 = vadd.f32 %v1257_v62, %v1154_v24  ;;  %v378_v24 = vadd.f32 %v6973_v53, %v7096_v31  ;;  %v7623_v31 = vld [vmem:[%s9485_s6] ss:$0 sm:$0xff] }
 0x25c   :  { %v1899_v11 = vld [vmem:[#allocation3 + $0x30] sm:$0xff]  ;;  %v7387_v50 = vpack.c.bf16 %v7377_v30, %v7358_v21 }
 0x25d   :  { %v1912_v34 = vpack.c.bf16 %v1899_v11, %v1462_v17  ;;  %5344 = vmatmul.msk.bf16.gmra.mxu3 %vm53_vm4, %v7383_v8  ;;  %v1260_v17 = vpop.f32.mrf.mxu0  ;;  %v1132_v61 = vpop.f32.mrf.mxu3 }
 0x25e   :  { %5376 = vmatmul.msk.bf16.gmra.mxu0 %vm53_vm4, %v7387_v50  ;;  %v1385_v39 = vpop.f32.mrf.mxu1  ;;  %v1005_v63 = vpop.f32.mrf.mxu2 }
 0x25f   :  { %5408 = vmatmul.msk.bf16.gmra.mxu1 %vm53_vm4, %v1912_v34  ;;  %v1413_v19 = vadd.f32 %v1385_v39, %v1283_v32  ;;  %v1155_v34 = vadd.f32 %v1130_v46, %v1025_v5 }
 0x261   :  { %v1429_v7 = vmax.f32 %v1413_v19, 0.0 }
 0x262   :  { %v1464_v38 = vld [vmem:[#allocation3 + $0x38] sm:$0xff] }
 0x263   :  { %v7397_v48 = vld [vmem:[#allocation3 + $0x31] sm:$0xff]  ;;  %1445 = vst.msk [vmem:[#allocation3 + $0x40] sm:$0xff] %vm53_vm4, %v1429_v7  ;;  %v7402_v59 = vpack.c.bf16 %v1464_v38, %v1899_v11  ;;  %v766_v11 = vadd.f32 %v7084_v41, %v636_v27  ;;  %v508_v27 = vadd.f32 %v7111_v44, %v378_v24 }
 0x264   :  { %v7399_v16 = vld [vmem:[#allocation3 + $0x32] sm:$0xff] }
 0x265   :  { %5313 = vmatmul.msk.bf16.gmra.mxu2 %vm53_vm4, %v7402_v59  ;;  %v896_v37 = vadd.f32 %v7189_v6, %v766_v11  ;;  %v1262_v19 = vpop.f32.mrf.mxu0  ;;  %v1285_v6 = vadd.f32 %v1260_v17, %v1155_v34  ;;  %v638_v44 = vadd.f32 %v7113_v4, %v508_v27  ;;  %v1027_v34 = vadd.f32 %v1005_v63, %v7199_v36 }
 0x266   :  { %v1387_v13 = vpop.f32.mrf.mxu1 }
 0x267   :  { %v1414_v43 = vadd.f32 %v1387_v13, %v1284_v0  ;;  %v1026_v46 = vadd.f32 %v1002_v57, %v896_v37  ;;  %v1135_v0 = vpop.f32.mrf.mxu3  ;;  %v1007_v37 = vpop.f32.mrf.mxu2 }
 0x269   :  { %v1430_v35 = vmax.f32 %v1414_v43, 0.0  ;;  %v1156_v5 = vadd.f32 %v1132_v61, %v1026_v46 }
 0x26a   :  { %v7413_v32 = vld [vmem:[#allocation3 + $0x39] sm:$0xff] }
 0x26b   :  { %v7415_v39 = vld [vmem:[#allocation3 + $0x3a] sm:$0xff]  ;;  %1446 = vst.msk [vmem:[#allocation3 + $0x48] sm:$0xff] %vm53_vm4, %v1430_v35  ;;  %v7421_v58 = vpack.c.bf16 %v7413_v32, %v7397_v48  ;;  %v1286_v35 = vadd.f32 %v1262_v19, %v1156_v5 }
 0x26c   :  { %v1901_v33 = vld [vmem:[#allocation3 + $0x40] sm:$0xff]  ;;  %v7425_v62 = vpack.c.bf16 %v7415_v39, %v7399_v16 }
 0x26d   :  { %v1913_v41 = vpack.c.bf16 %v1901_v33, %v1464_v38  ;;  %5345 = vmatmul.msk.bf16.gmra.mxu3 %vm53_vm4, %v7421_v58  ;;  %v1265_v61 = vpop.f32.mrf.mxu0 }
 0x26e   :  { %5377 = vmatmul.msk.bf16.gmra.mxu0 %vm53_vm4, %v7425_v62  ;;  %v1390_v55 = vpop.f32.mrf.mxu1 }
 0x26f   :  { %5409 = vmatmul.msk.bf16.gmra.mxu1 %vm53_vm4, %v1913_v41  ;;  %v1415_v7 = vadd.f32 %v1390_v55, %v1285_v6  ;;  %v768_v6 = vadd.f32 %v7118_v45, %v638_v44  ;;  %v1157_v55 = vadd.f32 %v1135_v0, %v1027_v34  ;;  %v1137_v5 = vpop.f32.mrf.mxu3  ;;  %v380_v44 = vadd.f32 %v6973_v53, %v7120_v56 }
 0x271   :  { %v1431_v38 = vmax.f32 %v1415_v7, 0.0  ;;  %v898_v63 = vadd.f32 %v7217_v42, %v768_v6  ;;  %v1287_v42 = vadd.f32 %v1265_v61, %v1157_v55 }
 0x272   :  { %v1466_v57 = vld [vmem:[#allocation3 + $0x48] sm:$0xff] }
 0x273   :  { %v7435_v13 = vld [vmem:[#allocation3 + $0x41] sm:$0xff]  ;;  %1447 = vst.msk [vmem:[#allocation3 + $0x50] sm:$0xff] %vm53_vm4, %v1431_v38  ;;  %v7440_v17 = vpack.c.bf16 %v1466_v57, %v1901_v33  ;;  %v1028_v38 = vadd.f32 %v1007_v37, %v898_v63 }
 0x274   :  { %v7437_v43 = vld [vmem:[#allocation3 + $0x42] sm:$0xff] }
 0x275   :  { %5314 = vmatmul.msk.bf16.gmra.mxu2 %vm53_vm4, %v7440_v17  ;;  %v6314_v33 = vld [vmem:[%s9484_s5 + $0x80] sm:$0xff] }
 0x276   :  { %v1392_v41 = vpop.f32.mrf.mxu1  ;;  %2128 = vmatpush.bf16.msra.mxu2 %v6314_v33  ;;  %v1010_v33 = vpop.f32.mrf.mxu2 }
 0x277   :  { %v1416_v46 = vadd.f32 %v1392_v41, %v1286_v35  ;;  %v1267_v35 = vpop.f32.mrf.mxu0  ;;  %v1158_v41 = vadd.f32 %v1137_v5, %v1028_v38  ;;  %v1140_v56 = vpop.f32.mrf.mxu3  ;;  %v1029_v63 = vadd.f32 %v1010_v33, %v7250_v29 }
 0x279   :  { %v1432_v24 = vmax.f32 %v1416_v46, 0.0 }
 0x27a   :  { %v7454_v4 = vld [vmem:[#allocation3 + $0x49] sm:$0xff] }
 0x27b   :  { %v7456_v7 = vld [vmem:[#allocation3 + $0x4a] sm:$0xff]  ;;  %1448 = vst.msk [vmem:[#allocation3 + $0x58] sm:$0xff] %vm53_vm4, %v1432_v24  ;;  %v7462_v19 = vpack.c.bf16 %v7454_v4, %v7435_v13 }
 0x27c   :  { %v1903_v36 = vld [vmem:[#allocation3 + $0x50] sm:$0xff]  ;;  %v7466_v27 = vpack.c.bf16 %v7456_v7, %v7437_v43 }
 0x27d   :  { %v1914_v45 = vpack.c.bf16 %v1903_v36, %v1466_v57  ;;  %5346 = vmatmul.msk.bf16.gmra.mxu3 %vm53_vm4, %v7462_v19  ;;  %v510_v57 = vadd.f32 %v7178_v1, %v380_v44 }
 0x27e   :  { %5378 = vmatmul.msk.bf16.gmra.mxu0 %vm53_vm4, %v7466_v27  ;;  %v1395_v0 = vpop.f32.mrf.mxu1 }
 0x27f   :  { %5410 = vmatmul.msk.bf16.gmra.mxu1 %vm53_vm4, %v1914_v45  ;;  %v1417_v34 = vadd.f32 %v1395_v0, %v1287_v42  ;;  %v640_v1 = vadd.f32 %v7183_v52, %v510_v57  ;;  %v1288_v45 = vadd.f32 %v1267_v35, %v1158_v41  ;;  %v1270_v42 = vpop.f32.mrf.mxu0  ;;  %v1159_v0 = vadd.f32 %v1140_v56, %v1029_v63  ;;  %v6321_v56 = vld [vmem:[%s9484_s5 + $0xb8] sm:$0xff] }
 0x280   :  { %2271 = vmatpush.bf16.msra.mxu3 %v6321_v56  ;;  %v6323_v56 = vld [vmem:[%s9484_s5 + $0xc8] sm:$0xff] }
 0x281   :  { %v1433_v37 = vmax.f32 %v1417_v34, 0.0  ;;  %v1012_v34 = vpop.f32.mrf.mxu2  ;;  %v1289_v33 = vadd.f32 %v1270_v42, %v1159_v0 }
 0x282   :  { %v1468_v46 = vld [vmem:[#allocation3 + $0x58] sm:$0xff] }
 0x283   :  { %v7476_v6 = vld [vmem:[#allocation3 + $0x51] sm:$0xff]  ;;  %1449 = vst.msk [vmem:[#allocation3 + $0x60] sm:$0xff] %vm53_vm4, %v1433_v37  ;;  %v7481_v61 = vpack.c.bf16 %v1468_v46, %v1903_v36  ;;  %v770_v36 = vadd.f32 %v7187_v12, %v640_v1  ;;  %v6329_v1 = vld [vmem:[%s9484_s5 + $0xf8] sm:$0xff] }
 0x284   :  { %v7478_v24 = vld [vmem:[#allocation3 + $0x52] sm:$0xff]  ;;  %2563 = vmatpush.bf16.msrb.mxu1 %v6329_v1 }
 0x285   :  { %5315 = vmatmul.msk.bf16.gmra.mxu2 %vm53_vm4, %v7481_v61  ;;  %v900_v52 = vadd.f32 %v7274_v26, %v770_v36  ;;  %v1142_v26 = vpop.f32.mrf.mxu3  ;;  %v6328_v36 = vld [vmem:[%s9484_s5 + $0xf0] sm:$0xff]  ;;  %v6327_v1 = vld [vmem:[%s9484_s5 + $0xe8] sm:$0xff] }
 0x286   :  { %v1397_v5 = vpop.f32.mrf.mxu1 }
 0x287   :  { %v1418_v38 = vadd.f32 %v1397_v5, %v1288_v45  ;;  %v1030_v57 = vadd.f32 %v1012_v34, %v900_v52  ;;  %v6320_v45 = vld [vmem:[%s9484_s5 + $0xb0] sm:$0xff]  ;;  %v1272_v0 = vpop.f32.mrf.mxu0 }
 0x288   :  { %v6324_v5 = vld [vmem:[%s9484_s5 + $0xd0] sm:$0xff]  ;;  %2272 = vmatpush.bf16.msra.mxu3 %v6320_v45  ;;  %2564 = vmatpush.bf16.msrb.mxu1 %v6328_v36 }
 0x289   :  { %v1434_v44 = vmax.f32 %v1418_v38, 0.0  ;;  %v1160_v38 = vadd.f32 %v1142_v26, %v1030_v57  ;;  %v6332_v57 = vld [vmem:[%s9484_s5 + $0x110] sm:$0xff] }
 0x28a   :  { %v7492_v37 = vld [vmem:[#allocation3 + $0x59] sm:$0xff] }
 0x28b   :  { %v7494_v53 = vld [vmem:[#allocation3 + $0x5a] sm:$0xff]  ;;  %1450 = vst.msk [vmem:[#allocation3 + $0x68] sm:$0xff] %vm53_vm4, %v1434_v44  ;;  %v7500_v29 = vpack.c.bf16 %v7492_v37, %v7476_v6  ;;  %v1290_v26 = vadd.f32 %v1272_v0, %v1160_v38 }
 0x28c   :  { %v1905_v55 = vld [vmem:[#allocation3 + $0x60] sm:$0xff]  ;;  %v7504_v35 = vpack.c.bf16 %v7494_v53, %v7478_v24  ;;  %2565 = vmatpush.bf16.msrb.mxu1 %v6327_v1 }
 0x28d   :  { %v1915_v12 = vpack.c.bf16 %v1905_v55, %v1468_v46  ;;  %5347 = vmatmul.msk.bf16.gmra.mxu3 %vm53_vm4, %v7500_v29  ;;  %v6325_v46 = vld [vmem:[%s9484_s5 + $0xd8] sm:$0xff] }
 0x28e   :  { %5379 = vmatmul.msk.bf16.gmra.mxu0 %vm53_vm4, %v7504_v35  ;;  %v1400_v41 = vpop.f32.mrf.mxu1 }
 0x28f   :  { %5411 = vmatmul.msk.bf16.gmra.mxu1 %vm53_vm4, %v1915_v12  ;;  %v1419_v63 = vadd.f32 %v1400_v41, %v1289_v33  ;;  %2417 = vmatpush.bf16.msra.mxu0 %v6325_v46  ;;  %v6333_v41 = vld [vmem:[%s9484_s5 + $0x118] sm:$0xff] }
 0x290   :  { %2709 = vmatpush.bf16.msrb.mxu2 %v6333_v41  ;;  %v6318_v41 = vld [vmem:[%s9484_s5 + $0xa0] sm:$0xff] }
 0x291   :  { %v1435_v42 = vmax.f32 %v1419_v63, 0.0 }
 0x292   :  { %v1470_v44 = vld [vmem:[#allocation3 + $0x68] sm:$0xff] }
 0x293   :  { %v7529_v34 = vld [vmem:[#allocation3 + $0x61] sm:$0xff]  ;;  %1451 = vst.msk [vmem:[#allocation3 + $0x70] sm:$0xff] %vm53_vm4, %v1435_v42  ;;  %v7534_v12 = vpack.c.bf16 %v1470_v44, %v1905_v55  ;;  %2418 = vmatpush.bf16.msra.mxu0 %v6324_v5  ;;  %v6319_v55 = vld [vmem:[%s9484_s5 + $0xa8] sm:$0xff] }
 0x294   :  { %v7531_v52 = vld [vmem:[#allocation3 + $0x62] sm:$0xff]  ;;  %2273 = vmatpush.bf16.msra.mxu3 %v6319_v55  ;;  %2710 = vmatpush.bf16.msrb.mxu2 %v6332_v57 }
 0x295   :  { %5316 = vmatmul.msk.bf16.gmra.mxu2 %vm53_vm4, %v7534_v12  ;;  %v6322_v55 = vld [vmem:[%s9484_s5 + $0xc0] sm:$0xff] }
 0x296   :  { %v1402_v46 = vpop.f32.mrf.mxu1 }
 0x297   :  { %v1420_v63 = vadd.f32 %v1402_v46, %v1290_v26  ;;  %2419 = vmatpush.bf16.msra.mxu0 %v6323_v56  ;;  %v6326_v56 = vld [vmem:[%s9484_s5 + $0xe0] sm:$0xff] }
 0x298   :  { %2274 = vmatpush.bf16.msra.mxu3 %v6318_v41  ;;  %2566 = vmatpush.bf16.msrb.mxu1 %v6326_v56 }
 0x299   :  { %v1436_v45 = vmax.f32 %v1420_v63, 0.0 }
 0x29a   :  { %v7554_v5 = vld [vmem:[#allocation3 + $0x69] sm:$0xff] }
 0x29b   :  { %v7556_v38 = vld [vmem:[#allocation3 + $0x6a] sm:$0xff]  ;;  %1452 = vst.msk [vmem:[#allocation3 + $0x78] sm:$0xff] %vm53_vm4, %v1436_v45  ;;  %v7561_v36 = vpack.c.bf16 %v7554_v5, %v7529_v34  ;;  %2420 = vmatpush.bf16.msra.mxu0 %v6322_v55  ;;  %v7597_v55 = vld [vmem:[#allocation3 + $0x80] sm:$0xff] }
 0x29c   :  { %v1907_v42 = vld [vmem:[#allocation3 + $0x70] sm:$0xff]  ;;  %v7565_v0 = vpack.c.bf16 %v7556_v38, %v7531_v52 }
 0x29d   :  { %v1916_v26 = vpack.c.bf16 %v1907_v42, %v1470_v44  ;;  %5348 = vmatmul.msk.bf16.gmra.mxu3 %vm53_vm4, %v7561_v36 }
 0x29e   :  { %5380 = vmatmul.msk.bf16.gmra.mxu0 %vm53_vm4, %v7565_v0 }
 0x29f   :  { %5412 = vmatmul.msk.bf16.gmra.mxu1 %vm53_vm4, %v1916_v26 }
 0x2a2   :  { %v1472_v44 = vld [vmem:[#allocation3 + $0x78] sm:$0xff] }
 0x2a3   :  { %v7581_v46 = vld [vmem:[#allocation3 + $0x71] sm:$0xff]  ;;  %v7583_v1 = vpack.c.bf16 %v1472_v44, %v1907_v42  ;;  %v7593_v26 = vld [vmem:[#allocation3 + $0x79] sm:$0xff]  ;;  %v1917_v45 = vpack.c.bf16 %v7597_v55, %v1472_v44 }
 0x2a4   :  { %v7585_v63 = vld [vmem:[#allocation3 + $0x72] sm:$0xff]  ;;  %v7595_v41 = vld [vmem:[#allocation3 + $0x7a] sm:$0xff]  ;;  %v7601_v42 = vpack.c.bf16 %v7593_v26, %v7581_v46 }
 0x2a5   :  { %5317 = vmatmul.msk.bf16.gmra.mxu2 %vm53_vm4, %v7583_v1  ;;  %v7605_v56 = vpack.c.bf16 %v7595_v41, %v7585_v63 }
 0x2a7   :  { %9510 = vst [vmem:[#allocation5_spill] sm:$0xff] %v7605_v56 }
 0x2ad   :  { %5349 = vmatmul.msk.bf16.gmra.mxu3 %vm53_vm4, %v7601_v42 }
 0x2ae   :  { %5381 = vmatmul.msk.bf16.gmra.mxu0 %vm53_vm4, %v7605_v56 }
 0x2af   :  { %5413 = vmatmul.msk.bf16.gmra.mxu1 %vm53_vm4, %v1917_v45 }
 0x2b5   :  { %5438 = vmatmul.msk.bf16.vlgmr.msra.gmra.mxu2 %vm53_vm4, %v2056_v10 }
 0x2b8   :  { %v1546_v33 = vpop.f32.mrf.mxu2 }
 0x2b9   :  { %v1586_v47 = vadd.f32 %v7623_v31, %v1546_v33 }
 0x2bb   :  { %v1838_v44 = vpop.f32.mrf.mxu0 }
 0x2bc   :  { %v1984_v11 = vpop.f32.mrf.mxu1 }
 0x2bd   :  { %5470 = vmatmul.msk.bf16.vlgmr.msra.gmra.mxu3 %vm53_vm4, %v2202_v14 }
 0x2be   :  { %5502 = vmatmul.msk.bf16.vlgmr.msra.gmra.mxu0 %vm53_vm4, %v7325_v15 }
 0x2bf   :  { %5534 = vmatmul.msk.bf16.vlgmr.msrb.gmra.mxu1 %vm53_vm4, %v7341_v3 }
 0x2c0   :  { %v1548_v54 = vpop.f32.mrf.mxu2  ;;  %v1692_v10 = vpop.f32.mrf.mxu3 }
 0x2c1   :  { %v1732_v57 = vadd.f32 %v1692_v10, %v1586_v47  ;;  %v1587_v22 = vadd.f32 %v7623_v31, %v1548_v54  ;;  %v9511_v47 = vpack.c.bf16 %v7358_v21, %v7336_v2  ;;  %v9512_v2 = vpack.c.bf16 %v7397_v48, %v7375_v51  ;;  %v6331_v21 = vld [vmem:[%s9484_s5 + $0x108] sm:$0xff] }
 0x2c2   :  { %2711 = vmatpush.bf16.msrb.mxu2 %v6331_v21  ;;  %v9513_v51 = vpack.c.bf16 %v7399_v16, %v7377_v30  ;;  %v9514_v30 = vpack.c.bf16 %v7435_v13, %v7413_v32 }
 0x2c3   :  { %v1840_v45 = vpop.f32.mrf.mxu0  ;;  %v1878_v60 = vadd.f32 %v1838_v44, %v1732_v57 }
 0x2c4   :  { %v1986_v18 = vpop.f32.mrf.mxu1 }
 0x2c5   :  { %5439 = vmatmul.msk.bf16.gmra.mxu2 %vm53_vm4, %v2057_v49  ;;  %v7638_v25 = vadd.f32 %v1984_v11, %v1878_v60 }
 0x2c8   :  { %v1551_v15 = vpop.f32.mrf.mxu2  ;;  %v1694_v14 = vpop.f32.mrf.mxu3 }
 0x2c9   :  { %v1733_v3 = vadd.f32 %v1694_v14, %v1587_v22  ;;  %v1588_v20 = vadd.f32 %v7623_v31, %v1551_v15 }
 0x2cb   :  { %v1843_v28 = vpop.f32.mrf.mxu0  ;;  %v1879_v33 = vadd.f32 %v1840_v45, %v1733_v3 }
 0x2cc   :  { %v1989_v56 = vpop.f32.mrf.mxu1 }
 0x2cd   :  { %5471 = vmatmul.msk.bf16.gmra.mxu3 %vm53_vm4, %v9511_v47  ;;  %v7647_v9 = vadd.f32 %v1986_v18, %v1879_v33 }
 0x2ce   :  { %5503 = vmatmul.msk.bf16.gmra.mxu0 %vm53_vm4, %v7361_v23 }
 0x2cf   :  { %5535 = vmatmul.msk.bf16.gmra.mxu1 %vm53_vm4, %v7383_v8 }
 0x2d0   :  { %v1553_v49 = vpop.f32.mrf.mxu2  ;;  %v1697_v60 = vpop.f32.mrf.mxu3 }
 0x2d1   :  { %v1734_v11 = vadd.f32 %v1697_v60, %v1588_v20  ;;  %v1589_v8 = vadd.f32 %v7623_v31, %v1553_v49 }
 0x2d3   :  { %v1845_v44 = vpop.f32.mrf.mxu0  ;;  %v1880_v54 = vadd.f32 %v1843_v28, %v1734_v11 }
 0x2d4   :  { %v1991_v10 = vpop.f32.mrf.mxu1 }
 0x2d5   :  { %5440 = vmatmul.msk.bf16.gmra.mxu2 %vm53_vm4, %v9512_v2  ;;  %v7659_v23 = vadd.f32 %v1989_v56, %v1880_v54  ;;  %v9515_v2 = vpack.c.bf16 %v7437_v43, %v7415_v39  ;;  %v9516_v39 = vpack.c.bf16 %v7476_v6, %v7454_v4  ;;  %v6330_v43 = vld [vmem:[%s9484_s5 + $0x100] sm:$0xff]  ;;  %v9517_v4 = vpack.c.bf16 %v7478_v24, %v7456_v7 }
 0x2d6   :  { %2712 = vmatpush.bf16.msrb.mxu2 %v6330_v43  ;;  %v9518_v24 = vpack.c.bf16 %v7529_v34, %v7492_v37 }
 0x2d8   :  { %v1556_v18 = vpop.f32.mrf.mxu2  ;;  %v1699_v57 = vpop.f32.mrf.mxu3 }
 0x2d9   :  { %v1735_v45 = vadd.f32 %v1699_v57, %v1589_v8  ;;  %v1590_v56 = vadd.f32 %v7623_v31, %v1556_v18 }
 0x2db   :  { %v1848_v22 = vpop.f32.mrf.mxu0  ;;  %v1881_v28 = vadd.f32 %v1845_v44, %v1735_v45 }
 0x2dc   :  { %v1994_v15 = vpop.f32.mrf.mxu1 }
 0x2dd   :  { %5472 = vmatmul.msk.bf16.gmra.mxu3 %vm53_vm4, %v9513_v51  ;;  %v7668_v48 = vadd.f32 %v1991_v10, %v1881_v28 }
 0x2de   :  { %5504 = vmatmul.msk.bf16.gmra.mxu0 %vm53_vm4, %v7402_v59 }
 0x2df   :  { %5536 = vmatmul.msk.bf16.gmra.mxu1 %vm53_vm4, %v7421_v58 }
 0x2e0   :  { %v1558_v14 = vpop.f32.mrf.mxu2  ;;  %v1702_v3 = vpop.f32.mrf.mxu3 }
 0x2e1   :  { %v1736_v33 = vadd.f32 %v1702_v3, %v1590_v56  ;;  %v1591_v59 = vadd.f32 %v7623_v31, %v1558_v14 }
 0x2e3   :  { %v1850_v47 = vpop.f32.mrf.mxu0  ;;  %v1882_v20 = vadd.f32 %v1848_v22, %v1736_v33 }
 0x2e4   :  { %v1996_v49 = vpop.f32.mrf.mxu1 }
 0x2e5   :  { %5441 = vmatmul.msk.bf16.gmra.mxu2 %vm53_vm4, %v9514_v30  ;;  %v7677_v16 = vadd.f32 %v1994_v15, %v1882_v20 }
 0x2e8   :  { %v1561_v60 = vpop.f32.mrf.mxu2  ;;  %v1704_v11 = vpop.f32.mrf.mxu3 }
 0x2e9   :  { %v1737_v58 = vadd.f32 %v1704_v11, %v1591_v59  ;;  %v1592_v13 = vadd.f32 %v7623_v31, %v1561_v60 }
 0x2eb   :  { %v1853_v44 = vpop.f32.mrf.mxu0  ;;  %v1883_v54 = vadd.f32 %v1850_v47, %v1737_v58 }
 0x2ec   :  { %v1999_v10 = vpop.f32.mrf.mxu1 }
 0x2ed   :  { %5473 = vmatmul.msk.bf16.gmra.mxu3 %vm53_vm4, %v9515_v2  ;;  %v7686_v32 = vadd.f32 %v1996_v49, %v1883_v54 }
 0x2ee   :  { %5505 = vmatmul.msk.bf16.gmra.mxu0 %vm53_vm4, %v7440_v17 }
 0x2ef   :  { %5537 = vmatmul.msk.bf16.gmra.mxu1 %vm53_vm4, %v7462_v19 }
 0x2f0   :  { %v1563_v21 = vpop.f32.mrf.mxu2  ;;  %v1707_v8 = vpop.f32.mrf.mxu3 }
 0x2f1   :  { %v1738_v18 = vadd.f32 %v1707_v8, %v1592_v13  ;;  %v1593_v19 = vadd.f32 %v7623_v31, %v1563_v21 }
 0x2f3   :  { %v1855_v57 = vpop.f32.mrf.mxu0  ;;  %v1884_v45 = vadd.f32 %v1853_v44, %v1738_v18  ;;  %v9519_v44 = vpack.c.bf16 %v7531_v52, %v7494_v53  ;;  %v9520_v53 = vpack.c.bf16 %v7581_v46, %v7554_v5  ;;  %v9521_v18 = vpack.c.bf16 %v7585_v63, %v7556_v38  ;;  %v2347_v63 = vld [vmem:[#allocation3 + $0x88] sm:$0xff] }
 0x2f4   :  { %v2001_v22 = vpop.f32.mrf.mxu1 }
 0x2f5   :  { %5442 = vmatmul.msk.bf16.gmra.mxu2 %vm53_vm4, %v9516_v39  ;;  %v7698_v17 = vadd.f32 %v1999_v10, %v1884_v45 }
 0x2f8   :  { %v1566_v28 = vpop.f32.mrf.mxu2  ;;  %v1709_v15 = vpop.f32.mrf.mxu3 }
 0x2f9   :  { %v1739_v51 = vadd.f32 %v1709_v15, %v1593_v19  ;;  %v1594_v33 = vadd.f32 %v7623_v31, %v1566_v28  ;;  %v2493_v28 = vld [vmem:[#allocation3 + $0x89] sm:$0xff] }
 0x2fb   :  { %v1858_v56 = vpop.f32.mrf.mxu0  ;;  %v1885_v14 = vadd.f32 %v1855_v57, %v1739_v51  ;;  %v7768_v51 = vld [vmem:[#allocation3 + $0x82] sm:$0xff] }
 0x2fc   :  { %v2004_v3 = vpop.f32.mrf.mxu1 }
 0x2fd   :  { %5474 = vmatmul.msk.bf16.gmra.mxu3 %vm53_vm4, %v9517_v4  ;;  %v7707_v6 = vadd.f32 %v2001_v22, %v1885_v14  ;;  %v2055_v22 = vld [vmem:[#allocation3 + $0x81] sm:$0xff]  ;;  %v5632_v4 = vld [vmem:[%s9486_s7 + $0x70] sm:$0xf] }
 0x2fe   :  { %5506 = vmatmul.msk.bf16.gmra.mxu0 %vm53_vm4, %v7481_v61  ;;  %v2063_v19 = vpack.c.bf16 %v2055_v22, %v7593_v26  ;;  %v2209_v26 = vpack.c.bf16 %v7768_v51, %v7595_v41 }
 0x2ff   :  { %5538 = vmatmul.msk.bf16.gmra.mxu1 %vm53_vm4, %v7500_v29 }
 0x300   :  { %v7712_v47 = vpop.f32.mrf.mxu2  ;;  %v1712_v20 = vpop.f32.mrf.mxu3 }
 0x301   :  { %v1740_v49 = vadd.f32 %v1712_v20, %v1594_v33  ;;  %v6349_v33 = vld [vmem:[%s9486_s7 + $0x74] sm:$0xf0] }
 0x302   :  { %v5633_v20 = vor.u32 %v6349_v33, %v5632_v4  ;;  %v5610_v33 = vld [vmem:[%s9486_s7 + $0x48] sm:$0xf0] }
 0x303   :  { %v7714_v30 = vpop.f32.mrf.mxu0  ;;  %v1886_v59 = vadd.f32 %v1858_v56, %v1740_v49  ;;  %v2355_v56 = vpack.c.bf16 %v2347_v63, %v7597_v55  ;;  %v5618_v63 = vld [vmem:[%s9486_s7 + $0x58] sm:$0xf0] }
 0x304   :  { %v7716_v7 = vpop.f32.mrf.mxu1  ;;  %2928 = vmatpush.bf16.msrb.mxu3 %v5633_v20 }
 0x305   :  { %5443 = vmatmul.msk.bf16.gmra.mxu2 %vm53_vm4, %v9518_v24  ;;  %v7722_v61 = vadd.f32 %v2004_v3, %v1886_v59  ;;  %v2501_v3 = vpack.c.bf16 %v2493_v28, %v2055_v22 }
 0x308   :  { %v1571_v60 = vpop.f32.mrf.mxu2  ;;  %v7724_v29 = vpop.f32.mrf.mxu3 }
 0x309   :  { %v1596_v37 = vadd.f32 %v7623_v31, %v1571_v60 }
 0x30b   :  { %v1863_v11 = vpop.f32.mrf.mxu0 }
 0x30c   :  { %v2009_v58 = vpop.f32.mrf.mxu1 }
 0x30d   :  { %5475 = vmatmul.msk.bf16.gmra.mxu3 %vm53_vm4, %v9519_v44  ;;  %v5634_v44 = vld [vmem:[%s9486_s7 + $0x78] sm:$0xf0] }
 0x30e   :  { %5507 = vmatmul.msk.bf16.gmra.mxu0 %vm53_vm4, %v7534_v12 }
 0x30f   :  { %5539 = vmatmul.msk.bf16.gmra.mxu1 %vm53_vm4, %v7561_v36 }
 0x310   :  { %v7735_v34 = vpop.f32.mrf.mxu2  ;;  %v1717_v54 = vpop.f32.mrf.mxu3 }
 0x311   :  { %v1742_v10 = vadd.f32 %v1717_v54, %v1596_v37 }
 0x313   :  { %v1888_v2 = vadd.f32 %v1863_v11, %v1742_v10  ;;  %v7737_v13 = vpop.f32.mrf.mxu0 }
 0x314   :  { %v7739_v21 = vpop.f32.mrf.mxu1 }
 0x315   :  { %5444 = vmatmul.msk.bf16.gmra.mxu2 %vm53_vm4, %v9520_v53  ;;  %v7745_v52 = vadd.f32 %v2009_v58, %v1888_v2  ;;  %v6348_v58 = vld [vmem:[%s9486_s7 + $0x74] sm:$0xf]  ;;  %v6347_v53 = vld [vmem:[%s9486_s7 + $0x64] sm:$0xf0] }
 0x316   :  { %v5637_v54 = vor.u32 %v6348_v58, %v5634_v44 }
 0x318   :  { %v1576_v12 = vpop.f32.mrf.mxu2  ;;  %v7747_v36 = vpop.f32.mrf.mxu3  ;;  %2977 = vmatpush.bf16.msrb.mxu0 %v5637_v54 }
 0x319   :  { %v1598_v5 = vadd.f32 %v7623_v31, %v1576_v12 }
 0x31b   :  { %v1868_v8 = vpop.f32.mrf.mxu0 }
 0x31c   :  { %v2014_v46 = vpop.f32.mrf.mxu1 }
 0x31d   :  { %5476 = vmatmul.msk.bf16.gmra.mxu3 %vm53_vm4, %v9521_v18 }
 0x31e   :  { %5508 = vmatmul.msk.bf16.gmra.mxu0 %vm53_vm4, %v7583_v1 }
 0x31f   :  { %5540 = vmatmul.msk.bf16.gmra.mxu1 %vm53_vm4, %v7601_v42 }
 0x320   :  { %v7758_v57 = vpop.f32.mrf.mxu2  ;;  %v1722_v45 = vpop.f32.mrf.mxu3 }
 0x321   :  { %v1744_v39 = vadd.f32 %v1722_v45, %v1598_v5  ;;  %v5626_v5 = vld [vmem:[%s9486_s7 + $0x68] sm:$0xf0] }
 0x323   :  { %v1890_v43 = vadd.f32 %v1868_v8, %v1744_v39  ;;  %v7764_v1 = vpop.f32.mrf.mxu0 }
 0x324   :  { %v7771_v14 = vpop.f32.mrf.mxu1 }
 0x325   :  { %5445 = vmatmul.msk.bf16.gmra.mxu2 %vm53_vm4, %v2063_v19  ;;  %v7762_v38 = vadd.f32 %v2014_v46, %v1890_v43 }
 0x328   :  { %v1581_v42 = vpop.f32.mrf.mxu2  ;;  %v7766_v15 = vpop.f32.mrf.mxu3 }
 0x329   :  { %v1600_v55 = vadd.f32 %v7623_v31, %v1581_v42 }
 0x32b   :  { %v1873_v24 = vpop.f32.mrf.mxu0 }
 0x32c   :  { %v2019_v11 = vpop.f32.mrf.mxu1 }
 0x32d   :  { %5477 = vmatmul.msk.bf16.gmra.mxu3 %vm53_vm4, %v2209_v26 }
 0x32e   :  { %5509 = vmatmul.msk.bf16.gmra.mxu0 %vm53_vm4, %v2355_v56 }
 0x32f   :  { %5541 = vmatmul.msk.bf16.gmra.mxu1 %vm53_vm4, %v2501_v3 }
 0x330   :  { %v7785_v49 = vpop.f32.mrf.mxu2  ;;  %v1727_v41 = vpop.f32.mrf.mxu3 }
 0x331   :  { %v1746_v59 = vadd.f32 %v1727_v41, %v1600_v55 }
 0x333   :  { %v1892_v60 = vadd.f32 %v1873_v24, %v1746_v59 }
 0x335   :  { %5566 = vmatmul.msk.bf16.vlgmr.msrb.gmra.mxu2 %vm53_vm4, %v7345_v40  ;;  %v7795_v37 = vadd.f32 %v2019_v11, %v1892_v60  ;;  %v5624_v40 = vld [vmem:[%s9486_s7 + $0x60] sm:$0xf]  ;;  %v5602_v11 = vld [vmem:[%s9486_s7 + $0x38] sm:$0xf0] }
 0x336   :  { %v5625_v12 = vor.u32 %v6347_v53, %v5624_v40 }
 0x338   :  { %v2130_v10 = vpop.f32.mrf.mxu2  ;;  %2929 = vmatpush.bf16.msrb.mxu3 %v5625_v12  ;;  %v7888_v53 = vpop.f32.mrf.mxu3  ;;  %v5594_v12 = vld [vmem:[%s9486_s7 + $0x28] sm:$0xf0] }
 0x339   :  { %v7798_v2 = vadd.f32 %v2130_v10, %v7638_v25  ;;  %v6346_v25 = vld [vmem:[%s9486_s7 + $0x64] sm:$0xf] }
 0x33a   :  { %v5629_v46 = vor.u32 %v6346_v25, %v5626_v5 }
 0x33c   :  { %2978 = vmatpush.bf16.msrb.mxu0 %v5629_v46  ;;  %v7901_v46 = vpop.f32.mrf.mxu0 }
 0x340   :  { %v2132_v8 = vpop.f32.mrf.mxu2 }
 0x341   :  { %v7807_v18 = vadd.f32 %v2132_v8, %v7647_v9  ;;  %v5616_v9 = vld [vmem:[%s9486_s7 + $0x50] sm:$0xf] }
 0x345   :  { %5567 = vmatmul.msk.bf16.gmra.mxu2 %vm53_vm4, %v7387_v50  ;;  %v6345_v50 = vld [vmem:[%s9486_s7 + $0x54] sm:$0xf0] }
 0x346   :  { %v5617_v39 = vor.u32 %v6345_v50, %v5616_v9  ;;  %v7909_v50 = vpop.f32.mrf.mxu1 }
 0x348   :  { %v2135_v45 = vpop.f32.mrf.mxu2  ;;  %2930 = vmatpush.bf16.msrb.mxu3 %v5617_v39  ;;  %v7911_v39 = vpop.f32.mrf.mxu3 }
 0x349   :  { %v7818_v22 = vadd.f32 %v2135_v45, %v7659_v23  ;;  %v6344_v23 = vld [vmem:[%s9486_s7 + $0x54] sm:$0xf]  ;;  %v6337_v45 = vld [vmem:[%s9486_s7 + $0x14] sm:$0xf0] }
 0x34a   :  { %v5621_v28 = vor.u32 %v6344_v23, %v5618_v63  ;;  %v9522_v23 = vld [vmem:[#allocation5_spill] sm:$0xff]  ;;  %v6336_v63 = vld [vmem:[%s9486_s7 + $0x14] sm:$0xf] }
 0x34c   :  { %2979 = vmatpush.bf16.msrb.mxu0 %v5621_v28  ;;  %v5586_v28 = vld [vmem:[%s9486_s7 + $0x18] sm:$0xf0] }
 0x350   :  { %v2137_v43 = vpop.f32.mrf.mxu2 }
 0x351   :  { %v7827_v19 = vadd.f32 %v2137_v43, %v7668_v48  ;;  %v5608_v48 = vld [vmem:[%s9486_s7 + $0x40] sm:$0xf] }
 0x355   :  { %5568 = vmatmul.msk.bf16.gmra.mxu2 %vm53_vm4, %v7425_v62  ;;  %v6343_v62 = vld [vmem:[%s9486_s7 + $0x44] sm:$0xf0] }
 0x356   :  { %v5609_v3 = vor.u32 %v6343_v62, %v5608_v48  ;;  %v7925_v48 = vpop.f32.mrf.mxu1  ;;  %v5712_v62 = vld [vmem:[%s9486_s7 + $0xf0] sm:$0xf] }
 0x358   :  { %v2140_v42 = vpop.f32.mrf.mxu2  ;;  %2931 = vmatpush.bf16.msrb.mxu3 %v5609_v3  ;;  %v6365_v3 = vld [vmem:[%s9486_s7 + $0xf4] sm:$0xf0] }
 0x359   :  { %v7838_v56 = vadd.f32 %v2140_v42, %v7677_v16  ;;  %v6342_v16 = vld [vmem:[%s9486_s7 + $0x44] sm:$0xf]  ;;  %v5589_v42 = vor.u32 %v6336_v63, %v5586_v28 }
 0x35a   :  { %v5613_v20 = vor.u32 %v6342_v16, %v5610_v33  ;;  %v7936_v16 = vpop.f32.mrf.mxu3 }
 0x35c   :  { %2980 = vmatpush.bf16.msrb.mxu0 %v5613_v20  ;;  %v5713_v20 = vor.u32 %v6365_v3, %v5712_v62  ;;  %v5688_v62 = vld [vmem:[%s9486_s7 + $0xc0] sm:$0xf]  ;;  %v6359_v3 = vld [vmem:[%s9486_s7 + $0xc4] sm:$0xf0] }
 0x35e   :  { %3179 = vmatpush.bf16.msra.mxu1 %v5713_v20  ;;  %v6334_v20 = vld [vmem:[%s9486_s7 + $0x4] sm:$0xf] }
 0x360   :  { %v2142_v26 = vpop.f32.mrf.mxu2 }
 0x361   :  { %v7847_v4 = vadd.f32 %v2142_v26, %v7686_v32  ;;  %v5600_v32 = vld [vmem:[%s9486_s7 + $0x30] sm:$0xf]  ;;  %v6364_v26 = vld [vmem:[%s9486_s7 + $0xf4] sm:$0xf] }
 0x365   :  { %5569 = vmatmul.msk.bf16.gmra.mxu2 %vm53_vm4, %v7466_v27  ;;  %v6341_v27 = vld [vmem:[%s9486_s7 + $0x34] sm:$0xf0] }
 0x366   :  { %v5601_v59 = vor.u32 %v6341_v27, %v5600_v32 }
 0x368   :  { %v2145_v55 = vpop.f32.mrf.mxu2  ;;  %2932 = vmatpush.bf16.msrb.mxu3 %v5601_v59  ;;  %v5704_v59 = vld [vmem:[%s9486_s7 + $0xe0] sm:$0xf] }
 0x369   :  { %v7858_v41 = vadd.f32 %v2145_v55, %v7698_v17  ;;  %v6340_v17 = vld [vmem:[%s9486_s7 + $0x34] sm:$0xf]  ;;  %v5714_v55 = vld [vmem:[%s9486_s7 + $0xf8] sm:$0xf0] }
 0x36a   :  { %v5605_v58 = vor.u32 %v6340_v17, %v5602_v11  ;;  %v5717_v27 = vor.u32 %v6364_v26, %v5714_v55  ;;  %v6362_v17 = vld [vmem:[%s9486_s7 + $0xe4] sm:$0xf]  ;;  %v5578_v55 = vld [vmem:[%s9486_s7 + $0x8] sm:$0xf0] }
 0x36b   :  { %v6358_v26 = vld [vmem:[%s9486_s7 + $0xc4] sm:$0xf] }
 0x36c   :  { %2981 = vmatpush.bf16.msrb.mxu0 %v5605_v58  ;;  %3228 = vmatpush.bf16.msra.mxu2 %v5717_v27 }
 0x370   :  { %v2147_v24 = vpop.f32.mrf.mxu2 }
 0x371   :  { %v7867_v60 = vadd.f32 %v2147_v24, %v7707_v6  ;;  %v5592_v6 = vld [vmem:[%s9486_s7 + $0x20] sm:$0xf]  ;;  %v6363_v24 = vld [vmem:[%s9486_s7 + $0xe4] sm:$0xf0] }
 0x372   :  { %v5705_v11 = vor.u32 %v6363_v24, %v5704_v59  ;;  %v5581_v59 = vor.u32 %v6334_v20, %v5578_v55  ;;  %v5680_v24 = vld [vmem:[%s9486_s7 + $0xb0] sm:$0xf]  ;;  %v6353_v20 = vld [vmem:[%s9486_s7 + $0x94] sm:$0xf0]  ;;  %v6352_v55 = vld [vmem:[%s9486_s7 + $0x94] sm:$0xf] }
 0x374   :  { %3180 = vmatpush.bf16.msra.mxu1 %v5705_v11  ;;  %v6356_v11 = vld [vmem:[%s9486_s7 + $0xb4] sm:$0xf] }
 0x375   :  { %5570 = vmatmul.msk.bf16.gmra.mxu2 %vm53_vm4, %v7504_v35  ;;  %v6339_v35 = vld [vmem:[%s9486_s7 + $0x24] sm:$0xf0] }
 0x376   :  { %v5593_v10 = vor.u32 %v6339_v35, %v5592_v6  ;;  %v6335_v6 = vld [vmem:[%s9486_s7 + $0x4] sm:$0xf0] }
 0x378   :  { %v2150_v44 = vpop.f32.mrf.mxu2  ;;  %2933 = vmatpush.bf16.msrb.mxu3 %v5593_v10  ;;  %v2639_v10 = vld [vmem:[#allocation3 + $0x8a] sm:$0xff] }
 0x379   :  { %v7878_v54 = vadd.f32 %v2150_v44, %v7722_v61  ;;  %v6338_v61 = vld [vmem:[%s9486_s7 + $0x24] sm:$0xf]  ;;  %v5576_v44 = vld [vmem:[%s9486_s7] sm:$0xf]  ;;  %v2647_v63 = vpack.c.bf16 %v2639_v10, %v7768_v51  ;;  %v5690_v51 = vld [vmem:[%s9486_s7 + $0xc8] sm:$0xf0] }
 0x37a   :  { %v5597_v8 = vor.u32 %v6338_v61, %v5594_v12  ;;  %v5577_v61 = vor.u32 %v6335_v6, %v5576_v44  ;;  %v5696_v12 = vld [vmem:[%s9486_s7 + $0xd0] sm:$0xf]  ;;  %v5693_v27 = vor.u32 %v6358_v26, %v5690_v51  ;;  %v5682_v6 = vld [vmem:[%s9486_s7 + $0xb8] sm:$0xf0] }
 0x37b   :  { %v5664_v51 = vld [vmem:[%s9486_s7 + $0x90] sm:$0xf] }
 0x37c   :  { %2982 = vmatpush.bf16.msrb.mxu0 %v5597_v8  ;;  %v6361_v8 = vld [vmem:[%s9486_s7 + $0xd4] sm:$0xf0] }
 0x380   :  { %v7886_v40 = vpop.f32.mrf.mxu2  ;;  %2983 = vmatpush.bf16.msrb.mxu0 %v5589_v42  ;;  %v7981_v42 = vpop.f32.mrf.mxu3 }
 0x384   :  { %2984 = vmatpush.bf16.msrb.mxu0 %v5581_v59  ;;  %v5665_v59 = vor.u32 %v6353_v20, %v5664_v51 }
 0x385   :  { %5571 = vmatmul.msk.bf16.gmra.mxu2 %vm53_vm4, %v7565_v0  ;;  %v5584_v0 = vld [vmem:[%s9486_s7 + $0x10] sm:$0xf] }
 0x386   :  { %v5585_v9 = vor.u32 %v6337_v45, %v5584_v0  ;;  %v5697_v45 = vor.u32 %v6361_v8, %v5696_v12  ;;  %v5672_v8 = vld [vmem:[%s9486_s7 + $0xa0] sm:$0xf] }
 0x388   :  { %v2155_v25 = vpop.f32.mrf.mxu2  ;;  %2934 = vmatpush.bf16.msrb.mxu3 %v5585_v9  ;;  %v5698_v9 = vld [vmem:[%s9486_s7 + $0xd8] sm:$0xf0]  ;;  %3181 = vmatpush.bf16.msra.mxu1 %v5697_v45  ;;  %v6354_v45 = vld [vmem:[%s9486_s7 + $0xa4] sm:$0xf] }
 0x389   :  { %v7899_v5 = vadd.f32 %v2155_v25, %v7745_v52  ;;  %v7915_v52 = vpop.f32.mrf.mxu0  ;;  %v6360_v25 = vld [vmem:[%s9486_s7 + $0xd4] sm:$0xf] }
 0x38a   :  { %v5701_v28 = vor.u32 %v6360_v25, %v5698_v9  ;;  %v6355_v25 = vld [vmem:[%s9486_s7 + $0xa4] sm:$0xf0]  ;;  %v2283_v9 = vpop.f32.mrf.mxu3 }
 0x38c   :  { %2935 = vmatpush.bf16.msrb.mxu3 %v5577_v61  ;;  %v5685_v61 = vor.u32 %v6356_v11, %v5682_v6  ;;  %v5656_v11 = vld [vmem:[%s9486_s7 + $0x80] sm:$0xf] }
 0x390   :  { %v7913_v43 = vpop.f32.mrf.mxu2 }
 0x391   :  { %v7962_v35 = vpop.f32.mrf.mxu0 }
 0x395   :  { %5572 = vmatmul.msk.bf16.gmra.mxu2 %vm53_vm4, %v9522_v23  ;;  %v7978_v23 = vpop.f32.mrf.mxu1 }
 0x398   :  { %v2160_v33 = vpop.f32.mrf.mxu2 }
 0x399   :  { %v7942_v32 = vadd.f32 %v2160_v33, %v7762_v38  ;;  %v5706_v38 = vld [vmem:[%s9486_s7 + $0xe8] sm:$0xf0]  ;;  %v5689_v33 = vor.u32 %v6359_v3, %v5688_v62  ;;  %v5792_v62 = vld [vmem:[%s9486_s7 + $0x170] sm:$0xf]  ;;  %v6381_v3 = vld [vmem:[%s9486_s7 + $0x174] sm:$0xf0] }
 0x39a   :  { %v5709_v58 = vor.u32 %v6362_v17, %v5706_v38  ;;  %v6357_v17 = vld [vmem:[%s9486_s7 + $0xb4] sm:$0xf0]  ;;  %v8011_v38 = vpop.f32.mrf.mxu0  ;;  %v5793_v26 = vor.u32 %v6381_v3, %v5792_v62 }
 0x39b   :  { %3182 = vmatpush.bf16.msra.mxu1 %v5689_v33  ;;  %v5681_v44 = vor.u32 %v6357_v17, %v5680_v24  ;;  %v2316_v33 = vadd.f32 %v7911_v39, %v7798_v2  ;;  %v5666_v2 = vld [vmem:[%s9486_s7 + $0x98] sm:$0xf0] }
 0x39c   :  { %3229 = vmatpush.bf16.msra.mxu2 %v5709_v58  ;;  %3430 = vmatpush.bf16.msra.mxu3 %v5793_v26  ;;  %v5669_v39 = vor.u32 %v6352_v55, %v5666_v2  ;;  %v5784_v55 = vld [vmem:[%s9486_s7 + $0x160] sm:$0xf] }
 0x39d   :  { %v8019_v12 = vpop.f32.mrf.mxu1  ;;  %v2462_v17 = vadd.f32 %v7915_v52, %v2316_v33 }
 0x39f   :  { %3183 = vmatpush.bf16.msra.mxu1 %v5681_v44  ;;  %v6350_v44 = vld [vmem:[%s9486_s7 + $0x84] sm:$0xf]  ;;  %v2608_v62 = vadd.f32 %v7925_v48, %v2462_v17  ;;  %v2318_v48 = vadd.f32 %v7981_v42, %v7818_v22  ;;  %v5786_v22 = vld [vmem:[%s9486_s7 + $0x168] sm:$0xf0] }
 0x3a0   :  { %v7973_v0 = vpop.f32.mrf.mxu2  ;;  %3230 = vmatpush.bf16.msra.mxu2 %v5701_v28 }
 0x3a2   :  { %v2429_v24 = vpop.f32.mrf.mxu0 }
 0x3a4   :  { %3231 = vmatpush.bf16.msra.mxu2 %v5693_v27 }
 0x3a5   :  { %5573 = vmatmul.msk.bf16.gmra.mxu2 %vm53_vm4, %v2647_v63  ;;  %v5674_v63 = vld [vmem:[%s9486_s7 + $0xa8] sm:$0xf0] }
 0x3a6   :  { %v5677_v28 = vor.u32 %v6354_v45, %v5674_v63  ;;  %v5794_v45 = vld [vmem:[%s9486_s7 + $0x178] sm:$0xf0] }
 0x3a8   :  { %v2165_v58 = vpop.f32.mrf.mxu2  ;;  %3232 = vmatpush.bf16.msra.mxu2 %v5685_v61  ;;  %v5658_v61 = vld [vmem:[%s9486_s7 + $0x88] sm:$0xf0] }
 0x3a9   :  { %v8017_v10 = vadd.f32 %v2165_v58, %v7795_v37  ;;  %v5673_v37 = vor.u32 %v6355_v25, %v5672_v8  ;;  %v6351_v58 = vld [vmem:[%s9486_s7 + $0x84] sm:$0xf0]  ;;  %v2575_v8 = vpop.f32.mrf.mxu1  ;;  %v5661_v52 = vor.u32 %v6350_v44, %v5658_v61  ;;  %v6380_v25 = vld [vmem:[%s9486_s7 + $0x174] sm:$0xf] }
 0x3aa   :  { %v5657_v6 = vor.u32 %v6351_v58, %v5656_v11  ;;  %v5797_v63 = vor.u32 %v6380_v25, %v5794_v45  ;;  %v2432_v20 = vpop.f32.mrf.mxu0  ;;  %v2464_v11 = vadd.f32 %v8011_v38, %v2318_v48 }
 0x3ab   :  { %3184 = vmatpush.bf16.msra.mxu1 %v5673_v37  ;;  %v2286_v37 = vpop.f32.mrf.mxu3 }
 0x3ac   :  { %3233 = vmatpush.bf16.msra.mxu2 %v5677_v28  ;;  %v2317_v28 = vadd.f32 %v7936_v16, %v7807_v18  ;;  %3479 = vmatpush.bf16.msra.mxu0 %v5797_v63 }
 0x3ae   :  { %v2463_v33 = vadd.f32 %v7962_v35, %v2317_v28 }
 0x3af   :  { %3185 = vmatpush.bf16.msra.mxu1 %v5665_v59  ;;  %v6379_v59 = vld [vmem:[%s9486_s7 + $0x164] sm:$0xf0] }
 0x3b0   :  { %v8050_v27 = vpop.f32.mrf.mxu2  ;;  %3234 = vmatpush.bf16.msra.mxu2 %v5669_v39  ;;  %v5785_v18 = vor.u32 %v6379_v59, %v5784_v55  ;;  %v2609_v2 = vadd.f32 %v7978_v23, %v2463_v33  ;;  %v2319_v23 = vadd.f32 %v2283_v9, %v7827_v19  ;;  %v6377_v19 = vld [vmem:[%s9486_s7 + $0x154] sm:$0xf0] }
 0x3b1   :  { %v2578_v16 = vpop.f32.mrf.mxu1 }
 0x3b2   :  { %3431 = vmatpush.bf16.msra.mxu3 %v5785_v18  ;;  %v2434_v42 = vpop.f32.mrf.mxu0  ;;  %v2465_v28 = vadd.f32 %v2429_v24, %v2319_v23 }
 0x3b3   :  { %3186 = vmatpush.bf16.msra.mxu1 %v5657_v6  ;;  %v2288_v39 = vpop.f32.mrf.mxu3  ;;  %v6378_v6 = vld [vmem:[%s9486_s7 + $0x164] sm:$0xf] }
 0x3b4   :  { %3235 = vmatpush.bf16.msra.mxu2 %v5661_v52  ;;  %v5789_v61 = vor.u32 %v6378_v6, %v5786_v22  ;;  %v2610_v52 = vadd.f32 %v8019_v12, %v2464_v11  ;;  %v2611_v33 = vadd.f32 %v2575_v8, %v2465_v28 }
 0x3b6   :  { %3480 = vmatpush.bf16.msra.mxu0 %v5789_v61 }
 0x3b8   :  { %v2714_v3 = vpop.f32.mrf.mxu2 }
 0x3b9   :  { %v2754_v26 = vadd.f32 %v2714_v3, %v2608_v62  ;;  %v2580_v25 = vpop.f32.mrf.mxu1  ;;  %v5776_v3 = vld [vmem:[%s9486_s7 + $0x150] sm:$0xf] }
 0x3ba   :  { %v5777_v12 = vor.u32 %v6377_v19, %v5776_v3 }
 0x3bb   :  { %v2770_v51 = vmax.f32 %v2754_v26, 0.0  ;;  %v2291_v63 = vpop.f32.mrf.mxu3  ;;  %v2320_v26 = vadd.f32 %v2286_v37, %v7838_v56  ;;  %v5778_v56 = vld [vmem:[%s9486_s7 + $0x158] sm:$0xf0]  ;;  %v2321_v37 = vadd.f32 %v2288_v39, %v7847_v4  ;;  %v5768_v4 = vld [vmem:[%s9486_s7 + $0x140] sm:$0xf] }
 0x3bc   :  { %3432 = vmatpush.bf16.msra.mxu3 %v5777_v12  ;;  %v2322_v19 = vadd.f32 %v2291_v63, %v7858_v41  ;;  %v5770_v41 = vld [vmem:[%s9486_s7 + $0x148] sm:$0xf0] }
 0x3bd   :  { %2786 = vst [vmem:[#allocation4] sm:$0xff] %v2770_v51  ;;  %v2466_v59 = vadd.f32 %v2432_v20, %v2320_v26  ;;  %v2467_v23 = vadd.f32 %v2434_v42, %v2321_v37 }
 0x3bf   :  { %v2612_v20 = vadd.f32 %v2578_v16, %v2466_v59  ;;  %v6375_v16 = vld [vmem:[%s9486_s7 + $0x144] sm:$0xf0]  ;;  %v2613_v12 = vadd.f32 %v2580_v25, %v2467_v23 }
 0x3c0   :  { %v2716_v35 = vpop.f32.mrf.mxu2  ;;  %v5769_v3 = vor.u32 %v6375_v16, %v5768_v4 }
 0x3c1   :  { %v2755_v17 = vadd.f32 %v2716_v35, %v2609_v2  ;;  %v2583_v18 = vpop.f32.mrf.mxu1 }
 0x3c2   :  { %3433 = vmatpush.bf16.msra.mxu3 %v5769_v3 }
 0x3c3   :  { %v2771_v58 = vmax.f32 %v2755_v17, 0.0  ;;  %v2293_v2 = vpop.f32.mrf.mxu3 }
 0x3c5   :  { %2787 = vst [vmem:[#allocation4 + $0x8] sm:$0xff] %v2771_v58  ;;  %v2824_v44 = vpack.c.bf16 %v2771_v58, %v2770_v51  ;;  %v2437_v51 = vpop.f32.mrf.mxu0 }
 0x3c7   :  { %2936 = vmatmul.bf16.vlgmr.msrb.gmra.mxu3 %v2824_v44  ;;  %2985 = vmatmul.bf16.vlgmr.msrb.gmra.mxu0 %v2824_v44 }
 0x3c8   :  { %v2719_v38 = vpop.f32.mrf.mxu2 }
 0x3c9   :  { %v2756_v45 = vadd.f32 %v2719_v38, %v2610_v52  ;;  %v2585_v28 = vpop.f32.mrf.mxu1 }
 0x3cb   :  { %v2772_v62 = vmax.f32 %v2756_v45, 0.0 }
 0x3cc   :  { %v3058_v35 = vld [vmem:[#allocation4 + $0x1] sm:$0xff] }
 0x3cd   :  { %2788 = vst [vmem:[#allocation4 + $0x10] sm:$0xff] %v2772_v62  ;;  %v8102_v9 = vpack.c.bf16 %v2772_v62, %v2771_v58  ;;  %v6376_v58 = vld [vmem:[%s9486_s7 + $0x154] sm:$0xf]  ;;  %v2439_v61 = vpop.f32.mrf.mxu0 }
 0x3ce   :  { %v5781_v8 = vor.u32 %v6376_v58, %v5778_v56  ;;  %v6374_v56 = vld [vmem:[%s9486_s7 + $0x144] sm:$0xf] }
 0x3cf   :  { %v5773_v63 = vor.u32 %v6374_v56, %v5770_v41 }
 0x3d0   :  { %v2721_v55 = vpop.f32.mrf.mxu2  ;;  %3481 = vmatpush.bf16.msra.mxu0 %v5781_v8 }
 0x3d1   :  { %v2757_v24 = vadd.f32 %v2721_v55, %v2611_v33  ;;  %v2468_v55 = vadd.f32 %v2437_v51, %v2322_v19  ;;  %v2323_v51 = vadd.f32 %v2293_v2, %v7867_v60  ;;  %v2588_v8 = vpop.f32.mrf.mxu1  ;;  %v6373_v2 = vld [vmem:[%s9486_s7 + $0x134] sm:$0xf0] }
 0x3d3   :  { %v2773_v48 = vmax.f32 %v2757_v24, 0.0  ;;  %v2614_v37 = vadd.f32 %v2583_v18, %v2468_v55  ;;  %v2469_v4 = vadd.f32 %v2439_v61, %v2323_v51  ;;  %v5760_v18 = vld [vmem:[%s9486_s7 + $0x130] sm:$0xf] }
 0x3d4   :  { %v3059_v17 = vld [vmem:[#allocation4 + $0x9] sm:$0xff]  ;;  %3482 = vmatpush.bf16.msra.mxu0 %v5773_v63  ;;  %v5761_v19 = vor.u32 %v6373_v2, %v5760_v18 }
 0x3d5   :  { %2789 = vst [vmem:[#allocation4 + $0x18] sm:$0xff] %v2773_v48  ;;  %v3074_v11 = vpack.c.bf16 %v3059_v17, %v3058_v35  ;;  %v2825_v44 = vpack.c.bf16 %v2773_v48, %v2772_v62  ;;  %v8112_v38 = vld [vmem:[#allocation4 + $0xa] sm:$0xff]  ;;  %v2296_v62 = vpop.f32.mrf.mxu3  ;;  %v2442_v35 = vpop.f32.mrf.mxu0 }
 0x3d6   :  { %3434 = vmatpush.bf16.msra.mxu3 %v5761_v19 }
 0x3d7   :  { %3187 = vmatmul.bf16.vlgmr.msra.gmra.mxu1 %v3074_v11  ;;  %3236 = vmatmul.bf16.vlgmr.msra.gmra.mxu2 %v3074_v11 }
 0x3d8   :  { %v2724_v6 = vpop.f32.mrf.mxu2  ;;  %2941 = vmatmul.bf16.gmra.mxu3 %v2825_v44  ;;  %2990 = vmatmul.bf16.gmra.mxu0 %v2825_v44 }
 0x3d9   :  { %v2758_v22 = vadd.f32 %v2724_v6, %v2612_v20 }
 0x3db   :  { %v2774_v52 = vmax.f32 %v2758_v22, 0.0  ;;  %v1595_v22 = vadd.f32 %v7623_v31, %v7712_v47 }
 0x3dc   :  { %v8114_v45 = vld [vmem:[#allocation4 + $0x12] sm:$0xff] }
 0x3dd   :  { %2790 = vst [vmem:[#allocation4 + $0x20] sm:$0xff] %v2774_v52  ;;  %v8122_v39 = vpack.c.bf16 %v2774_v52, %v2773_v48  ;;  %v8126_v42 = vpack.c.bf16 %v8114_v45, %v8112_v38  ;;  %v3060_v59 = vld [vmem:[#allocation4 + $0x11] sm:$0xff]  ;;  %v2298_v20 = vpop.f32.mrf.mxu3  ;;  %v2444_v61 = vpop.f32.mrf.mxu0 }
 0x3de   :  { %v3812_v11 = vld [vmem:[#allocation4 + $0x11] sm:$0xff] }
 0x3e0   :  { %v2726_v26 = vpop.f32.mrf.mxu2 }
 0x3e1   :  { %v2759_v33 = vadd.f32 %v2726_v26, %v2613_v12  ;;  %v2324_v26 = vadd.f32 %v2296_v62, %v7878_v54  ;;  %v6372_v54 = vld [vmem:[%s9486_s7 + $0x134] sm:$0xf] }
 0x3e3   :  { %v2775_v24 = vmax.f32 %v2759_v33, 0.0  ;;  %v2615_v33 = vadd.f32 %v2585_v28, %v2469_v4  ;;  %v5762_v28 = vld [vmem:[%s9486_s7 + $0x138] sm:$0xf0] }
 0x3e4   :  { %v3061_v17 = vld [vmem:[#allocation4 + $0x19] sm:$0xff]  ;;  %v5765_v62 = vor.u32 %v6372_v54, %v5762_v28 }
 0x3e5   :  { %v3813_v48 = vld [vmem:[#allocation4 + $0x19] sm:$0xff]  ;;  %2791 = vst [vmem:[#allocation4 + $0x28] sm:$0xff] %v2775_v24  ;;  %v3075_v44 = vpack.c.bf16 %v3061_v17, %v3060_v59  ;;  %v2826_v58 = vpack.c.bf16 %v2775_v24, %v2774_v52  ;;  %v1741_v52 = vadd.f32 %v7724_v29, %v1595_v22  ;;  %v2590_v59 = vpop.f32.mrf.mxu1  ;;  %v2447_v22 = vpop.f32.mrf.mxu0 }
 0x3e6   :  { %v8135_v25 = vpack.c.bf16 %v3813_v48, %v3812_v11  ;;  %v8141_v3 = vld [vmem:[#allocation4 + $0x1a] sm:$0xff]  ;;  %v2301_v11 = vpop.f32.mrf.mxu3  ;;  %3483 = vmatpush.bf16.msra.mxu0 %v5765_v62 }
 0x3e7   :  { %3192 = vmatmul.bf16.gmra.mxu1 %v3075_v44  ;;  %3241 = vmatmul.bf16.gmra.mxu2 %v3075_v44  ;;  %v1887_v12 = vadd.f32 %v7714_v30, %v1741_v52 }
 0x3e8   :  { %v2729_v6 = vpop.f32.mrf.mxu2  ;;  %2946 = vmatmul.bf16.gmra.mxu3 %v2826_v58  ;;  %2995 = vmatmul.bf16.gmra.mxu0 %v2826_v58 }
 0x3e9   :  { %v2760_v23 = vadd.f32 %v2729_v6, %v2614_v37  ;;  %v2033_v48 = vadd.f32 %v7716_v7, %v1887_v12 }
 0x3eb   :  { %v2776_v16 = vmax.f32 %v2760_v23, 0.0  ;;  %v2179_v51 = vadd.f32 %v7886_v40, %v2033_v48  ;;  %v1597_v23 = vadd.f32 %v7623_v31, %v7735_v34  ;;  %v6371_v31 = vld [vmem:[%s9486_s7 + $0x124] sm:$0xf0] }
 0x3ec   :  { %v8143_v60 = vld [vmem:[#allocation4 + $0x22] sm:$0xff] }
 0x3ed   :  { %2792 = vst [vmem:[#allocation4 + $0x30] sm:$0xff] %v2776_v16  ;;  %v8151_v47 = vpack.c.bf16 %v2776_v16, %v2775_v24  ;;  %v8155_v29 = vpack.c.bf16 %v8143_v60, %v8141_v3  ;;  %v2470_v24 = vadd.f32 %v2442_v35, %v2324_v26  ;;  %v3062_v58 = vld [vmem:[#allocation4 + $0x21] sm:$0xff]  ;;  %v2325_v35 = vadd.f32 %v2298_v20, %v2179_v51  ;;  %v2593_v18 = vpop.f32.mrf.mxu1 }
 0x3ee   :  { %v3814_v41 = vld [vmem:[#allocation4 + $0x21] sm:$0xff]  ;;  %v1743_v4 = vadd.f32 %v7747_v36, %v1597_v23  ;;  %v2303_v19 = vpop.f32.mrf.mxu3 }
 0x3ef   :  { %v2616_v6 = vadd.f32 %v2588_v8, %v2470_v24  ;;  %v5752_v8 = vld [vmem:[%s9486_s7 + $0x120] sm:$0xf]  ;;  %v2449_v24 = vpop.f32.mrf.mxu0 }
 0x3f0   :  { %v2731_v55 = vpop.f32.mrf.mxu2  ;;  %v1889_v26 = vadd.f32 %v7737_v13, %v1743_v4 }
 0x3f1   :  { %v2761_v17 = vadd.f32 %v2731_v55, %v2615_v33  ;;  %v2326_v33 = vadd.f32 %v2301_v11, %v7899_v5  ;;  %v6370_v5 = vld [vmem:[%s9486_s7 + $0x124] sm:$0xf] }
 0x3f3   :  { %v2777_v44 = vmax.f32 %v2761_v17, 0.0 }
 0x3f4   :  { %v3063_v56 = vld [vmem:[#allocation4 + $0x29] sm:$0xff] }
 0x3f5   :  { %v3815_v63 = vld [vmem:[#allocation4 + $0x29] sm:$0xff]  ;;  %2793 = vst [vmem:[#allocation4 + $0x38] sm:$0xff] %v2777_v44  ;;  %v3076_v30 = vpack.c.bf16 %v3063_v56, %v3062_v58  ;;  %v2827_v37 = vpack.c.bf16 %v2777_v44, %v2776_v16  ;;  %v2471_v16 = vadd.f32 %v2444_v61, %v2325_v35  ;;  %v5753_v61 = vor.u32 %v6371_v31, %v5752_v8  ;;  %v2595_v54 = vpop.f32.mrf.mxu1 }
 0x3f6   :  { %v8167_v7 = vpack.c.bf16 %v3815_v63, %v3814_v41  ;;  %v8172_v12 = vld [vmem:[#allocation4 + $0x2a] sm:$0xff]  ;;  %v2035_v58 = vadd.f32 %v7739_v21, %v1889_v26  ;;  %v2472_v56 = vadd.f32 %v2447_v22, %v2326_v33  ;;  %v5754_v21 = vld [vmem:[%s9486_s7 + $0x128] sm:$0xf0]  ;;  %v2306_v11 = vpop.f32.mrf.mxu3 }
 0x3f7   :  { %3197 = vmatmul.bf16.gmra.mxu1 %v3076_v30  ;;  %3246 = vmatmul.bf16.gmra.mxu2 %v3076_v30  ;;  %v2617_v55 = vadd.f32 %v2590_v59, %v2471_v16  ;;  %v5757_v62 = vor.u32 %v6370_v5, %v5754_v21  ;;  %v6489_v22 = vld [vmem:[%s9485_s6] ss:$0 sm:$0xff] }
 0x3f8   :  { %v2734_v40 = vpop.f32.mrf.mxu2  ;;  %2951 = vmatmul.bf16.gmra.mxu3 %v2827_v37  ;;  %3000 = vmatmul.bf16.gmra.mxu0 %v2827_v37  ;;  %v2181_v37 = vadd.f32 %v7913_v43, %v2035_v58  ;;  %v2618_v43 = vadd.f32 %v2593_v18, %v2472_v56  ;;  %v5744_v18 = vld [vmem:[%s9486_s7 + $0x110] sm:$0xf] }
 0x3f9   :  { %v2762_v52 = vadd.f32 %v2734_v40, %v2616_v6  ;;  %3435 = vmatpush.bf16.msra.mxu3 %v5753_v61  ;;  %v1599_v40 = vadd.f32 %v6489_v22, %v7758_v57  ;;  %3484 = vmatpush.bf16.msra.mxu0 %v5757_v62  ;;  %v6369_v57 = vld [vmem:[%s9486_s7 + $0x114] sm:$0xf0] }
 0x3fa   :  { %v2327_v35 = vadd.f32 %v2303_v19, %v2181_v37  ;;  %v5745_v61 = vor.u32 %v6369_v57, %v5744_v18  ;;  %v5736_v57 = vld [vmem:[%s9486_s7 + $0x100] sm:$0xf] }
 0x3fb   :  { %v2778_v2 = vmax.f32 %v2762_v52, 0.0  ;;  %v1745_v52 = vadd.f32 %v7766_v15, %v1599_v40 }
 0x3fc   :  { %v8174_v20 = vld [vmem:[#allocation4 + $0x32] sm:$0xff]  ;;  %v2473_v4 = vadd.f32 %v2449_v24, %v2327_v35  ;;  %v6397_v35 = vld [vmem:[%s9486_s7 + $0x1f4] sm:$0xf0] }
 0x3fd   :  { %2794 = vst [vmem:[#allocation4 + $0x40] sm:$0xff] %v2778_v2  ;;  %v8182_v34 = vpack.c.bf16 %v2778_v2, %v2777_v44  ;;  %v8186_v36 = vpack.c.bf16 %v8174_v20, %v8172_v12  ;;  %v3064_v44 = vld [vmem:[#allocation4 + $0x31] sm:$0xff]  ;;  %v1891_v26 = vadd.f32 %v7764_v1, %v1745_v52  ;;  %v2598_v33 = vpop.f32.mrf.mxu1  ;;  %3436 = vmatpush.bf16.msra.mxu3 %v5745_v61  ;;  %v5874_v52 = vld [vmem:[%s9486_s7 + $0x1f8] sm:$0xf0] }
 0x3fe   :  { %v3816_v51 = vld [vmem:[#allocation4 + $0x31] sm:$0xff] }
 0x3ff   :  { %v2037_v56 = vadd.f32 %v7771_v14, %v1891_v26 }
 0x400   :  { %v2736_v17 = vpop.f32.mrf.mxu2 }
 0x401   :  { %v2763_v48 = vadd.f32 %v2736_v17, %v2617_v55  ;;  %v2328_v55 = vadd.f32 %v2306_v11, %v7942_v32  ;;  %v2619_v17 = vadd.f32 %v2595_v54, %v2473_v4  ;;  %v6368_v32 = vld [vmem:[%s9486_s7 + $0x114] sm:$0xf]  ;;  %v5746_v54 = vld [vmem:[%s9486_s7 + $0x118] sm:$0xf0]  ;;  %v5864_v4 = vld [vmem:[%s9486_s7 + $0x1e0] sm:$0xf] }
 0x402   :  { %v5749_v21 = vor.u32 %v6368_v32, %v5746_v54  ;;  %v6366_v54 = vld [vmem:[%s9486_s7 + $0x104] sm:$0xf] }
 0x403   :  { %v2779_v41 = vmax.f32 %v2763_v48, 0.0  ;;  %v2308_v48 = vpop.f32.mrf.mxu3 }
 0x404   :  { %v3065_v63 = vld [vmem:[#allocation4 + $0x39] sm:$0xff]  ;;  %3485 = vmatpush.bf16.msra.mxu0 %v5749_v21 }
 0x405   :  { %v3817_v30 = vld [vmem:[#allocation4 + $0x39] sm:$0xff]  ;;  %2795 = vst [vmem:[#allocation4 + $0x48] sm:$0xff] %v2779_v41  ;;  %v3077_v13 = vpack.c.bf16 %v3065_v63, %v3064_v44  ;;  %v2828_v28 = vpack.c.bf16 %v2779_v41, %v2778_v2  ;;  %v2452_v2 = vpop.f32.mrf.mxu0  ;;  %v2600_v26 = vpop.f32.mrf.mxu1 }
 0x406   :  { %v8198_v59 = vpack.c.bf16 %v3817_v30, %v3816_v51  ;;  %v8205_v19 = vld [vmem:[#allocation4 + $0x3a] sm:$0xff]  ;;  %v2474_v44 = vadd.f32 %v2452_v2, %v2328_v55 }
 0x407   :  { %3202 = vmatmul.bf16.gmra.mxu1 %v3077_v13  ;;  %3251 = vmatmul.bf16.gmra.mxu2 %v3077_v13  ;;  %v2183_v13 = vadd.f32 %v7973_v0, %v2037_v56  ;;  %v5872_v0 = vld [vmem:[%s9486_s7 + $0x1f0] sm:$0xf] }
 0x408   :  { %v2739_v6 = vpop.f32.mrf.mxu2  ;;  %2956 = vmatmul.bf16.gmra.mxu3 %v2828_v28  ;;  %3005 = vmatmul.bf16.gmra.mxu0 %v2828_v28  ;;  %v2620_v62 = vadd.f32 %v2598_v33, %v2474_v44  ;;  %v5856_v44 = vld [vmem:[%s9486_s7 + $0x1d0] sm:$0xf] }
 0x409   :  { %v2764_v23 = vadd.f32 %v2739_v6, %v2618_v43  ;;  %v2329_v11 = vadd.f32 %v2308_v48, %v2183_v13  ;;  %v6396_v43 = vld [vmem:[%s9486_s7 + $0x1f4] sm:$0xf]  ;;  %v1601_v6 = vadd.f32 %v6489_v22, %v7785_v49  ;;  %v6394_v49 = vld [vmem:[%s9486_s7 + $0x1e4] sm:$0xf]  ;;  %v5866_v22 = vld [vmem:[%s9486_s7 + $0x1e8] sm:$0xf0] }
 0x40a   :  { %v5877_v18 = vor.u32 %v6396_v43, %v5874_v52  ;;  %v5850_v52 = vld [vmem:[%s9486_s7 + $0x1c8] sm:$0xf0] }
 0x40b   :  { %v2780_v16 = vmax.f32 %v2764_v23, 0.0  ;;  %v5873_v23 = vor.u32 %v6397_v35, %v5872_v0  ;;  %v1747_v61 = vadd.f32 %v7888_v53, %v1601_v6  ;;  %v2311_v33 = vpop.f32.mrf.mxu3  ;;  %v6393_v53 = vld [vmem:[%s9486_s7 + $0x1d4] sm:$0xf0]  ;;  %v6391_v0 = vld [vmem:[%s9486_s7 + $0x1c4] sm:$0xf0] }
 0x40c   :  { %v8207_v8 = vld [vmem:[#allocation4 + $0x42] sm:$0xff]  ;;  %3730 = vmatpush.bf16.msrb.mxu2 %v5877_v18  ;;  %v5857_v32 = vor.u32 %v6393_v53, %v5856_v44 }
 0x40d   :  { %2796 = vst [vmem:[#allocation4 + $0x50] sm:$0xff] %v2780_v16  ;;  %v8215_v31 = vpack.c.bf16 %v2780_v16, %v2779_v41  ;;  %v8219_v15 = vpack.c.bf16 %v8207_v8, %v8205_v19  ;;  %v3066_v63 = vld [vmem:[#allocation4 + $0x41] sm:$0xff]  ;;  %v2454_v5 = vpop.f32.mrf.mxu0  ;;  %3681 = vmatpush.bf16.msrb.mxu1 %v5873_v23 }
 0x40e   :  { %v3818_v30 = vld [vmem:[#allocation4 + $0x41] sm:$0xff]  ;;  %v2475_v48 = vadd.f32 %v2454_v5, %v2329_v11  ;;  %v5738_v5 = vld [vmem:[%s9486_s7 + $0x108] sm:$0xf0] }
 0x40f   :  { %v5741_v35 = vor.u32 %v6366_v54, %v5738_v5  ;;  %v5952_v5 = vld [vmem:[%s9486_s7 + $0x270] sm:$0xf] }
 0x410   :  { %v2741_v24 = vpop.f32.mrf.mxu2  ;;  %v2621_v11 = vadd.f32 %v2600_v26, %v2475_v48 }
 0x411   :  { %v2765_v58 = vadd.f32 %v2741_v24, %v2619_v17  ;;  %v6367_v17 = vld [vmem:[%s9486_s7 + $0x104] sm:$0xf0]  ;;  %3486 = vmatpush.bf16.msra.mxu0 %v5741_v35 }
 0x412   :  { %v5737_v56 = vor.u32 %v6367_v17, %v5736_v57 }
 0x413   :  { %v2781_v41 = vmax.f32 %v2765_v58, 0.0  ;;  %v5869_v58 = vor.u32 %v6394_v49, %v5866_v22  ;;  %v2313_v18 = vpop.f32.mrf.mxu3 }
 0x414   :  { %v3067_v51 = vld [vmem:[#allocation4 + $0x49] sm:$0xff]  ;;  %3437 = vmatpush.bf16.msra.mxu3 %v5737_v56  ;;  %v5840_v56 = vld [vmem:[%s9486_s7 + $0x1b0] sm:$0xf] }
 0x415   :  { %v3819_v37 = vld [vmem:[#allocation4 + $0x49] sm:$0xff]  ;;  %2797 = vst [vmem:[#allocation4 + $0x58] sm:$0xff] %v2781_v41  ;;  %v3078_v1 = vpack.c.bf16 %v3067_v51, %v3066_v63  ;;  %v2829_v28 = vpack.c.bf16 %v2781_v41, %v2780_v16  ;;  %v6395_v16 = vld [vmem:[%s9486_s7 + $0x1e4] sm:$0xf0]  ;;  %v6392_v63 = vld [vmem:[%s9486_s7 + $0x1d4] sm:$0xf]  ;;  %3731 = vmatpush.bf16.msrb.mxu2 %v5869_v58 }
 0x416   :  { %v8231_v14 = vpack.c.bf16 %v3819_v37, %v3818_v30  ;;  %v5865_v55 = vor.u32 %v6395_v16, %v5864_v4  ;;  %v5858_v51 = vld [vmem:[%s9486_s7 + $0x1d8] sm:$0xf0] }
 0x417   :  { %3207 = vmatmul.bf16.gmra.mxu1 %v3078_v1  ;;  %3256 = vmatmul.bf16.gmra.mxu2 %v3078_v1  ;;  %v8277_v30 = vld [vmem:[#allocation4 + $0x4a] sm:$0xff]  ;;  %v1893_v1 = vadd.f32 %v7901_v46, %v1747_v61  ;;  %v5861_v46 = vor.u32 %v6392_v63, %v5858_v51 }
 0x418   :  { %v2744_v40 = vpop.f32.mrf.mxu2  ;;  %2961 = vmatmul.bf16.gmra.mxu3 %v2829_v28  ;;  %3010 = vmatmul.bf16.gmra.mxu0 %v2829_v28  ;;  %v2457_v28 = vpop.f32.mrf.mxu0  ;;  %v5842_v51 = vld [vmem:[%s9486_s7 + $0x1b8] sm:$0xf0] }
 0x419   :  { %v2766_v2 = vadd.f32 %v2744_v40, %v2620_v62  ;;  %3682 = vmatpush.bf16.msrb.mxu1 %v5865_v55  ;;  %v5848_v62 = vld [vmem:[%s9486_s7 + $0x1c0] sm:$0xf]  ;;  %v2603_v40 = vpop.f32.mrf.mxu1  ;;  %v2039_v4 = vadd.f32 %v7909_v50, %v1893_v1  ;;  %3732 = vmatpush.bf16.msrb.mxu2 %v5861_v46  ;;  %v5834_v46 = vld [vmem:[%s9486_s7 + $0x1a8] sm:$0xf0] }
 0x41a   :  { %v5849_v23 = vor.u32 %v6391_v0, %v5848_v62  ;;  %v5832_v1 = vld [vmem:[%s9486_s7 + $0x1a0] sm:$0xf]  ;;  %v6413_v62 = vld [vmem:[%s9486_s7 + $0x274] sm:$0xf0] }
 0x41b   :  { %v2782_v24 = vmax.f32 %v2766_v2, 0.0  ;;  %v2185_v57 = vadd.f32 %v8050_v27, %v2039_v4  ;;  %v6389_v27 = vld [vmem:[%s9486_s7 + $0x1b4] sm:$0xf0] }
 0x41c   :  { %v8279_v37 = vld [vmem:[#allocation4 + $0x52] sm:$0xff]  ;;  %v5841_v63 = vor.u32 %v6389_v27, %v5840_v56 }
 0x41d   :  { %2798 = vst [vmem:[#allocation4 + $0x60] sm:$0xff] %v2782_v24  ;;  %v8281_v13 = vpack.c.bf16 %v2782_v24, %v2781_v41  ;;  %v8292_v21 = vpack.c.bf16 %v8279_v37, %v8277_v30  ;;  %v2330_v41 = vadd.f32 %v2311_v33, %v8017_v10  ;;  %3683 = vmatpush.bf16.msrb.mxu1 %v5857_v32  ;;  %v6390_v10 = vld [vmem:[%s9486_s7 + $0x1c4] sm:$0xf]  ;;  %v6383_v56 = vld [vmem:[%s9486_s7 + $0x184] sm:$0xf0] }
 0x41e   :  { %v3068_v49 = vld [vmem:[#allocation4 + $0x51] sm:$0xff]  ;;  %v5853_v33 = vor.u32 %v6390_v10, %v5850_v52  ;;  %v2331_v58 = vadd.f32 %v2313_v18, %v2185_v57  ;;  %v5826_v57 = vld [vmem:[%s9486_s7 + $0x198] sm:$0xf0] }
 0x41f   :  { %v2476_v16 = vadd.f32 %v2457_v28, %v2330_v41  ;;  %v8309_v55 = vld [vmem:[#allocation4 + $0x51] sm:$0xff] }
 0x420   :  { %v2746_v43 = vpop.f32.mrf.mxu2  ;;  %v2459_v44 = vpop.f32.mrf.mxu0  ;;  %v6387_v28 = vld [vmem:[%s9486_s7 + $0x1a4] sm:$0xf0]  ;;  %3733 = vmatpush.bf16.msrb.mxu2 %v5853_v33 }
 0x421   :  { %v2767_v6 = vadd.f32 %v2746_v43, %v2621_v11  ;;  %3684 = vmatpush.bf16.msrb.mxu1 %v5849_v23  ;;  %v2622_v50 = vadd.f32 %v2603_v40, %v2476_v16  ;;  %v5833_v41 = vor.u32 %v6387_v28, %v5832_v1  ;;  %v6386_v11 = vld [vmem:[%s9486_s7 + $0x1a4] sm:$0xf]  ;;  %v2477_v0 = vadd.f32 %v2459_v44, %v2331_v58  ;;  %v6385_v40 = vld [vmem:[%s9486_s7 + $0x194] sm:$0xf0]  ;;  %v2605_v23 = vpop.f32.mrf.mxu1  ;;  %v5816_v58 = vld [vmem:[%s9486_s7 + $0x180] sm:$0xf] }
 0x422   :  { %v5953_v43 = vor.u32 %v6413_v62, %v5952_v5  ;;  %v5837_v4 = vor.u32 %v6386_v11, %v5834_v46  ;;  %v6382_v44 = vld [vmem:[%s9486_s7 + $0x184] sm:$0xf]  ;;  %v6412_v28 = vld [vmem:[%s9486_s7 + $0x274] sm:$0xf] }
 0x423   :  { %v2783_v2 = vmax.f32 %v2767_v6, 0.0  ;;  %v5824_v6 = vld [vmem:[%s9486_s7 + $0x190] sm:$0xf] }
 0x424   :  { %v3069_v22 = vld [vmem:[#allocation4 + $0x59] sm:$0xff]  ;;  %3932 = vmatpush.bf16.msrb.mxu3 %v5953_v43 }
 0x425   :  { %2799 = vst [vmem:[#allocation4 + $0x68] sm:$0xff] %v2783_v2  ;;  %v3079_v61 = vpack.c.bf16 %v3069_v22, %v3068_v49  ;;  %v2830_v26 = vpack.c.bf16 %v2783_v2, %v2782_v24  ;;  %v3821_v17 = vld [vmem:[#allocation4 + $0x59] sm:$0xff]  ;;  %v6388_v24 = vld [vmem:[%s9486_s7 + $0x1b4] sm:$0xf]  ;;  %3685 = vmatpush.bf16.msrb.mxu1 %v5841_v63  ;;  %v5825_v49 = vor.u32 %v6385_v40, %v5824_v6 }
 0x426   :  { %v8312_v48 = vpack.c.bf16 %v3821_v17, %v8309_v55  ;;  %v5845_v54 = vor.u32 %v6388_v24, %v5842_v51  ;;  %v8350_v10 = vld [vmem:[#allocation4 + $0x5a] sm:$0xff]  ;;  %v6384_v22 = vld [vmem:[%s9486_s7 + $0x194] sm:$0xf]  ;;  %v5817_v24 = vor.u32 %v6383_v56, %v5816_v58 }
 0x427   :  { %3212 = vmatmul.bf16.gmra.mxu1 %v3079_v61  ;;  %3261 = vmatmul.bf16.gmra.mxu2 %v3079_v61  ;;  %v2623_v61 = vadd.f32 %v2605_v23, %v2477_v0  ;;  %v5944_v0 = vld [vmem:[%s9486_s7 + $0x260] sm:$0xf] }
 0x428   :  { %9523 = vst [vmem:[#allocation5_spill] sm:$0xff] %v8312_v48  ;;  %v2749_v53 = vpop.f32.mrf.mxu2  ;;  %2966 = vmatmul.bf16.gmra.mxu3 %v2830_v26  ;;  %3015 = vmatmul.bf16.gmra.mxu0 %v2830_v26 }
 0x429   :  { %v2768_v32 = vadd.f32 %v2749_v53, %v2622_v50  ;;  %3734 = vmatpush.bf16.msrb.mxu2 %v5845_v54  ;;  %3686 = vmatpush.bf16.msrb.mxu1 %v5833_v41  ;;  %v5818_v53 = vld [vmem:[%s9486_s7 + $0x188] sm:$0xf0] }
 0x42a   :  { %v5821_v1 = vor.u32 %v6382_v44, %v5818_v53  ;;  %v6409_v44 = vld [vmem:[%s9486_s7 + $0x254] sm:$0xf0] }
 0x42b   :  { %v2784_v35 = vmax.f32 %v2768_v32, 0.0  ;;  %v5954_v32 = vld [vmem:[%s9486_s7 + $0x278] sm:$0xf0] }
 0x42c   :  { %v8352_v52 = vld [vmem:[#allocation4 + $0x62] sm:$0xff]  ;;  %v5957_v54 = vor.u32 %v6412_v28, %v5954_v32 }
 0x42d   :  { %2800 = vst [vmem:[#allocation4 + $0x70] sm:$0xff] %v2784_v35  ;;  %v8354_v16 = vpack.c.bf16 %v2784_v35, %v2783_v2  ;;  %v8358_v18 = vpack.c.bf16 %v8352_v52, %v8350_v10  ;;  %3735 = vmatpush.bf16.msrb.mxu2 %v5837_v4  ;;  %v5829_v2 = vor.u32 %v6384_v22, %v5826_v57  ;;  %v3070_v50 = vld [vmem:[#allocation4 + $0x61] sm:$0xff] }
 0x42e   :  { %3687 = vmatpush.bf16.msrb.mxu1 %v5825_v49  ;;  %v8388_v5 = vld [vmem:[#allocation4 + $0x61] sm:$0xff]  ;;  %3981 = vmatpush.bf16.msrb.mxu0 %v5957_v54 }
 0x430   :  { %v2751_v26 = vpop.f32.mrf.mxu2 }
 0x431   :  { %v2769_v33 = vadd.f32 %v2751_v26, %v2623_v61  ;;  %3736 = vmatpush.bf16.msrb.mxu2 %v5829_v2  ;;  %v3309_v26 = vld [vmem:[#allocation4 + $0x2] sm:$0xff]  ;;  %v5946_v2 = vld [vmem:[%s9486_s7 + $0x268] sm:$0xf0] }
 0x432   :  { %3688 = vmatpush.bf16.msrb.mxu1 %v5817_v24  ;;  %v5936_v24 = vld [vmem:[%s9486_s7 + $0x250] sm:$0xf] }
 0x433   :  { %v8366_v17 = vmax.f32 %v2769_v33, 0.0  ;;  %v6410_v33 = vld [vmem:[%s9486_s7 + $0x264] sm:$0xf]  ;;  %v5937_v53 = vor.u32 %v6409_v44, %v5936_v24 }
 0x434   :  { %v3071_v27 = vld [vmem:[#allocation4 + $0x69] sm:$0xff]  ;;  %v5949_v58 = vor.u32 %v6410_v33, %v5946_v2 }
 0x435   :  { %2801 = vst [vmem:[#allocation4 + $0x78] sm:$0xff] %v8366_v17  ;;  %v3080_v63 = vpack.c.bf16 %v3071_v27, %v3070_v50  ;;  %v2831_v51 = vpack.c.bf16 %v8366_v17, %v2784_v35  ;;  %v3823_v41 = vld [vmem:[#allocation4 + $0x69] sm:$0xff]  ;;  %3737 = vmatpush.bf16.msrb.mxu2 %v5821_v1  ;;  %v6411_v35 = vld [vmem:[%s9486_s7 + $0x264] sm:$0xf0]  ;;  %v3325_v50 = vpack.c.bf16 %v8112_v38, %v3309_v26 }
 0x436   :  { %v8391_v11 = vpack.c.bf16 %v3823_v41, %v8388_v5  ;;  %v8393_v46 = vld [vmem:[#allocation4 + $0x6a] sm:$0xff]  ;;  %v5945_v6 = vor.u32 %v6411_v35, %v5944_v0  ;;  %3982 = vmatpush.bf16.msrb.mxu0 %v5949_v58  ;;  %v6408_v0 = vld [vmem:[%s9486_s7 + $0x254] sm:$0xf] }
 0x437   :  { %3217 = vmatmul.bf16.gmra.mxu1 %v3080_v63  ;;  %3266 = vmatmul.bf16.gmra.mxu2 %v3080_v63  ;;  %v2802_v38 = vld [vmem:[%s9487_s8] sm:$0x3]  ;;  %v5938_v35 = vld [vmem:[%s9486_s7 + $0x258] sm:$0xf0] }
 0x438   :  { %9524 = vst [vmem:[#allocation6_spill] sm:$0xff] %v8391_v11  ;;  %2971 = vmatmul.bf16.gmra.mxu3 %v2831_v51  ;;  %3020 = vmatmul.bf16.gmra.mxu0 %v2831_v51  ;;  %v8425_v63 = vperm.slane %v2802_v38, 0  ;;  %v8428_v32 = vperm.slane %v2802_v38, 1 }
 0x439   :  { %3933 = vmatpush.bf16.msrb.mxu3 %v5945_v6  ;;  %v3326_v6 = vpack.c.bf16 %v8141_v3, %v8114_v45  ;;  %v5928_v3 = vld [vmem:[%s9486_s7 + $0x240] sm:$0xf] }
 0x43c   :  { %v8395_v62 = vld [vmem:[#allocation4 + $0x72] sm:$0xff] }
 0x43d   :  { %v8405_v43 = vpack.c.bf16 %v8395_v62, %v8393_v46  ;;  %v3824_v40 = vld [vmem:[#allocation4 + $0x71] sm:$0xff]  ;;  %v3825_v23 = vld [vmem:[#allocation4 + $0x79] sm:$0xff]  ;;  %3934 = vmatpush.bf16.msrb.mxu3 %v5937_v53 }
 0x43e   :  { %v8407_v4 = vpack.c.bf16 %v3825_v23, %v3824_v40  ;;  %v3072_v49 = vld [vmem:[#allocation4 + $0x71] sm:$0xff]  ;;  %v3073_v22 = vld [vmem:[#allocation4 + $0x79] sm:$0xff]  ;;  %v5941_v40 = vor.u32 %v6408_v0, %v5938_v35 }
 0x43f   :  { %v3081_v61 = vpack.c.bf16 %v3073_v22, %v3072_v49 }
 0x440   :  { %9525 = vst [vmem:[#allocation7_spill] sm:$0xff] %v8407_v4  ;;  %3983 = vmatpush.bf16.msrb.mxu0 %v5941_v40  ;;  %v3811_v4 = vld [vmem:[#allocation4 + $0x9] sm:$0xff] }
 0x444   :  { %v2986_v57 = vpop.f32.mrf.mxu0 }
 0x445   :  { %v3027_v23 = vadd.f32 %v2986_v57, %v8428_v32 }
 0x447   :  { %3222 = vmatmul.bf16.gmra.mxu1 %v3081_v61  ;;  %3271 = vmatmul.bf16.gmra.mxu2 %v3081_v61 }
 0x448   :  { %3438 = vmatmul.bf16.vlgmr.msra.gmra.mxu3 %v3325_v50  ;;  %3487 = vmatmul.bf16.vlgmr.msra.gmra.mxu0 %v3325_v50 }
 0x44a   :  { %v2937_v56 = vpop.f32.mrf.mxu3 }
 0x44b   :  { %v3026_v1 = vadd.f32 %v2937_v56, %v8425_v63 }
 0x44c   :  { %v2988_v27 = vpop.f32.mrf.mxu0 }
 0x44d   :  { %v3029_v50 = vadd.f32 %v2988_v27, %v8428_v32  ;;  %v3327_v27 = vpack.c.bf16 %v8172_v12, %v8143_v60  ;;  %v5920_v12 = vld [vmem:[%s9486_s7 + $0x230] sm:$0xf] }
 0x452   :  { %v2939_v51 = vpop.f32.mrf.mxu3 }
 0x453   :  { %v3028_v22 = vadd.f32 %v2939_v51, %v8425_v63 }
 0x454   :  { %v3188_v28 = vpop.f32.mrf.mxu1 }
 0x455   :  { %v8430_v54 = vadd.f32 %v3188_v28, %v3026_v1  ;;  %v2991_v41 = vpop.f32.mrf.mxu0  ;;  %v6406_v1 = vld [vmem:[%s9486_s7 + $0x244] sm:$0xf]  ;;  %v5930_v28 = vld [vmem:[%s9486_s7 + $0x248] sm:$0xf0] }
 0x456   :  { %v5933_v0 = vor.u32 %v6406_v1, %v5930_v28  ;;  %v3031_v35 = vadd.f32 %v2991_v41, %v8428_v32  ;;  %v5922_v1 = vld [vmem:[%s9486_s7 + $0x238] sm:$0xf0] }
 0x457   :  { %3689 = vmatmul.bf16.vlgmr.msrb.gmra.mxu1 %v8102_v9  ;;  %3738 = vmatmul.bf16.vlgmr.msrb.gmra.mxu2 %v8102_v9  ;;  %v6407_v9 = vld [vmem:[%s9486_s7 + $0x244] sm:$0xf0] }
 0x458   :  { %3443 = vmatmul.bf16.gmra.mxu3 %v3326_v6  ;;  %3492 = vmatmul.bf16.gmra.mxu0 %v3326_v6  ;;  %v5929_v57 = vor.u32 %v6407_v9, %v5928_v3 }
 0x459   :  { %3984 = vmatpush.bf16.msrb.mxu0 %v5933_v0 }
 0x45a   :  { %v3237_v49 = vpop.f32.mrf.mxu2  ;;  %3935 = vmatpush.bf16.msrb.mxu3 %v5929_v57 }
 0x45b   :  { %v8444_v61 = vadd.f32 %v3237_v49, %v3027_v23  ;;  %v2942_v26 = vpop.f32.mrf.mxu3 }
 0x45c   :  { %v3190_v33 = vpop.f32.mrf.mxu1  ;;  %v3030_v56 = vadd.f32 %v2942_v26, %v8425_v63 }
 0x45d   :  { %v8446_v2 = vadd.f32 %v3190_v33, %v3028_v22  ;;  %v2993_v45 = vpop.f32.mrf.mxu0 }
 0x45e   :  { %v3033_v33 = vadd.f32 %v2993_v45, %v8428_v32  ;;  %v3328_v45 = vpack.c.bf16 %v8205_v19, %v8174_v20  ;;  %v5912_v19 = vld [vmem:[%s9486_s7 + $0x220] sm:$0xf] }
 0x462   :  { %v3239_v58 = vpop.f32.mrf.mxu2 }
 0x463   :  { %v8456_v24 = vadd.f32 %v3239_v58, %v3029_v50  ;;  %v2944_v44 = vpop.f32.mrf.mxu3 }
 0x464   :  { %v3193_v38 = vpop.f32.mrf.mxu1  ;;  %v3032_v40 = vadd.f32 %v2944_v44, %v8425_v63 }
 0x465   :  { %v8458_v53 = vadd.f32 %v3193_v38, %v3030_v56  ;;  %v2996_v51 = vpop.f32.mrf.mxu0  ;;  %v6404_v38 = vld [vmem:[%s9486_s7 + $0x234] sm:$0xf] }
 0x466   :  { %v5925_v28 = vor.u32 %v6404_v38, %v5922_v1  ;;  %v6402_v38 = vld [vmem:[%s9486_s7 + $0x224] sm:$0xf]  ;;  %v5914_v1 = vld [vmem:[%s9486_s7 + $0x228] sm:$0xf0] }
 0x467   :  { %3694 = vmatmul.bf16.gmra.mxu1 %v8122_v39  ;;  %3743 = vmatmul.bf16.gmra.mxu2 %v8122_v39  ;;  %v6405_v39 = vld [vmem:[%s9486_s7 + $0x234] sm:$0xf0] }
 0x468   :  { %3448 = vmatmul.bf16.gmra.mxu3 %v3327_v27  ;;  %3497 = vmatmul.bf16.gmra.mxu0 %v3327_v27  ;;  %v5921_v41 = vor.u32 %v6405_v39, %v5920_v12  ;;  %v3035_v27 = vadd.f32 %v2996_v51, %v8428_v32 }
 0x469   :  { %3985 = vmatpush.bf16.msrb.mxu0 %v5925_v28 }
 0x46a   :  { %v3242_v6 = vpop.f32.mrf.mxu2  ;;  %3936 = vmatpush.bf16.msrb.mxu3 %v5921_v41 }
 0x46b   :  { %v8472_v23 = vadd.f32 %v3242_v6, %v3031_v35  ;;  %v2947_v49 = vpop.f32.mrf.mxu3 }
 0x46c   :  { %v3195_v22 = vpop.f32.mrf.mxu1  ;;  %v3034_v9 = vadd.f32 %v2947_v49, %v8425_v63 }
 0x46d   :  { %v8474_v26 = vadd.f32 %v3195_v22, %v3032_v40  ;;  %v2998_v60 = vpop.f32.mrf.mxu0 }
 0x46e   :  { %v3037_v12 = vadd.f32 %v2998_v60, %v8428_v32  ;;  %v3329_v60 = vpack.c.bf16 %v8277_v30, %v8207_v8  ;;  %v5904_v30 = vld [vmem:[%s9486_s7 + $0x210] sm:$0xf] }
 0x472   :  { %v3244_v3 = vpop.f32.mrf.mxu2 }
 0x473   :  { %v8484_v57 = vadd.f32 %v3244_v3, %v3033_v33  ;;  %v2949_v50 = vpop.f32.mrf.mxu3 }
 0x474   :  { %v3198_v58 = vpop.f32.mrf.mxu1  ;;  %v3036_v35 = vadd.f32 %v2949_v50, %v8425_v63 }
 0x475   :  { %v8486_v56 = vadd.f32 %v3198_v58, %v3034_v9  ;;  %v3001_v44 = vpop.f32.mrf.mxu0 }
 0x476   :  { %v3039_v28 = vadd.f32 %v3001_v44, %v8428_v32 }
 0x477   :  { %3699 = vmatmul.bf16.gmra.mxu1 %v8151_v47  ;;  %3748 = vmatmul.bf16.gmra.mxu2 %v8151_v47  ;;  %v6403_v47 = vld [vmem:[%s9486_s7 + $0x224] sm:$0xf0] }
 0x478   :  { %3453 = vmatmul.bf16.gmra.mxu3 %v3328_v45  ;;  %3502 = vmatmul.bf16.gmra.mxu0 %v3328_v45  ;;  %v5913_v51 = vor.u32 %v6403_v47, %v5912_v19  ;;  %v5917_v45 = vor.u32 %v6402_v38, %v5914_v1  ;;  %v6400_v1 = vld [vmem:[%s9486_s7 + $0x214] sm:$0xf] }
 0x47a   :  { %v3247_v0 = vpop.f32.mrf.mxu2  ;;  %3937 = vmatpush.bf16.msrb.mxu3 %v5913_v51  ;;  %3986 = vmatpush.bf16.msrb.mxu0 %v5917_v45 }
 0x47b   :  { %v8500_v6 = vadd.f32 %v3247_v0, %v3035_v27  ;;  %v2952_v40 = vpop.f32.mrf.mxu3 }
 0x47c   :  { %v3200_v49 = vpop.f32.mrf.mxu1  ;;  %v3038_v41 = vadd.f32 %v2952_v40, %v8425_v63 }
 0x47d   :  { %v8502_v22 = vadd.f32 %v3200_v49, %v3036_v35  ;;  %v3003_v20 = vpop.f32.mrf.mxu0 }
 0x47e   :  { %v3041_v47 = vadd.f32 %v3003_v20, %v8428_v32  ;;  %v3330_v20 = vpack.c.bf16 %v8350_v10, %v8279_v37  ;;  %v6034_v10 = vld [vmem:[%s9486_s7 + $0x2f8] sm:$0xf0] }
 0x482   :  { %v3249_v39 = vpop.f32.mrf.mxu2 }
 0x483   :  { %v8512_v33 = vadd.f32 %v3249_v39, %v3037_v12  ;;  %v2954_v3 = vpop.f32.mrf.mxu3 }
 0x484   :  { %v3203_v9 = vpop.f32.mrf.mxu1  ;;  %v3040_v0 = vadd.f32 %v2954_v3, %v8425_v63 }
 0x485   :  { %v8514_v50 = vadd.f32 %v3203_v9, %v3038_v41  ;;  %v3006_v58 = vpop.f32.mrf.mxu0 }
 0x487   :  { %3704 = vmatmul.bf16.gmra.mxu1 %v8182_v34  ;;  %3753 = vmatmul.bf16.gmra.mxu2 %v8182_v34  ;;  %v6401_v34 = vld [vmem:[%s9486_s7 + $0x214] sm:$0xf0] }
 0x488   :  { %3458 = vmatmul.bf16.gmra.mxu3 %v3329_v60  ;;  %3507 = vmatmul.bf16.gmra.mxu0 %v3329_v60  ;;  %v5905_v44 = vor.u32 %v6401_v34, %v5904_v30  ;;  %v5906_v60 = vld [vmem:[%s9486_s7 + $0x218] sm:$0xf0] }
 0x489   :  { %v5909_v45 = vor.u32 %v6400_v1, %v5906_v60 }
 0x48a   :  { %v3252_v27 = vpop.f32.mrf.mxu2  ;;  %3938 = vmatpush.bf16.msrb.mxu3 %v5905_v44 }
 0x48b   :  { %v8528_v35 = vadd.f32 %v3252_v27, %v3039_v28  ;;  %v2957_v40 = vpop.f32.mrf.mxu3  ;;  %v6032_v28 = vld [vmem:[%s9486_s7 + $0x2f0] sm:$0xf]  ;;  %v6429_v27 = vld [vmem:[%s9486_s7 + $0x2f4] sm:$0xf0]  ;;  %3987 = vmatpush.bf16.msrb.mxu0 %v5909_v45  ;;  %v5896_v45 = vld [vmem:[%s9486_s7 + $0x200] sm:$0xf] }
 0x48c   :  { %v3205_v49 = vpop.f32.mrf.mxu1  ;;  %v3042_v12 = vadd.f32 %v2957_v40, %v8425_v63  ;;  %v6033_v37 = vor.u32 %v6429_v27, %v6032_v28  ;;  %v6399_v28 = vld [vmem:[%s9486_s7 + $0x204] sm:$0xf0]  ;;  %v6016_v27 = vld [vmem:[%s9486_s7 + $0x2d0] sm:$0xf] }
 0x48d   :  { %v8530_v19 = vadd.f32 %v3205_v49, %v3040_v0  ;;  %v3008_v8 = vpop.f32.mrf.mxu0  ;;  %v6428_v0 = vld [vmem:[%s9486_s7 + $0x2f4] sm:$0xf] }
 0x48e   :  { %v6037_v40 = vor.u32 %v6428_v0, %v6034_v10  ;;  %4183 = vmatpush.bf16.msra.mxu1 %v6033_v37  ;;  %v5897_v0 = vor.u32 %v6399_v28, %v5896_v45  ;;  %v6425_v37 = vld [vmem:[%s9486_s7 + $0x2d4] sm:$0xf0]  ;;  %v6424_v10 = vld [vmem:[%s9486_s7 + $0x2d4] sm:$0xf]  ;;  %v6398_v28 = vld [vmem:[%s9486_s7 + $0x204] sm:$0xf] }
 0x490   :  { %4232 = vmatpush.bf16.msra.mxu2 %v6037_v40  ;;  %v6017_v40 = vor.u32 %v6425_v37, %v6016_v27  ;;  %3939 = vmatpush.bf16.msrb.mxu3 %v5897_v0  ;;  %v5898_v27 = vld [vmem:[%s9486_s7 + $0x208] sm:$0xf0] }
 0x492   :  { %v3254_v51 = vpop.f32.mrf.mxu2 }
 0x493   :  { %v8540_v39 = vadd.f32 %v3254_v51, %v3041_v47  ;;  %v2959_v41 = vpop.f32.mrf.mxu3  ;;  %v6024_v47 = vld [vmem:[%s9486_s7 + $0x2e0] sm:$0xf]  ;;  %v6427_v51 = vld [vmem:[%s9486_s7 + $0x2e4] sm:$0xf0] }
 0x494   :  { %v3208_v3 = vpop.f32.mrf.mxu1  ;;  %v3044_v30 = vadd.f32 %v2959_v41, %v8425_v63  ;;  %v6026_v41 = vld [vmem:[%s9486_s7 + $0x2e8] sm:$0xf0] }
 0x495   :  { %v8542_v9 = vadd.f32 %v3208_v3, %v3042_v12  ;;  %v8544_v38 = vpop.f32.mrf.mxu0  ;;  %v6025_v3 = vor.u32 %v6427_v51, %v6024_v47 }
 0x497   :  { %3709 = vmatmul.bf16.gmra.mxu1 %v8215_v31  ;;  %3758 = vmatmul.bf16.gmra.mxu2 %v8215_v31  ;;  %v3043_v31 = vadd.f32 %v3006_v58, %v8428_v32  ;;  %v6426_v58 = vld [vmem:[%s9486_s7 + $0x2e4] sm:$0xf] }
 0x498   :  { %3463 = vmatmul.bf16.gmra.mxu3 %v3330_v20  ;;  %3512 = vmatmul.bf16.gmra.mxu0 %v3330_v20  ;;  %v6029_v20 = vor.u32 %v6426_v58, %v6026_v41  ;;  %v6423_v41 = vld [vmem:[%s9486_s7 + $0x2c4] sm:$0xf0] }
 0x499   :  { %4184 = vmatpush.bf16.msra.mxu1 %v6025_v3  ;;  %v6008_v3 = vld [vmem:[%s9486_s7 + $0x2c0] sm:$0xf] }
 0x49a   :  { %v3257_v49 = vpop.f32.mrf.mxu2  ;;  %4233 = vmatpush.bf16.msra.mxu2 %v6029_v20  ;;  %v6009_v45 = vor.u32 %v6423_v41, %v6008_v3 }
 0x49b   :  { %v8570_v34 = vadd.f32 %v3257_v49, %v3043_v31  ;;  %v2962_v44 = vpop.f32.mrf.mxu3  ;;  %v6018_v31 = vld [vmem:[%s9486_s7 + $0x2d8] sm:$0xf0] }
 0x49c   :  { %v3210_v12 = vpop.f32.mrf.mxu1  ;;  %v6021_v49 = vor.u32 %v6424_v10, %v6018_v31  ;;  %v3046_v51 = vadd.f32 %v2962_v44, %v8425_v63  ;;  %v6010_v44 = vld [vmem:[%s9486_s7 + $0x2c8] sm:$0xf0]  ;;  %v5901_v31 = vor.u32 %v6398_v28, %v5898_v27 }
 0x49d   :  { %v8584_v1 = vadd.f32 %v3210_v12, %v3044_v30  ;;  %v8586_v60 = vpop.f32.mrf.mxu0  ;;  %v3045_v30 = vadd.f32 %v3008_v8, %v8428_v32  ;;  %4185 = vmatpush.bf16.msra.mxu1 %v6017_v40  ;;  %v6422_v8 = vld [vmem:[%s9486_s7 + $0x2c4] sm:$0xf]  ;;  %v3331_v40 = vpack.c.bf16 %v8393_v46, %v8352_v52  ;;  %v6002_v46 = vld [vmem:[%s9486_s7 + $0x2b8] sm:$0xf0] }
 0x49e   :  { %4234 = vmatpush.bf16.msra.mxu2 %v6021_v49  ;;  %v6013_v10 = vor.u32 %v6422_v8, %v6010_v44  ;;  %v6000_v49 = vld [vmem:[%s9486_s7 + $0x2b0] sm:$0xf]  ;;  %3988 = vmatpush.bf16.msrb.mxu0 %v5901_v31  ;;  %v6419_v44 = vld [vmem:[%s9486_s7 + $0x2a4] sm:$0xf0] }
 0x4a1   :  { %4186 = vmatpush.bf16.msra.mxu1 %v6009_v45  ;;  %v5992_v45 = vld [vmem:[%s9486_s7 + $0x2a0] sm:$0xf] }
 0x4a2   :  { %v3259_v47 = vpop.f32.mrf.mxu2  ;;  %4235 = vmatpush.bf16.msra.mxu2 %v6013_v10  ;;  %v5993_v27 = vor.u32 %v6419_v44, %v5992_v45 }
 0x4a3   :  { %v8608_v58 = vadd.f32 %v3259_v47, %v3045_v30  ;;  %v2964_v12 = vpop.f32.mrf.mxu3  ;;  %v6421_v30 = vld [vmem:[%s9486_s7 + $0x2b4] sm:$0xf0]  ;;  %v6420_v47 = vld [vmem:[%s9486_s7 + $0x2b4] sm:$0xf] }
 0x4a4   :  { %v3213_v20 = vpop.f32.mrf.mxu1  ;;  %v6001_v52 = vor.u32 %v6421_v30, %v6000_v49  ;;  %v3048_v41 = vadd.f32 %v2964_v12, %v8425_v63  ;;  %v5994_v12 = vld [vmem:[%s9486_s7 + $0x2a8] sm:$0xf0]  ;;  %v6112_v49 = vld [vmem:[%s9486_s7 + $0x370] sm:$0xf]  ;;  %v6445_v30 = vld [vmem:[%s9486_s7 + $0x374] sm:$0xf0] }
 0x4a5   :  { %v8628_v0 = vadd.f32 %v3213_v20, %v3046_v51  ;;  %v8630_v37 = vpop.f32.mrf.mxu0  ;;  %v6005_v51 = vor.u32 %v6420_v47, %v6002_v46  ;;  %v5984_v47 = vld [vmem:[%s9486_s7 + $0x290] sm:$0xf]  ;;  %v6417_v46 = vld [vmem:[%s9486_s7 + $0x294] sm:$0xf0] }
 0x4a6   :  { %4187 = vmatpush.bf16.msra.mxu1 %v6001_v52  ;;  %v6113_v52 = vor.u32 %v6445_v30, %v6112_v49  ;;  %v5976_v49 = vld [vmem:[%s9486_s7 + $0x280] sm:$0xf]  ;;  %v6415_v30 = vld [vmem:[%s9486_s7 + $0x284] sm:$0xf0] }
 0x4a7   :  { %3714 = vmatmul.bf16.gmra.mxu1 %v8281_v13  ;;  %3763 = vmatmul.bf16.gmra.mxu2 %v8281_v13  ;;  %v3047_v13 = vadd.f32 %v8544_v38, %v8428_v32  ;;  %v6418_v38 = vld [vmem:[%s9486_s7 + $0x2a4] sm:$0xf] }
 0x4a8   :  { %3468 = vmatmul.bf16.gmra.mxu3 %v3331_v40  ;;  %3517 = vmatmul.bf16.gmra.mxu0 %v3331_v40  ;;  %v5997_v40 = vor.u32 %v6418_v38, %v5994_v12  ;;  %v8687_v38 = vld [vmem:[#allocation4 + $0x7a] sm:$0xff] }
 0x4a9   :  { %4236 = vmatpush.bf16.msra.mxu2 %v6005_v51  ;;  %v5986_v51 = vld [vmem:[%s9486_s7 + $0x298] sm:$0xf0]  ;;  %4434 = vmatpush.bf16.msra.mxu3 %v6113_v52 }
 0x4aa   :  { %v3262_v3 = vpop.f32.mrf.mxu2  ;;  %4188 = vmatpush.bf16.msra.mxu1 %v5993_v27 }
 0x4ab   :  { %v8651_v8 = vadd.f32 %v3262_v3, %v3047_v13  ;;  %v2967_v20 = vpop.f32.mrf.mxu3  ;;  %v6416_v13 = vld [vmem:[%s9486_s7 + $0x294] sm:$0xf]  ;;  %v5985_v3 = vor.u32 %v6417_v46, %v5984_v47  ;;  %v5977_v47 = vor.u32 %v6415_v30, %v5976_v49 }
 0x4ac   :  { %v3215_v28 = vpop.f32.mrf.mxu1  ;;  %v5989_v45 = vor.u32 %v6416_v13, %v5986_v51  ;;  %v6444_v51 = vld [vmem:[%s9486_s7 + $0x374] sm:$0xf] }
 0x4ad   :  { %v8665_v10 = vadd.f32 %v3215_v28, %v3048_v41  ;;  %v3018_v31 = vpop.f32.mrf.mxu0  ;;  %v3049_v41 = vadd.f32 %v8586_v60, %v8428_v32  ;;  %4237 = vmatpush.bf16.msra.mxu2 %v5997_v40  ;;  %v3050_v28 = vadd.f32 %v2967_v20, %v8425_v63  ;;  %v6414_v60 = vld [vmem:[%s9486_s7 + $0x284] sm:$0xf]  ;;  %v5978_v20 = vld [vmem:[%s9486_s7 + $0x288] sm:$0xf0] }
 0x4ae   :  { %4189 = vmatpush.bf16.msra.mxu1 %v5985_v3  ;;  %v5981_v13 = vor.u32 %v6414_v60, %v5978_v20  ;;  %v6114_v3 = vld [vmem:[%s9486_s7 + $0x378] sm:$0xf0] }
 0x4b1   :  { %4238 = vmatpush.bf16.msra.mxu2 %v5989_v45  ;;  %v3051_v45 = vadd.f32 %v8630_v37, %v8428_v32  ;;  %v6443_v37 = vld [vmem:[%s9486_s7 + $0x364] sm:$0xf0] }
 0x4b2   :  { %v3264_v44 = vpop.f32.mrf.mxu2  ;;  %4190 = vmatpush.bf16.msra.mxu1 %v5977_v47 }
 0x4b3   :  { %v8690_v27 = vadd.f32 %v3264_v44, %v3049_v41  ;;  %v2969_v12 = vpop.f32.mrf.mxu3  ;;  %v3332_v41 = vpack.c.bf16 %v8687_v38, %v8395_v62  ;;  %v6117_v44 = vor.u32 %v6444_v51, %v6114_v3 }
 0x4b4   :  { %v3218_v40 = vpop.f32.mrf.mxu1  ;;  %v3052_v49 = vadd.f32 %v2969_v12, %v8425_v63 }
 0x4b5   :  { %v8704_v52 = vadd.f32 %v3218_v40, %v3050_v28  ;;  %v3021_v46 = vpop.f32.mrf.mxu0  ;;  %4239 = vmatpush.bf16.msra.mxu2 %v5981_v13  ;;  %4483 = vmatpush.bf16.msra.mxu0 %v6117_v44  ;;  %v3053_v13 = vadd.f32 %v3018_v31, %v8428_v32  ;;  %v6106_v31 = vld [vmem:[%s9486_s7 + $0x368] sm:$0xf0] }
 0x4b7   :  { %3719 = vmatmul.bf16.gmra.mxu1 %v8354_v16  ;;  %3768 = vmatmul.bf16.gmra.mxu2 %v8354_v16  ;;  %v6104_v16 = vld [vmem:[%s9486_s7 + $0x360] sm:$0xf] }
 0x4b8   :  { %3473 = vmatmul.bf16.gmra.mxu3 %v3332_v41  ;;  %3522 = vmatmul.bf16.gmra.mxu0 %v3332_v41  ;;  %v6105_v20 = vor.u32 %v6443_v37, %v6104_v16  ;;  %v6442_v16 = vld [vmem:[%s9486_s7 + $0x364] sm:$0xf] }
 0x4b9   :  { %v6491_v37 = vld [vmem:[#allocation4 + $0x11] sm:$0xff] }
 0x4ba   :  { %v3267_v28 = vpop.f32.mrf.mxu2  ;;  %4435 = vmatpush.bf16.msra.mxu3 %v6105_v20  ;;  %v3827_v20 = vpack.c.bf16 %v6491_v37, %v3811_v4 }
 0x4bb   :  { %v8719_v30 = vadd.f32 %v3267_v28, %v3051_v45  ;;  %v2972_v60 = vpop.f32.mrf.mxu3  ;;  %v6490_v28 = vld [vmem:[#allocation4 + $0x80] sm:$0xff] }
 0x4bc   :  { %v3220_v62 = vpop.f32.mrf.mxu1  ;;  %v3054_v51 = vadd.f32 %v2972_v60, %v8425_v63 }
 0x4bd   :  { %v8721_v40 = vadd.f32 %v3220_v62, %v3052_v49  ;;  %v3023_v47 = vpop.f32.mrf.mxu0  ;;  %v3583_v49 = vpack.c.bf16 %v6490_v28, %v8366_v17  ;;  %v3055_v17 = vadd.f32 %v3021_v46, %v8428_v32  ;;  %v6441_v46 = vld [vmem:[%s9486_s7 + $0x354] sm:$0xf0] }
 0x4c2   :  { %v3269_v12 = vpop.f32.mrf.mxu2 }
 0x4c3   :  { %v8731_v3 = vadd.f32 %v3269_v12, %v3053_v13  ;;  %v2974_v41 = vpop.f32.mrf.mxu3  ;;  %v6109_v13 = vor.u32 %v6442_v16, %v6106_v31 }
 0x4c4   :  { %v3223_v44 = vpop.f32.mrf.mxu1 }
 0x4c5   :  { %v8733_v45 = vadd.f32 %v3223_v44, %v3054_v51  ;;  %v3488_v62 = vpop.f32.mrf.mxu0  ;;  %4484 = vmatpush.bf16.msra.mxu0 %v6109_v13  ;;  %v3056_v51 = vadd.f32 %v2974_v41, %v8425_v63  ;;  %v3057_v41 = vadd.f32 %v3023_v47, %v8428_v32  ;;  %v6492_v47 = vld [vmem:[#allocation4 + $0x19] sm:$0xff] }
 0x4c6   :  { %v3529_v60 = vadd.f32 %v3488_v62, %v8444_v61 }
 0x4c7   :  { %3724 = vmatmul.bf16.gmra.mxu1 %v3583_v49  ;;  %3773 = vmatmul.bf16.gmra.mxu2 %v3583_v49  ;;  %v6096_v49 = vld [vmem:[%s9486_s7 + $0x350] sm:$0xf] }
 0x4c8   :  { %3940 = vmatmul.bf16.vlgmr.msrb.gmra.mxu3 %v3827_v20  ;;  %3989 = vmatmul.bf16.vlgmr.msrb.gmra.mxu0 %v3827_v20  ;;  %v6097_v63 = vor.u32 %v6441_v46, %v6096_v49 }
 0x4ca   :  { %v3272_v12 = vpop.f32.mrf.mxu2  ;;  %4436 = vmatpush.bf16.msra.mxu3 %v6097_v63 }
 0x4cb   :  { %v8745_v44 = vadd.f32 %v3272_v12, %v3055_v17  ;;  %v3439_v28 = vpop.f32.mrf.mxu3  ;;  %v6440_v17 = vld [vmem:[%s9486_s7 + $0x354] sm:$0xf] }
 0x4cc   :  { %v3225_v11 = vpop.f32.mrf.mxu1  ;;  %v3528_v48 = vadd.f32 %v3439_v28, %v8430_v54  ;;  %v6493_v12 = vld [vmem:[#allocation4 + $0x21] sm:$0xff] }
 0x4cd   :  { %v8748_v61 = vadd.f32 %v3225_v11, %v3056_v51  ;;  %v3490_v4 = vpop.f32.mrf.mxu0  ;;  %v3828_v51 = vpack.c.bf16 %v6493_v12, %v6492_v47  ;;  %v6438_v47 = vld [vmem:[%s9486_s7 + $0x344] sm:$0xf] }
 0x4ce   :  { %v3531_v62 = vadd.f32 %v3490_v4, %v8456_v24  ;;  %v6098_v24 = vld [vmem:[%s9486_s7 + $0x358] sm:$0xf0] }
 0x4cf   :  { %v6101_v28 = vor.u32 %v6440_v17, %v6098_v24 }
 0x4d1   :  { %4485 = vmatpush.bf16.msra.mxu0 %v6101_v28 }
 0x4d2   :  { %v3274_v16 = vpop.f32.mrf.mxu2 }
 0x4d3   :  { %v8758_v31 = vadd.f32 %v3274_v16, %v3057_v41  ;;  %v3441_v11 = vpop.f32.mrf.mxu3  ;;  %v6088_v41 = vld [vmem:[%s9486_s7 + $0x340] sm:$0xf] }
 0x4d4   :  { %v3690_v54 = vpop.f32.mrf.mxu1  ;;  %v3530_v37 = vadd.f32 %v3441_v11, %v8446_v2 }
 0x4d5   :  { %v8761_v20 = vadd.f32 %v3690_v54, %v3528_v48  ;;  %v3493_v13 = vpop.f32.mrf.mxu0 }
 0x4d6   :  { %v3533_v32 = vadd.f32 %v3493_v13, %v8472_v23 }
 0x4d7   :  { %4191 = vmatmul.bf16.vlgmr.msra.gmra.mxu1 %v8126_v42  ;;  %4240 = vmatmul.bf16.vlgmr.msra.gmra.mxu2 %v8126_v42  ;;  %v6439_v42 = vld [vmem:[%s9486_s7 + $0x344] sm:$0xf0] }
 0x4d8   :  { %3945 = vmatmul.bf16.gmra.mxu3 %v3828_v51  ;;  %3994 = vmatmul.bf16.gmra.mxu0 %v3828_v51  ;;  %v6089_v11 = vor.u32 %v6439_v42, %v6088_v41  ;;  %v6494_v51 = vld [vmem:[#allocation4 + $0x29] sm:$0xff]  ;;  %v6080_v42 = vld [vmem:[%s9486_s7 + $0x330] sm:$0xf] }
 0x4da   :  { %v3739_v48 = vpop.f32.mrf.mxu2  ;;  %4437 = vmatpush.bf16.msra.mxu3 %v6089_v11 }
 0x4db   :  { %v8772_v2 = vadd.f32 %v3739_v48, %v3529_v60  ;;  %v3444_v4 = vpop.f32.mrf.mxu3 }
 0x4dc   :  { %v3692_v49 = vpop.f32.mrf.mxu1  ;;  %v3532_v46 = vadd.f32 %v3444_v4, %v8458_v53 }
 0x4dd   :  { %v8775_v63 = vadd.f32 %v3692_v49, %v3530_v37  ;;  %v3495_v23 = vpop.f32.mrf.mxu0 }
 0x4de   :  { %v3535_v16 = vadd.f32 %v3495_v23, %v8484_v57  ;;  %v6090_v57 = vld [vmem:[%s9486_s7 + $0x348] sm:$0xf0] }
 0x4df   :  { %v6093_v48 = vor.u32 %v6438_v47, %v6090_v57  ;;  %v6436_v57 = vld [vmem:[%s9486_s7 + $0x334] sm:$0xf] }
 0x4e1   :  { %4486 = vmatpush.bf16.msra.mxu0 %v6093_v48 }
 0x4e2   :  { %v3741_v60 = vpop.f32.mrf.mxu2 }
 0x4e3   :  { %v8784_v54 = vadd.f32 %v3741_v60, %v3531_v62  ;;  %v3446_v13 = vpop.f32.mrf.mxu3  ;;  %v6495_v62 = vld [vmem:[#allocation4 + $0x31] sm:$0xff] }
 0x4e4   :  { %v3695_v53 = vpop.f32.mrf.mxu1  ;;  %v3534_v37 = vadd.f32 %v3446_v13, %v8474_v26  ;;  %v3829_v28 = vpack.c.bf16 %v6495_v62, %v6494_v51  ;;  %v6496_v62 = vld [vmem:[#allocation4 + $0x39] sm:$0xff] }
 0x4e5   :  { %v8787_v17 = vadd.f32 %v3695_v53, %v3532_v46  ;;  %v3498_v24 = vpop.f32.mrf.mxu0 }
 0x4e6   :  { %v3537_v12 = vadd.f32 %v3498_v24, %v8500_v6 }
 0x4e7   :  { %4196 = vmatmul.bf16.gmra.mxu1 %v8155_v29  ;;  %4245 = vmatmul.bf16.gmra.mxu2 %v8155_v29  ;;  %v6437_v29 = vld [vmem:[%s9486_s7 + $0x334] sm:$0xf0] }
 0x4e8   :  { %3950 = vmatmul.bf16.gmra.mxu3 %v3829_v28  ;;  %3999 = vmatmul.bf16.gmra.mxu0 %v3829_v28  ;;  %v6081_v60 = vor.u32 %v6437_v29, %v6080_v42  ;;  %v6072_v42 = vld [vmem:[%s9486_s7 + $0x320] sm:$0xf] }
 0x4ea   :  { %v3744_v26 = vpop.f32.mrf.mxu2  ;;  %4438 = vmatpush.bf16.msra.mxu3 %v6081_v60 }
 0x4eb   :  { %v8798_v4 = vadd.f32 %v3744_v26, %v3533_v32  ;;  %v3449_v49 = vpop.f32.mrf.mxu3 }
 0x4ec   :  { %v3697_v46 = vpop.f32.mrf.mxu1  ;;  %v3536_v23 = vadd.f32 %v3449_v49, %v8486_v56 }
 0x4ed   :  { %v8801_v41 = vadd.f32 %v3697_v46, %v3534_v37  ;;  %v3500_v6 = vpop.f32.mrf.mxu0 }
 0x4ee   :  { %v3539_v11 = vadd.f32 %v3500_v6, %v8512_v33  ;;  %v6082_v33 = vld [vmem:[%s9486_s7 + $0x338] sm:$0xf0] }
 0x4ef   :  { %v6085_v48 = vor.u32 %v6436_v57, %v6082_v33  ;;  %v6434_v57 = vld [vmem:[%s9486_s7 + $0x324] sm:$0xf] }
 0x4f1   :  { %4487 = vmatpush.bf16.msra.mxu0 %v6085_v48 }
 0x4f2   :  { %v3746_v32 = vpop.f32.mrf.mxu2 }
 0x4f3   :  { %v8810_v13 = vadd.f32 %v3746_v32, %v3535_v16  ;;  %v3451_v53 = vpop.f32.mrf.mxu3  ;;  %v6497_v16 = vld [vmem:[#allocation4 + $0x41] sm:$0xff] }
 0x4f4   :  { %v3700_v56 = vpop.f32.mrf.mxu1  ;;  %v3538_v37 = vadd.f32 %v3451_v53, %v8502_v22  ;;  %v3830_v28 = vpack.c.bf16 %v6497_v16, %v6496_v62  ;;  %v6498_v62 = vld [vmem:[#allocation4 + $0x49] sm:$0xff] }
 0x4f5   :  { %v8813_v24 = vadd.f32 %v3700_v56, %v3536_v23  ;;  %v3503_v47 = vpop.f32.mrf.mxu0 }
 0x4f6   :  { %v3541_v51 = vadd.f32 %v3503_v47, %v8528_v35 }
 0x4f7   :  { %4201 = vmatmul.bf16.gmra.mxu1 %v8186_v36  ;;  %4250 = vmatmul.bf16.gmra.mxu2 %v8186_v36  ;;  %v6435_v36 = vld [vmem:[%s9486_s7 + $0x324] sm:$0xf0] }
 0x4f8   :  { %3955 = vmatmul.bf16.gmra.mxu3 %v3830_v28  ;;  %4004 = vmatmul.bf16.gmra.mxu0 %v3830_v28  ;;  %v6073_v60 = vor.u32 %v6435_v36, %v6072_v42 }
 0x4fa   :  { %v3749_v22 = vpop.f32.mrf.mxu2  ;;  %4439 = vmatpush.bf16.msra.mxu3 %v6073_v60 }
 0x4fb   :  { %v8824_v26 = vadd.f32 %v3749_v22, %v3537_v12  ;;  %v3454_v49 = vpop.f32.mrf.mxu3 }
 0x4fc   :  { %v3702_v46 = vpop.f32.mrf.mxu1  ;;  %v3540_v23 = vadd.f32 %v3454_v49, %v8514_v50 }
 0x4fd   :  { %v8827_v6 = vadd.f32 %v3702_v46, %v3538_v37  ;;  %v3505_v35 = vpop.f32.mrf.mxu0 }
 0x4fe   :  { %v3543_v29 = vadd.f32 %v3505_v35, %v8540_v39  ;;  %v6074_v39 = vld [vmem:[%s9486_s7 + $0x328] sm:$0xf0] }
 0x4ff   :  { %v6077_v16 = vor.u32 %v6434_v57, %v6074_v39  ;;  %v6461_v39 = vld [vmem:[%s9486_s7 + $0x3f4] sm:$0xf0] }
 0x501   :  { %4488 = vmatpush.bf16.msra.mxu0 %v6077_v16 }
 0x502   :  { %v3751_v12 = vpop.f32.mrf.mxu2 }
 0x503   :  { %v8836_v32 = vadd.f32 %v3751_v12, %v3539_v11  ;;  %v3456_v53 = vpop.f32.mrf.mxu3  ;;  %v3831_v11 = vpack.c.bf16 %v8309_v55, %v6498_v62  ;;  %v6064_v55 = vld [vmem:[%s9486_s7 + $0x310] sm:$0xf]  ;;  %v6194_v62 = vld [vmem:[%s9486_s7 + $0x3f8] sm:$0xf0] }
 0x504   :  { %v3705_v50 = vpop.f32.mrf.mxu1  ;;  %v3542_v56 = vadd.f32 %v3456_v53, %v8530_v19 }
 0x505   :  { %v8839_v37 = vadd.f32 %v3705_v50, %v3540_v23  ;;  %v3508_v47 = vpop.f32.mrf.mxu0  ;;  %v6432_v50 = vld [vmem:[%s9486_s7 + $0x314] sm:$0xf] }
 0x506   :  { %v3545_v33 = vadd.f32 %v3508_v47, %v8570_v34 }
 0x507   :  { %4206 = vmatmul.bf16.gmra.mxu1 %v8219_v15  ;;  %4255 = vmatmul.bf16.gmra.mxu2 %v8219_v15  ;;  %v6433_v15 = vld [vmem:[%s9486_s7 + $0x314] sm:$0xf0] }
 0x508   :  { %3960 = vmatmul.bf16.gmra.mxu3 %v3831_v11  ;;  %4009 = vmatmul.bf16.gmra.mxu0 %v3831_v11  ;;  %v6065_v35 = vor.u32 %v6433_v15, %v6064_v55 }
 0x50a   :  { %v3754_v19 = vpop.f32.mrf.mxu2  ;;  %4440 = vmatpush.bf16.msra.mxu3 %v6065_v35 }
 0x50b   :  { %v8851_v28 = vadd.f32 %v3754_v19, %v3541_v51  ;;  %v3459_v48 = vpop.f32.mrf.mxu3 }
 0x50c   :  { %v3707_v22 = vpop.f32.mrf.mxu1  ;;  %v3544_v49 = vadd.f32 %v3459_v48, %v8542_v9  ;;  %v6184_v48 = vld [vmem:[%s9486_s7 + $0x3e0] sm:$0xf] }
 0x50d   :  { %v8854_v46 = vadd.f32 %v3707_v22, %v3542_v56  ;;  %v3510_v34 = vpop.f32.mrf.mxu0  ;;  %v6459_v22 = vld [vmem:[%s9486_s7 + $0x3e4] sm:$0xf0] }
 0x50e   :  { %v3547_v23 = vadd.f32 %v3510_v34, %v8608_v58  ;;  %v6066_v58 = vld [vmem:[%s9486_s7 + $0x318] sm:$0xf0]  ;;  %v6185_v15 = vor.u32 %v6459_v22, %v6184_v48  ;;  %v6430_v22 = vld [vmem:[%s9486_s7 + $0x304] sm:$0xf] }
 0x50f   :  { %v6069_v57 = vor.u32 %v6432_v50, %v6066_v58  ;;  %v6457_v58 = vld [vmem:[%s9486_s7 + $0x3d4] sm:$0xf0] }
 0x511   :  { %4489 = vmatpush.bf16.msra.mxu0 %v6069_v57 }
 0x512   :  { %v3756_v51 = vpop.f32.mrf.mxu2 }
 0x513   :  { %v8863_v42 = vadd.f32 %v3756_v51, %v3543_v29  ;;  %v3461_v36 = vpop.f32.mrf.mxu3  ;;  %v6499_v29 = vld [vmem:[#allocation4 + $0x59] sm:$0xff] }
 0x514   :  { %v3710_v9 = vpop.f32.mrf.mxu1  ;;  %v3546_v60 = vadd.f32 %v3461_v36, %v8584_v1  ;;  %v3832_v47 = vpack.c.bf16 %v8388_v5, %v6499_v29  ;;  %v6192_v1 = vld [vmem:[%s9486_s7 + $0x3f0] sm:$0xf]  ;;  %v6456_v29 = vld [vmem:[%s9486_s7 + $0x3d4] sm:$0xf] }
 0x515   :  { %v8866_v12 = vadd.f32 %v3710_v9, %v3544_v49  ;;  %v3513_v53 = vpop.f32.mrf.mxu0  ;;  %v6193_v5 = vor.u32 %v6461_v39, %v6192_v1  ;;  %v6458_v49 = vld [vmem:[%s9486_s7 + $0x3e4] sm:$0xf]  ;;  %v6056_v9 = vld [vmem:[%s9486_s7 + $0x300] sm:$0xf] }
 0x516   :  { %v8875_v56 = vadd.f32 %v3513_v53, %v8651_v8  ;;  %v6460_v8 = vld [vmem:[%s9486_s7 + $0x3f4] sm:$0xf]  ;;  %v6431_v53 = vld [vmem:[%s9486_s7 + $0x304] sm:$0xf0] }
 0x517   :  { %4211 = vmatmul.bf16.gmra.mxu1 %v8292_v21  ;;  %4260 = vmatmul.bf16.gmra.mxu2 %v8292_v21  ;;  %v6197_v21 = vor.u32 %v6460_v8, %v6194_v62  ;;  %v6455_v62 = vld [vmem:[%s9486_s7 + $0x3c4] sm:$0xf0] }
 0x518   :  { %3965 = vmatmul.bf16.gmra.mxu3 %v3832_v47  ;;  %4014 = vmatmul.bf16.gmra.mxu0 %v3832_v47  ;;  %v6178_v47 = vld [vmem:[%s9486_s7 + $0x3d8] sm:$0xf0] }
 0x519   :  { %4685 = vmatpush.bf16.msrb.mxu1 %v6193_v5  ;;  %4734 = vmatpush.bf16.msrb.mxu2 %v6197_v21  ;;  %v6181_v1 = vor.u32 %v6456_v29, %v6178_v47  ;;  %v6168_v5 = vld [vmem:[%s9486_s7 + $0x3c0] sm:$0xf]  ;;  %v6454_v21 = vld [vmem:[%s9486_s7 + $0x3c4] sm:$0xf] }
 0x51a   :  { %v3759_v11 = vpop.f32.mrf.mxu2  ;;  %v6169_v48 = vor.u32 %v6455_v62, %v6168_v5 }
 0x51b   :  { %v8892_v16 = vadd.f32 %v3759_v11, %v3545_v33  ;;  %v3464_v19 = vpop.f32.mrf.mxu3  ;;  %v6186_v33 = vld [vmem:[%s9486_s7 + $0x3e8] sm:$0xf0] }
 0x51c   :  { %v3712_v34 = vpop.f32.mrf.mxu1  ;;  %v3548_v55 = vadd.f32 %v3464_v19, %v8628_v0  ;;  %v6189_v36 = vor.u32 %v6458_v49, %v6186_v33  ;;  %v6176_v0 = vld [vmem:[%s9486_s7 + $0x3d0] sm:$0xf]  ;;  %v6058_v49 = vld [vmem:[%s9486_s7 + $0x308] sm:$0xf0] }
 0x51d   :  { %v8907_v35 = vadd.f32 %v3712_v34, %v3546_v60  ;;  %v3515_v51 = vpop.f32.mrf.mxu0  ;;  %4686 = vmatpush.bf16.msrb.mxu1 %v6185_v15  ;;  %v6057_v60 = vor.u32 %v6431_v53, %v6056_v9  ;;  %v6177_v57 = vor.u32 %v6457_v58, %v6176_v0  ;;  %v6501_v9 = vld [vmem:[#allocation4 + $0x71] sm:$0xff]  ;;  %v6160_v0 = vld [vmem:[%s9486_s7 + $0x3b0] sm:$0xf]  ;;  %v6162_v58 = vld [vmem:[%s9486_s7 + $0x3b8] sm:$0xf0] }
 0x51e   :  { %v8919_v50 = vadd.f32 %v3515_v51, %v8690_v27  ;;  %4735 = vmatpush.bf16.msrb.mxu2 %v6189_v36  ;;  %v6061_v51 = vor.u32 %v6430_v22, %v6058_v49  ;;  %v6500_v36 = vld [vmem:[#allocation4 + $0x69] sm:$0xff]  ;;  %v6272_v22 = vld [vmem:[%s9486_s7 + $0x470] sm:$0xf] }
 0x51f   :  { %4441 = vmatpush.bf16.msra.mxu3 %v6057_v60  ;;  %v3833_v53 = vpack.c.bf16 %v6501_v9, %v6500_v36  ;;  %v6477_v49 = vld [vmem:[%s9486_s7 + $0x474] sm:$0xf0]  ;;  %v6146_v36 = vld [vmem:[%s9486_s7 + $0x398] sm:$0xf0] }
 0x520   :  { %4490 = vmatpush.bf16.msra.mxu0 %v6061_v51  ;;  %v6448_v51 = vld [vmem:[%s9486_s7 + $0x394] sm:$0xf] }
 0x521   :  { %4687 = vmatpush.bf16.msrb.mxu1 %v6177_v57 }
 0x522   :  { %v3761_v27 = vpop.f32.mrf.mxu2  ;;  %4736 = vmatpush.bf16.msrb.mxu2 %v6181_v1  ;;  %v6152_v1 = vld [vmem:[%s9486_s7 + $0x3a0] sm:$0xf] }
 0x523   :  { %v8930_v39 = vadd.f32 %v3761_v27, %v3547_v23  ;;  %v3466_v8 = vpop.f32.mrf.mxu3  ;;  %v6170_v23 = vld [vmem:[%s9486_s7 + $0x3c8] sm:$0xf0]  ;;  %v6451_v27 = vld [vmem:[%s9486_s7 + $0x3a4] sm:$0xf0] }
 0x524   :  { %v3715_v11 = vpop.f32.mrf.mxu1  ;;  %v3550_v19 = vadd.f32 %v3466_v8, %v8665_v10  ;;  %v6173_v33 = vor.u32 %v6454_v21, %v6170_v23  ;;  %v6450_v8 = vld [vmem:[%s9486_s7 + $0x3a4] sm:$0xf]  ;;  %v6153_v21 = vor.u32 %v6451_v27, %v6152_v1 }
 0x525   :  { %v8951_v34 = vadd.f32 %v3715_v11, %v3548_v55  ;;  %v3518_v15 = vpop.f32.mrf.mxu0  ;;  %4688 = vmatpush.bf16.msrb.mxu1 %v6169_v48  ;;  %v6453_v55 = vld [vmem:[%s9486_s7 + $0x3b4] sm:$0xf0] }
 0x526   :  { %v8954_v10 = vadd.f32 %v3518_v15, %v8719_v30  ;;  %v6452_v30 = vld [vmem:[%s9486_s7 + $0x3b4] sm:$0xf]  ;;  %v6161_v60 = vor.u32 %v6453_v55, %v6160_v0  ;;  %4737 = vmatpush.bf16.msrb.mxu2 %v6173_v33  ;;  %v6449_v33 = vld [vmem:[%s9486_s7 + $0x394] sm:$0xf0] }
 0x527   :  { %4216 = vmatmul.bf16.gmra.mxu1 %v8358_v18  ;;  %4265 = vmatmul.bf16.gmra.mxu2 %v8358_v18  ;;  %v6165_v18 = vor.u32 %v6452_v30, %v6162_v58  ;;  %v6447_v58 = vld [vmem:[%s9486_s7 + $0x384] sm:$0xf0] }
 0x528   :  { %3970 = vmatmul.bf16.gmra.mxu3 %v3833_v53  ;;  %4019 = vmatmul.bf16.gmra.mxu0 %v3833_v53  ;;  %v6149_v53 = vor.u32 %v6448_v51, %v6146_v36  ;;  %v6264_v36 = vld [vmem:[%s9486_s7 + $0x460] sm:$0xf] }
 0x529   :  { %4689 = vmatpush.bf16.msrb.mxu1 %v6161_v60  ;;  %v6136_v60 = vld [vmem:[%s9486_s7 + $0x380] sm:$0xf] }
 0x52a   :  { %v3764_v29 = vpop.f32.mrf.mxu2  ;;  %4738 = vmatpush.bf16.msrb.mxu2 %v6165_v18  ;;  %v6446_v18 = vld [vmem:[%s9486_s7 + $0x384] sm:$0xf]  ;;  %v6137_v1 = vor.u32 %v6447_v58, %v6136_v60  ;;  %v4314_v60 = vld [vmem:[#allocation4 + $0x18] sm:$0xff] }
 0x52b   :  { %v8971_v47 = vadd.f32 %v3764_v29, %v8875_v56  ;;  %v3469_v57 = vpop.f32.mrf.mxu3  ;;  %v6154_v56 = vld [vmem:[%s9486_s7 + $0x3a8] sm:$0xf0] }
 0x52c   :  { %v3717_v5 = vpop.f32.mrf.mxu1  ;;  %v3552_v62 = vadd.f32 %v3469_v57, %v8704_v52  ;;  %v6157_v23 = vor.u32 %v6450_v8, %v6154_v56  ;;  %v6144_v52 = vld [vmem:[%s9486_s7 + $0x390] sm:$0xf]  ;;  %v6274_v56 = vld [vmem:[%s9486_s7 + $0x478] sm:$0xf0] }
 0x52d   :  { %v8986_v11 = vadd.f32 %v3717_v5, %v3550_v19  ;;  %v3520_v48 = vpop.f32.mrf.mxu0  ;;  %4690 = vmatpush.bf16.msrb.mxu1 %v6153_v21  ;;  %v6273_v19 = vor.u32 %v6477_v49, %v6272_v22  ;;  %v6145_v9 = vor.u32 %v6449_v33, %v6144_v52  ;;  %v6476_v21 = vld [vmem:[%s9486_s7 + $0x474] sm:$0xf] }
 0x52e   :  { %v3555_v15 = vadd.f32 %v3520_v48, %v8731_v3  ;;  %4739 = vmatpush.bf16.msrb.mxu2 %v6157_v23  ;;  %v9007_v3 = vld [vmem:[#allocation4 + $0x81] sm:$0xff]  ;;  %v6502_v48 = vld [vmem:[#allocation4 + $0x79] sm:$0xff]  ;;  %v6277_v22 = vor.u32 %v6476_v21, %v6274_v56 }
 0x52f   :  { %4936 = vmatpush.bf16.msrb.mxu3 %v6273_v19  ;;  %v3834_v23 = vpack.c.bf16 %v9007_v3, %v6502_v48 }
 0x530   :  { %4985 = vmatpush.bf16.msrb.mxu0 %v6277_v22 }
 0x531   :  { %4691 = vmatpush.bf16.msrb.mxu1 %v6145_v9 }
 0x532   :  { %v3766_v0 = vpop.f32.mrf.mxu2  ;;  %4740 = vmatpush.bf16.msrb.mxu2 %v6149_v53 }
 0x533   :  { %v9010_v55 = vadd.f32 %v3766_v0, %v8919_v50  ;;  %v3471_v30 = vpop.f32.mrf.mxu3  ;;  %v6138_v50 = vld [vmem:[%s9486_s7 + $0x388] sm:$0xf0]  ;;  %v9050_v0 = vld [vmem:[#allocation4 + $0x82] sm:$0xff] }
 0x534   :  { %v3720_v29 = vpop.f32.mrf.mxu1  ;;  %v3554_v57 = vadd.f32 %v3471_v30, %v8721_v40  ;;  %v6141_v5 = vor.u32 %v6446_v18, %v6138_v50  ;;  %v4313_v50 = vld [vmem:[#allocation4 + $0x10] sm:$0xff] }
 0x535   :  { %v9025_v27 = vadd.f32 %v3720_v29, %v3552_v62  ;;  %v3523_v8 = vpop.f32.mrf.mxu0  ;;  %4692 = vmatpush.bf16.msrb.mxu1 %v6137_v1 }
 0x536   :  { %v3557_v40 = vadd.f32 %v3523_v8, %v8745_v44  ;;  %4741 = vmatpush.bf16.msrb.mxu2 %v6141_v5  ;;  %v4329_v5 = vpack.c.bf16 %v4314_v60, %v4313_v50  ;;  %v4315_v60 = vld [vmem:[#allocation4 + $0x20] sm:$0xff] }
 0x537   :  { %4221 = vmatmul.bf16.gmra.mxu1 %v8405_v43  ;;  %4270 = vmatmul.bf16.gmra.mxu2 %v8405_v43  ;;  %v6475_v43 = vld [vmem:[%s9486_s7 + $0x464] sm:$0xf0] }
 0x538   :  { %3975 = vmatmul.bf16.gmra.mxu3 %v3834_v23  ;;  %4024 = vmatmul.bf16.gmra.mxu0 %v3834_v23  ;;  %v6265_v53 = vor.u32 %v6475_v43, %v6264_v36 }
 0x53a   :  { %v3769_v62 = vpop.f32.mrf.mxu2  ;;  %4937 = vmatpush.bf16.msrb.mxu3 %v6265_v53 }
 0x53b   :  { %v9038_v49 = vadd.f32 %v3769_v62, %v8954_v10  ;;  %v3474_v52 = vpop.f32.mrf.mxu3 }
 0x53c   :  { %v3722_v19 = vpop.f32.mrf.mxu1  ;;  %v3556_v44 = vadd.f32 %v3474_v52, %v8733_v45  ;;  %v6473_v52 = vld [vmem:[%s9486_s7 + $0x454] sm:$0xf0] }
 0x53d   :  { %v9041_v33 = vadd.f32 %v3722_v19, %v3554_v57  ;;  %v3525_v51 = vpop.f32.mrf.mxu0  ;;  %v4085_v57 = vpack.c.bf16 %v9050_v0, %v8687_v38 }
 0x53e   :  { %v3559_v9 = vadd.f32 %v3525_v51, %v8758_v31  ;;  %v6474_v31 = vld [vmem:[%s9486_s7 + $0x464] sm:$0xf] }
 0x542   :  { %v3771_v10 = vpop.f32.mrf.mxu2 }
 0x543   :  { %v9052_v30 = vadd.f32 %v3771_v10, %v3555_v15  ;;  %v3476_v45 = vpop.f32.mrf.mxu3  ;;  %v6266_v15 = vld [vmem:[%s9486_s7 + $0x468] sm:$0xf0] }
 0x544   :  { %v3725_v58 = vpop.f32.mrf.mxu1  ;;  %v3558_v18 = vadd.f32 %v3476_v45, %v8748_v61  ;;  %v6269_v21 = vor.u32 %v6474_v31, %v6266_v15 }
 0x545   :  { %v9055_v29 = vadd.f32 %v3725_v58, %v3556_v44  ;;  %v3990_v1 = vpop.f32.mrf.mxu0  ;;  %v6472_v58 = vld [vmem:[%s9486_s7 + $0x454] sm:$0xf] }
 0x546   :  { %v4031_v8 = vadd.f32 %v3990_v1, %v8772_v2  ;;  %4986 = vmatpush.bf16.msrb.mxu0 %v6269_v21  ;;  %v6256_v2 = vld [vmem:[%s9486_s7 + $0x450] sm:$0xf] }
 0x547   :  { %4226 = vmatmul.bf16.gmra.mxu1 %v4085_v57  ;;  %4275 = vmatmul.bf16.gmra.mxu2 %v4085_v57  ;;  %v6257_v44 = vor.u32 %v6473_v52, %v6256_v2 }
 0x548   :  { %4442 = vmatmul.bf16.vlgmr.msra.gmra.mxu3 %v4329_v5  ;;  %4491 = vmatmul.bf16.vlgmr.msra.gmra.mxu0 %v4329_v5 }
 0x549   :  { %4938 = vmatpush.bf16.msrb.mxu3 %v6257_v44 }
 0x54a   :  { %v3774_v38 = vpop.f32.mrf.mxu2 }
 0x54b   :  { %v9066_v61 = vadd.f32 %v3774_v38, %v3557_v40  ;;  %v3941_v56 = vpop.f32.mrf.mxu3 }
 0x54c   :  { %v3727_v48 = vpop.f32.mrf.mxu1  ;;  %v4030_v23 = vadd.f32 %v3941_v56, %v8761_v20  ;;  %v4316_v20 = vld [vmem:[#allocation4 + $0x28] sm:$0xff] }
 0x54d   :  { %v9069_v22 = vadd.f32 %v3727_v48, %v3558_v18  ;;  %v3992_v62 = vpop.f32.mrf.mxu0  ;;  %v4330_v18 = vpack.c.bf16 %v4316_v20, %v4315_v60 }
 0x54e   :  { %v4033_v19 = vadd.f32 %v3992_v62, %v8784_v54  ;;  %v6258_v54 = vld [vmem:[%s9486_s7 + $0x458] sm:$0xf0] }
 0x54f   :  { %v6261_v57 = vor.u32 %v6472_v58, %v6258_v54 }
 0x551   :  { %4987 = vmatpush.bf16.msrb.mxu0 %v6261_v57 }
 0x552   :  { %v3776_v40 = vpop.f32.mrf.mxu2 }
 0x553   :  { %v9078_v51 = vadd.f32 %v3776_v40, %v3559_v9  ;;  %v3943_v36 = vpop.f32.mrf.mxu3  ;;  %v4317_v40 = vld [vmem:[#allocation4 + $0x30] sm:$0xff] }
 0x554   :  { %v4192_v43 = vpop.f32.mrf.mxu1  ;;  %v4032_v53 = vadd.f32 %v3943_v36, %v8775_v63  ;;  %v6470_v36 = vld [vmem:[%s9486_s7 + $0x444] sm:$0xf] }
 0x555   :  { %v9081_v10 = vadd.f32 %v4192_v43, %v4030_v23  ;;  %v3995_v45 = vpop.f32.mrf.mxu0 }
 0x556   :  { %v4035_v9 = vadd.f32 %v3995_v45, %v8798_v4  ;;  %v6248_v4 = vld [vmem:[%s9486_s7 + $0x440] sm:$0xf] }
 0x557   :  { %4693 = vmatmul.bf16.vlgmr.msrb.gmra.mxu1 %v8135_v25  ;;  %4742 = vmatmul.bf16.vlgmr.msrb.gmra.mxu2 %v8135_v25  ;;  %v6471_v25 = vld [vmem:[%s9486_s7 + $0x444] sm:$0xf0] }
 0x558   :  { %4447 = vmatmul.bf16.gmra.mxu3 %v4330_v18  ;;  %4496 = vmatmul.bf16.gmra.mxu0 %v4330_v18  ;;  %v6249_v56 = vor.u32 %v6471_v25, %v6248_v4 }
 0x55a   :  { %v4241_v63 = vpop.f32.mrf.mxu2  ;;  %4939 = vmatpush.bf16.msrb.mxu3 %v6249_v56  ;;  %v4319_v56 = vld [vmem:[#allocation4 + $0x40] sm:$0xff] }
 0x55b   :  { %v9092_v1 = vadd.f32 %v4241_v63, %v4031_v8  ;;  %v3946_v50 = vpop.f32.mrf.mxu3 }
 0x55c   :  { %v4194_v31 = vpop.f32.mrf.mxu1  ;;  %v4034_v15 = vadd.f32 %v3946_v50, %v8787_v17  ;;  %v4318_v17 = vld [vmem:[#allocation4 + $0x38] sm:$0xff] }
 0x55d   :  { %v9095_v5 = vadd.f32 %v4194_v31, %v4032_v53  ;;  %v3997_v21 = vpop.f32.mrf.mxu0  ;;  %v4331_v20 = vpack.c.bf16 %v4318_v17, %v4317_v40 }
 0x55e   :  { %v4037_v38 = vadd.f32 %v3997_v21, %v8810_v13  ;;  %v6250_v13 = vld [vmem:[%s9486_s7 + $0x448] sm:$0xf0] }
 0x55f   :  { %v6253_v43 = vor.u32 %v6470_v36, %v6250_v13 }
 0x561   :  { %4988 = vmatpush.bf16.msrb.mxu0 %v6253_v43 }
 0x562   :  { %v4243_v8 = vpop.f32.mrf.mxu2 }
 0x563   :  { %v9104_v48 = vadd.f32 %v4243_v8, %v4033_v19  ;;  %v3948_v23 = vpop.f32.mrf.mxu3  ;;  %v6468_v8 = vld [vmem:[%s9486_s7 + $0x434] sm:$0xf] }
 0x564   :  { %v4197_v62 = vpop.f32.mrf.mxu1  ;;  %v4036_v2 = vadd.f32 %v3948_v23, %v8801_v41 }
 0x565   :  { %v9107_v52 = vadd.f32 %v4197_v62, %v4034_v15  ;;  %v4000_v44 = vpop.f32.mrf.mxu0 }
 0x566   :  { %v4039_v19 = vadd.f32 %v4000_v44, %v8824_v26  ;;  %v6240_v26 = vld [vmem:[%s9486_s7 + $0x430] sm:$0xf] }
 0x567   :  { %4698 = vmatmul.bf16.gmra.mxu1 %v8167_v7  ;;  %4747 = vmatmul.bf16.gmra.mxu2 %v8167_v7  ;;  %v6469_v7 = vld [vmem:[%s9486_s7 + $0x434] sm:$0xf0] }
 0x568   :  { %4452 = vmatmul.bf16.gmra.mxu3 %v4331_v20  ;;  %4501 = vmatmul.bf16.gmra.mxu0 %v4331_v20  ;;  %v6241_v63 = vor.u32 %v6469_v7, %v6240_v26  ;;  %v4321_v7 = vld [vmem:[#allocation4 + $0x50] sm:$0xff] }
 0x56a   :  { %v4246_v41 = vpop.f32.mrf.mxu2  ;;  %4940 = vmatpush.bf16.msrb.mxu3 %v6241_v63  ;;  %v6466_v63 = vld [vmem:[%s9486_s7 + $0x424] sm:$0xf] }
 0x56b   :  { %v9118_v53 = vadd.f32 %v4246_v41, %v4035_v9  ;;  %v3951_v45 = vpop.f32.mrf.mxu3 }
 0x56c   :  { %v4199_v60 = vpop.f32.mrf.mxu1  ;;  %v4038_v58 = vadd.f32 %v3951_v45, %v8813_v24  ;;  %v4320_v24 = vld [vmem:[#allocation4 + $0x48] sm:$0xff] }
 0x56d   :  { %v9121_v54 = vadd.f32 %v4199_v60, %v4036_v2  ;;  %v4002_v18 = vpop.f32.mrf.mxu0  ;;  %v4332_v23 = vpack.c.bf16 %v4320_v24, %v4319_v56 }
 0x56e   :  { %v4041_v57 = vadd.f32 %v4002_v18, %v8836_v32  ;;  %v6242_v32 = vld [vmem:[%s9486_s7 + $0x438] sm:$0xf0] }
 0x56f   :  { %v6245_v17 = vor.u32 %v6468_v8, %v6242_v32 }
 0x571   :  { %4989 = vmatpush.bf16.msrb.mxu0 %v6245_v17 }
 0x572   :  { %v4248_v9 = vpop.f32.mrf.mxu2 }
 0x573   :  { %v9130_v50 = vadd.f32 %v4248_v9, %v4037_v38  ;;  %v3953_v31 = vpop.f32.mrf.mxu3 }
 0x574   :  { %v4202_v15 = vpop.f32.mrf.mxu1  ;;  %v4040_v21 = vadd.f32 %v3953_v31, %v8827_v6 }
 0x575   :  { %v9133_v4 = vadd.f32 %v4202_v15, %v4038_v58  ;;  %v4005_v25 = vpop.f32.mrf.mxu0 }
 0x576   :  { %v4043_v38 = vadd.f32 %v4005_v25, %v8851_v28  ;;  %v6232_v28 = vld [vmem:[%s9486_s7 + $0x420] sm:$0xf] }
 0x577   :  { %4703 = vmatmul.bf16.gmra.mxu1 %v8198_v59  ;;  %4752 = vmatmul.bf16.gmra.mxu2 %v8198_v59  ;;  %v6467_v59 = vld [vmem:[%s9486_s7 + $0x424] sm:$0xf0] }
 0x578   :  { %4457 = vmatmul.bf16.gmra.mxu3 %v4332_v23  ;;  %4506 = vmatmul.bf16.gmra.mxu0 %v4332_v23  ;;  %v6233_v43 = vor.u32 %v6467_v59, %v6232_v28  ;;  %v4323_v28 = vld [vmem:[#allocation4 + $0x60] sm:$0xff] }
 0x579   :  { %v6464_v59 = vld [vmem:[%s9486_s7 + $0x414] sm:$0xf] }
 0x57a   :  { %v4251_v6 = vpop.f32.mrf.mxu2  ;;  %4941 = vmatpush.bf16.msrb.mxu3 %v6233_v43 }
 0x57b   :  { %v9144_v62 = vadd.f32 %v4251_v6, %v4039_v19  ;;  %v3956_v2 = vpop.f32.mrf.mxu3 }
 0x57c   :  { %v4204_v44 = vpop.f32.mrf.mxu1  ;;  %v4042_v40 = vadd.f32 %v3956_v2, %v8839_v37  ;;  %v4322_v37 = vld [vmem:[#allocation4 + $0x58] sm:$0xff] }
 0x57d   :  { %v9147_v36 = vadd.f32 %v4204_v44, %v4040_v21  ;;  %v4007_v13 = vpop.f32.mrf.mxu0  ;;  %v4333_v9 = vpack.c.bf16 %v4322_v37, %v4321_v7 }
 0x57e   :  { %v4045_v20 = vadd.f32 %v4007_v13, %v8863_v42  ;;  %v6234_v42 = vld [vmem:[%s9486_s7 + $0x428] sm:$0xf0] }
 0x57f   :  { %v6237_v31 = vor.u32 %v6466_v63, %v6234_v42  ;;  %v6463_v42 = vld [vmem:[%s9486_s7 + $0x404] sm:$0xf0] }
 0x581   :  { %4990 = vmatpush.bf16.msrb.mxu0 %v6237_v31 }
 0x582   :  { %v4253_v19 = vpop.f32.mrf.mxu2 }
 0x583   :  { %v9156_v41 = vadd.f32 %v4253_v19, %v4041_v57  ;;  %v3958_v45 = vpop.f32.mrf.mxu3 }
 0x584   :  { %v4207_v60 = vpop.f32.mrf.mxu1  ;;  %v4044_v58 = vadd.f32 %v3958_v45, %v8854_v46  ;;  %v9526_v45 = vld [vmem:[#allocation5_spill] sm:$0xff] }
 0x585   :  { %v9159_v18 = vadd.f32 %v4207_v60, %v4042_v40  ;;  %v4010_v26 = vpop.f32.mrf.mxu0 }
 0x586   :  { %v4047_v57 = vadd.f32 %v4010_v26, %v8892_v16  ;;  %v6224_v16 = vld [vmem:[%s9486_s7 + $0x410] sm:$0xf] }
 0x587   :  { %4708 = vmatmul.bf16.gmra.mxu1 %v8231_v14  ;;  %4757 = vmatmul.bf16.gmra.mxu2 %v8231_v14  ;;  %v6465_v14 = vld [vmem:[%s9486_s7 + $0x414] sm:$0xf0] }
 0x588   :  { %4462 = vmatmul.bf16.gmra.mxu3 %v4333_v9  ;;  %4511 = vmatmul.bf16.gmra.mxu0 %v4333_v9  ;;  %v6225_v23 = vor.u32 %v6465_v14, %v6224_v16  ;;  %v6218_v16 = vld [vmem:[%s9486_s7 + $0x408] sm:$0xf0] }
 0x58a   :  { %v4256_v46 = vpop.f32.mrf.mxu2  ;;  %4942 = vmatpush.bf16.msrb.mxu3 %v6225_v23  ;;  %v4325_v23 = vld [vmem:[#allocation4 + $0x70] sm:$0xff] }
 0x58b   :  { %v9170_v24 = vadd.f32 %v4256_v46, %v4043_v38  ;;  %v3961_v15 = vpop.f32.mrf.mxu3 }
 0x58c   :  { %v4209_v21 = vpop.f32.mrf.mxu1  ;;  %v4046_v25 = vadd.f32 %v3961_v15, %v8866_v12  ;;  %v4324_v12 = vld [vmem:[#allocation4 + $0x68] sm:$0xff] }
 0x58d   :  { %v9173_v56 = vadd.f32 %v4209_v21, %v4044_v58  ;;  %v4012_v8 = vpop.f32.mrf.mxu0  ;;  %v4334_v43 = vpack.c.bf16 %v4324_v12, %v4323_v28  ;;  %v9527_v12 = vld [vmem:[#allocation6_spill] sm:$0xff] }
 0x58e   :  { %v4049_v32 = vadd.f32 %v4012_v8, %v8930_v39  ;;  %v6226_v39 = vld [vmem:[%s9486_s7 + $0x418] sm:$0xf0]  ;;  %v6462_v8 = vld [vmem:[%s9486_s7 + $0x404] sm:$0xf] }
 0x58f   :  { %v6229_v19 = vor.u32 %v6464_v59, %v6226_v39 }
 0x591   :  { %4991 = vmatpush.bf16.msrb.mxu0 %v6229_v19 }
 0x592   :  { %v4258_v38 = vpop.f32.mrf.mxu2 }
 0x593   :  { %v9182_v17 = vadd.f32 %v4258_v38, %v4045_v20  ;;  %v3963_v6 = vpop.f32.mrf.mxu3  ;;  %v6221_v38 = vor.u32 %v6462_v8, %v6218_v16 }
 0x594   :  { %v4212_v2 = vpop.f32.mrf.mxu1  ;;  %v4048_v44 = vadd.f32 %v3963_v6, %v8907_v35 }
 0x595   :  { %v9185_v40 = vadd.f32 %v4212_v2, %v4046_v25  ;;  %v4015_v13 = vpop.f32.mrf.mxu0  ;;  %4992 = vmatpush.bf16.msrb.mxu0 %v6221_v38 }
 0x596   :  { %v4051_v20 = vadd.f32 %v4015_v13, %v8971_v47  ;;  %v6216_v47 = vld [vmem:[%s9486_s7 + $0x400] sm:$0xf] }
 0x597   :  { %4713 = vmatmul.bf16.gmra.mxu1 %v9526_v45  ;;  %4762 = vmatmul.bf16.gmra.mxu2 %v9526_v45  ;;  %v6217_v31 = vor.u32 %v6463_v42, %v6216_v47 }
 0x598   :  { %4467 = vmatmul.bf16.gmra.mxu3 %v4334_v43  ;;  %4516 = vmatmul.bf16.gmra.mxu0 %v4334_v43 }
 0x599   :  { %4943 = vmatpush.bf16.msrb.mxu3 %v6217_v31 }
 0x59a   :  { %v4261_v35 = vpop.f32.mrf.mxu2 }
 0x59b   :  { %v9196_v37 = vadd.f32 %v4261_v35, %v4047_v57  ;;  %v3966_v60 = vpop.f32.mrf.mxu3 }
 0x59c   :  { %v4214_v58 = vpop.f32.mrf.mxu1  ;;  %v4050_v26 = vadd.f32 %v3966_v60, %v8951_v34  ;;  %v4326_v34 = vld [vmem:[#allocation4 + $0x78] sm:$0xff] }
 0x59d   :  { %v9199_v7 = vadd.f32 %v4214_v58, %v4048_v44  ;;  %v4017_v63 = vpop.f32.mrf.mxu0  ;;  %v4335_v6 = vpack.c.bf16 %v4326_v34, %v4325_v23  ;;  %v6503_v58 = vld [vmem:[#allocation4 + $0x80] sm:$0xff] }
 0x59e   :  { %v4053_v9 = vadd.f32 %v4017_v63, %v9010_v55 }
 0x5a2   :  { %v4263_v57 = vpop.f32.mrf.mxu2 }
 0x5a3   :  { %v9208_v46 = vadd.f32 %v4263_v57, %v4049_v32  ;;  %v3968_v15 = vpop.f32.mrf.mxu3 }
 0x5a4   :  { %v4217_v21 = vpop.f32.mrf.mxu1  ;;  %v4052_v25 = vadd.f32 %v3968_v15, %v8986_v11 }
 0x5a5   :  { %v9217_v14 = vadd.f32 %v4217_v21, %v4050_v26  ;;  %v4020_v55 = vpop.f32.mrf.mxu0  ;;  %v4336_v26 = vpack.c.bf16 %v6503_v58, %v6503_v58  ;;  %v4579_v21 = vld [vmem:[#allocation4 + $0x89] sm:$0xff] }
 0x5a6   :  { %v4055_v32 = vadd.f32 %v4020_v55, %v9038_v49  ;;  %v4587_v8 = vpack.c.bf16 %v4579_v21, %v9007_v3  ;;  %v4816_v55 = vld [vmem:[#allocation4 + $0x1a] sm:$0xff] }
 0x5a7   :  { %4718 = vmatmul.bf16.gmra.mxu1 %v9527_v12  ;;  %4767 = vmatmul.bf16.gmra.mxu2 %v9527_v12 }
 0x5a8   :  { %4472 = vmatmul.bf16.gmra.mxu3 %v4335_v6  ;;  %4521 = vmatmul.bf16.gmra.mxu0 %v4335_v6 }
 0x5aa   :  { %v4266_v11 = vpop.f32.mrf.mxu2 }
 0x5ab   :  { %v9222_v2 = vadd.f32 %v4266_v11, %v4051_v20  ;;  %v3971_v44 = vpop.f32.mrf.mxu3 }
 0x5ac   :  { %v4219_v13 = vpop.f32.mrf.mxu1  ;;  %v4054_v28 = vadd.f32 %v3971_v44, %v9025_v27  ;;  %v9528_v27 = vld [vmem:[#allocation7_spill] sm:$0xff] }
 0x5ad   :  { %v9225_v59 = vadd.f32 %v4219_v13, %v4052_v25  ;;  %v4022_v39 = vpop.f32.mrf.mxu0 }
 0x5ae   :  { %v4057_v49 = vadd.f32 %v4022_v39, %v9052_v30 }
 0x5b2   :  { %v4268_v43 = vpop.f32.mrf.mxu2 }
 0x5b3   :  { %v9228_v19 = vadd.f32 %v4268_v43, %v4053_v9  ;;  %v3973_v45 = vpop.f32.mrf.mxu3 }
 0x5b4   :  { %v4222_v35 = vpop.f32.mrf.mxu1  ;;  %v4056_v60 = vadd.f32 %v3973_v45, %v9041_v33 }
 0x5b5   :  { %v9231_v20 = vadd.f32 %v4222_v35, %v4054_v28  ;;  %v4025_v63 = vpop.f32.mrf.mxu0  ;;  %v4818_v35 = vld [vmem:[#allocation4 + $0x2a] sm:$0xff] }
 0x5b6   :  { %v4059_v47 = vadd.f32 %v4025_v63, %v9066_v61 }
 0x5b7   :  { %4723 = vmatmul.bf16.gmra.mxu1 %v9528_v27  ;;  %4772 = vmatmul.bf16.gmra.mxu2 %v9528_v27 }
 0x5b8   :  { %4477 = vmatmul.bf16.gmra.mxu3 %v4336_v26  ;;  %4526 = vmatmul.bf16.gmra.mxu0 %v4336_v26  ;;  %v4817_v26 = vld [vmem:[#allocation4 + $0x22] sm:$0xff] }
 0x5ba   :  { %v4271_v30 = vpop.f32.mrf.mxu2 }
 0x5bb   :  { %v9236_v42 = vadd.f32 %v4271_v30, %v4055_v32  ;;  %v3976_v9 = vpop.f32.mrf.mxu3 }
 0x5bc   :  { %v4224_v31 = vpop.f32.mrf.mxu1  ;;  %v4058_v33 = vadd.f32 %v3976_v9, %v9055_v29  ;;  %v4815_v29 = vld [vmem:[#allocation4 + $0x12] sm:$0xff] }
 0x5bd   :  { %v9239_v57 = vadd.f32 %v4224_v31, %v4056_v60  ;;  %v4027_v15 = vpop.f32.mrf.mxu0  ;;  %v4831_v11 = vpack.c.bf16 %v4816_v55, %v4815_v29  ;;  %v4820_v31 = vld [vmem:[#allocation4 + $0x3a] sm:$0xff] }
 0x5be   :  { %v4061_v34 = vadd.f32 %v4027_v15, %v9078_v51  ;;  %v4819_v15 = vld [vmem:[#allocation4 + $0x32] sm:$0xff] }
 0x5c2   :  { %v4273_v61 = vpop.f32.mrf.mxu2 }
 0x5c3   :  { %v9242_v25 = vadd.f32 %v4273_v61, %v4057_v49  ;;  %v3978_v16 = vpop.f32.mrf.mxu3 }
 0x5c4   :  { %v4227_v23 = vpop.f32.mrf.mxu1  ;;  %v4060_v38 = vadd.f32 %v3978_v16, %v9069_v22  ;;  %v4822_v16 = vld [vmem:[#allocation4 + $0x4a] sm:$0xff] }
 0x5c5   :  { %v9246_v32 = vadd.f32 %v4227_v23, %v4058_v33  ;;  %v4492_v6 = vpop.f32.mrf.mxu0  ;;  %v4821_v23 = vld [vmem:[#allocation4 + $0x42] sm:$0xff] }
 0x5c6   :  { %v9249_v12 = vadd.f32 %v4492_v6, %v9092_v1 }
 0x5c7   :  { %4728 = vmatmul.bf16.gmra.mxu1 %v4587_v8  ;;  %4777 = vmatmul.bf16.gmra.mxu2 %v4587_v8 }
 0x5c8   :  { %4944 = vmatmul.bf16.vlgmr.msrb.gmra.mxu3 %v4831_v11  ;;  %4993 = vmatmul.bf16.vlgmr.msrb.gmra.mxu0 %v4831_v11 }
 0x5ca   :  { %v4276_v51 = vpop.f32.mrf.mxu2 }
 0x5cb   :  { %v9251_v44 = vadd.f32 %v4276_v51, %v4059_v47  ;;  %v4443_v3 = vpop.f32.mrf.mxu3  ;;  %v4824_v51 = vld [vmem:[#allocation4 + $0x5a] sm:$0xff] }
 0x5cc   :  { %v4229_v13 = vpop.f32.mrf.mxu1  ;;  %v9254_v28 = vadd.f32 %v4443_v3, %v9081_v10  ;;  %v4832_v10 = vpack.c.bf16 %v4818_v35, %v4817_v26 }
 0x5cd   :  { %v9256_v22 = vadd.f32 %v4229_v13, %v4060_v38  ;;  %v4494_v39 = vpop.f32.mrf.mxu0  ;;  %v4834_v38 = vpack.c.bf16 %v4822_v16, %v4821_v23  ;;  %v4823_v13 = vld [vmem:[#allocation4 + $0x52] sm:$0xff] }
 0x5ce   :  { %v9259_v49 = vadd.f32 %v4494_v39, %v9104_v48  ;;  %v4835_v39 = vpack.c.bf16 %v4824_v51, %v4823_v13 }
 0x5d2   :  { %v4278_v1 = vpop.f32.mrf.mxu2 }
 0x5d3   :  { %v9261_v43 = vadd.f32 %v4278_v1, %v4061_v34  ;;  %v4445_v45 = vpop.f32.mrf.mxu3  ;;  %v4833_v34 = vpack.c.bf16 %v4820_v31, %v4819_v15  ;;  %v4828_v15 = vld [vmem:[#allocation4 + $0x7a] sm:$0xff] }
 0x5d4   :  { %v9264_v60 = vadd.f32 %v4445_v45, %v9095_v5 }
 0x5d5   :  { %v4497_v58 = vpop.f32.mrf.mxu0 }
 0x5d6   :  { %v9267_v63 = vadd.f32 %v4497_v58, %v9118_v53  ;;  %v4826_v58 = vld [vmem:[#allocation4 + $0x6a] sm:$0xff] }
 0x5d8   :  { %4949 = vmatmul.bf16.gmra.mxu3 %v4832_v10  ;;  %4998 = vmatmul.bf16.gmra.mxu0 %v4832_v10  ;;  %v4825_v10 = vld [vmem:[#allocation4 + $0x62] sm:$0xff] }
 0x5da   :  { %v4743_v31 = vpop.f32.mrf.mxu2 }
 0x5db   :  { %v4448_v47 = vpop.f32.mrf.mxu3 }
 0x5dc   :  { %v9270_v48 = vadd.f32 %v4448_v47, %v9107_v52  ;;  %v4836_v47 = vpack.c.bf16 %v4826_v58, %v4825_v10 }
 0x5dd   :  { %v4499_v27 = vpop.f32.mrf.mxu0 }
 0x5de   :  { %v9273_v30 = vadd.f32 %v4499_v27, %v9130_v50 }
 0x5e3   :  { %v4450_v9 = vpop.f32.mrf.mxu3 }
 0x5e4   :  { %v9276_v5 = vadd.f32 %v4450_v9, %v9121_v54 }
 0x5e5   :  { %v4502_v33 = vpop.f32.mrf.mxu0 }
 0x5e6   :  { %v9279_v53 = vadd.f32 %v4502_v33, %v9144_v62 }
 0x5e8   :  { %4954 = vmatmul.bf16.gmra.mxu3 %v4833_v34  ;;  %5003 = vmatmul.bf16.gmra.mxu0 %v4833_v34 }
 0x5eb   :  { %v4453_v21 = vpop.f32.mrf.mxu3 }
 0x5ec   :  { %v9282_v52 = vadd.f32 %v4453_v21, %v9133_v4 }
 0x5ed   :  { %v4504_v61 = vpop.f32.mrf.mxu0 }
 0x5ee   :  { %v9285_v50 = vadd.f32 %v4504_v61, %v9156_v41 }
 0x5f3   :  { %v4455_v8 = vpop.f32.mrf.mxu3 }
 0x5f4   :  { %v9288_v54 = vadd.f32 %v4455_v8, %v9147_v36 }
 0x5f5   :  { %v4507_v55 = vpop.f32.mrf.mxu0 }
 0x5f6   :  { %v9291_v62 = vadd.f32 %v4507_v55, %v9170_v24 }
 0x5f8   :  { %4959 = vmatmul.bf16.gmra.mxu3 %v4834_v38  ;;  %5008 = vmatmul.bf16.gmra.mxu0 %v4834_v38  ;;  %v4830_v38 = vld [vmem:[#allocation4 + $0x8a] sm:$0xff] }
 0x5fb   :  { %v4458_v6 = vpop.f32.mrf.mxu3 }
 0x5fc   :  { %v9294_v4 = vadd.f32 %v4458_v6, %v9159_v18 }
 0x5fd   :  { %v4509_v29 = vpop.f32.mrf.mxu0 }
 0x5fe   :  { %v9297_v41 = vadd.f32 %v4509_v29, %v9182_v17 }
 0x603   :  { %v4460_v11 = vpop.f32.mrf.mxu3 }
 0x604   :  { %v9300_v36 = vadd.f32 %v4460_v11, %v9173_v56 }
 0x605   :  { %v4512_v3 = vpop.f32.mrf.mxu0 }
 0x606   :  { %v9303_v24 = vadd.f32 %v4512_v3, %v9196_v37 }
 0x608   :  { %4964 = vmatmul.bf16.gmra.mxu3 %v4835_v39  ;;  %5013 = vmatmul.bf16.gmra.mxu0 %v4835_v39 }
 0x60b   :  { %v4463_v1 = vpop.f32.mrf.mxu3 }
 0x60c   :  { %v9306_v18 = vadd.f32 %v4463_v1, %v9185_v40 }
 0x60d   :  { %v4514_v45 = vpop.f32.mrf.mxu0 }
 0x60e   :  { %v9309_v17 = vadd.f32 %v4514_v45, %v9208_v46 }
 0x613   :  { %v4465_v35 = vpop.f32.mrf.mxu3 }
 0x614   :  { %v9312_v56 = vadd.f32 %v4465_v35, %v9199_v7  ;;  %v4827_v7 = vld [vmem:[#allocation4 + $0x72] sm:$0xff] }
 0x615   :  { %v4517_v26 = vpop.f32.mrf.mxu0  ;;  %v4837_v61 = vpack.c.bf16 %v4828_v15, %v4827_v7 }
 0x616   :  { %v9315_v37 = vadd.f32 %v4517_v26, %v9222_v2 }
 0x618   :  { %4969 = vmatmul.bf16.gmra.mxu3 %v4836_v47  ;;  %5018 = vmatmul.bf16.gmra.mxu0 %v4836_v47 }
 0x61b   :  { %v4468_v27 = vpop.f32.mrf.mxu3 }
 0x61c   :  { %v9318_v40 = vadd.f32 %v4468_v27, %v9217_v14  ;;  %v4694_v14 = vpop.f32.mrf.mxu1 }
 0x61d   :  { %v4519_v9 = vpop.f32.mrf.mxu0 }
 0x61e   :  { %v9321_v46 = vadd.f32 %v4519_v9, %v9228_v19  ;;  %v4745_v19 = vpop.f32.mrf.mxu2 }
 0x623   :  { %v4470_v33 = vpop.f32.mrf.mxu3 }
 0x624   :  { %v9324_v34 = vadd.f32 %v4470_v33, %v9225_v59  ;;  %v4696_v59 = vpop.f32.mrf.mxu1 }
 0x625   :  { %v4522_v2 = vpop.f32.mrf.mxu0 }
 0x626   :  { %v9327_v21 = vadd.f32 %v4522_v2, %v9236_v42  ;;  %v4838_v42 = vpack.c.bf16 %v4830_v38, %v9050_v0  ;;  %v4748_v3 = vpop.f32.mrf.mxu2  ;;  %v4784_v0 = vadd.f32 %v4743_v31, %v9249_v12  ;;  %v4785_v31 = vadd.f32 %v4696_v59, %v9264_v60 }
 0x628   :  { %4974 = vmatmul.bf16.gmra.mxu3 %v4837_v61  ;;  %5023 = vmatmul.bf16.gmra.mxu0 %v4837_v61 }
 0x62b   :  { %v4473_v8 = vpop.f32.mrf.mxu3 }
 0x62c   :  { %v9330_v16 = vadd.f32 %v4473_v8, %v9231_v20 }
 0x62d   :  { %v4524_v55 = vpop.f32.mrf.mxu0 }
 0x62e   :  { %v9333_v23 = vadd.f32 %v4524_v55, %v9242_v25  ;;  %v4699_v25 = vpop.f32.mrf.mxu1 }
 0x62f   :  { %v4787_v61 = vadd.f32 %v4699_v25, %v9270_v48 }
 0x633   :  { %v4475_v6 = vpop.f32.mrf.mxu3 }
 0x634   :  { %v9336_v29 = vadd.f32 %v4475_v6, %v9239_v57  ;;  %v4750_v57 = vpop.f32.mrf.mxu2 }
 0x635   :  { %v4527_v11 = vpop.f32.mrf.mxu0  ;;  %v4790_v60 = vadd.f32 %v4750_v57, %v9273_v30 }
 0x636   :  { %v9340_v51 = vadd.f32 %v4527_v11, %v9251_v44  ;;  %v4701_v26 = vpop.f32.mrf.mxu1 }
 0x637   :  { %v4789_v59 = vadd.f32 %v4701_v26, %v9276_v5 }
 0x638   :  { %4979 = vmatmul.bf16.gmra.mxu3 %v4838_v42  ;;  %5028 = vmatmul.bf16.gmra.mxu0 %v4838_v42 }
 0x63b   :  { %v4478_v20 = vpop.f32.mrf.mxu3 }
 0x63c   :  { %v9343_v13 = vadd.f32 %v4478_v20, %v9246_v32  ;;  %v4783_v32 = vadd.f32 %v4694_v14, %v9254_v28  ;;  %v4753_v10 = vpop.f32.mrf.mxu2  ;;  %v4788_v28 = vadd.f32 %v4748_v3, %v9267_v63 }
 0x63d   :  { %v4529_v39 = vpop.f32.mrf.mxu0  ;;  %v4792_v48 = vadd.f32 %v4753_v10, %v9279_v53 }
 0x63e   :  { %v9346_v1 = vadd.f32 %v4529_v39, %v9261_v43  ;;  %v4786_v43 = vadd.f32 %v4745_v19, %v9259_v49 }
 0x643   :  { %v4480_v45 = vpop.f32.mrf.mxu3 }
 0x644   :  { %v9350_v35 = vadd.f32 %v4480_v45, %v9256_v22  ;;  %v4704_v22 = vpop.f32.mrf.mxu1  ;;  %v4755_v15 = vpop.f32.mrf.mxu2 }
 0x645   :  { %v4994_v44 = vpop.f32.mrf.mxu0  ;;  %v4791_v25 = vadd.f32 %v4704_v22, %v9282_v52  ;;  %v4794_v5 = vadd.f32 %v4755_v15, %v9285_v50 }
 0x646   :  { %v5035_v58 = vadd.f32 %v4994_v44, %v4784_v0 }
 0x648   :  { %5067 = vst [vmem:[%s9488_s9 + $0x8] sm:$0xff] %v5035_v58 }
 0x64b   :  { %v4945_v47 = vpop.f32.mrf.mxu3 }
 0x64c   :  { %v5034_v27 = vadd.f32 %v4945_v47, %v4783_v32  ;;  %v4706_v14 = vpop.f32.mrf.mxu1  ;;  %v4758_v38 = vpop.f32.mrf.mxu2 }
 0x64d   :  { %v4996_v9 = vpop.f32.mrf.mxu0  ;;  %v4793_v44 = vadd.f32 %v4706_v14, %v9288_v54  ;;  %v4796_v52 = vadd.f32 %v4758_v38, %v9291_v62 }
 0x64e   :  { %5066 = vst [vmem:[%s9488_s9] sm:$0xff] %v5034_v27  ;;  %v5037_v12 = vadd.f32 %v4996_v9, %v4786_v43 }
 0x650   :  { %5069 = vst [vmem:[%s9488_s9 + $0x18] sm:$0xff] %v5037_v12 }
 0x653   :  { %v4947_v33 = vpop.f32.mrf.mxu3 }
 0x654   :  { %v5036_v7 = vadd.f32 %v4947_v33, %v4785_v31  ;;  %v4709_v11 = vpop.f32.mrf.mxu1  ;;  %v4760_v20 = vpop.f32.mrf.mxu2 }
 0x655   :  { %v4999_v49 = vpop.f32.mrf.mxu0  ;;  %v4795_v43 = vadd.f32 %v4709_v11, %v9294_v4  ;;  %v4798_v54 = vadd.f32 %v4760_v20, %v9297_v41 }
 0x656   :  { %5068 = vst [vmem:[%s9488_s9 + $0x10] sm:$0xff] %v5036_v7  ;;  %v5039_v2 = vadd.f32 %v4999_v49, %v4788_v28 }
 0x658   :  { %5071 = vst [vmem:[%s9488_s9 + $0x28] sm:$0xff] %v5039_v2 }
 0x65b   :  { %v4950_v8 = vpop.f32.mrf.mxu3 }
 0x65c   :  { %v5038_v19 = vadd.f32 %v4950_v8, %v4787_v61  ;;  %v4711_v0 = vpop.f32.mrf.mxu1  ;;  %v4763_v58 = vpop.f32.mrf.mxu2 }
 0x65d   :  { %v5001_v63 = vpop.f32.mrf.mxu0  ;;  %v4797_v31 = vadd.f32 %v4711_v0, %v9300_v36  ;;  %v4800_v4 = vadd.f32 %v4763_v58, %v9303_v24 }
 0x65e   :  { %5070 = vst [vmem:[%s9488_s9 + $0x20] sm:$0xff] %v5038_v19  ;;  %v5041_v55 = vadd.f32 %v5001_v63, %v4790_v60 }
 0x660   :  { %5073 = vst [vmem:[%s9488_s9 + $0x38] sm:$0xff] %v5041_v55 }
 0x663   :  { %v4952_v6 = vpop.f32.mrf.mxu3 }
 0x664   :  { %v5040_v42 = vadd.f32 %v4952_v6, %v4789_v59  ;;  %v4714_v47 = vpop.f32.mrf.mxu1  ;;  %v4765_v12 = vpop.f32.mrf.mxu2 }
 0x665   :  { %v5004_v30 = vpop.f32.mrf.mxu0  ;;  %v4799_v2 = vadd.f32 %v4714_v47, %v9306_v18  ;;  %v4802_v36 = vadd.f32 %v4765_v12, %v9309_v17 }
 0x666   :  { %5072 = vst [vmem:[%s9488_s9 + $0x30] sm:$0xff] %v5040_v42  ;;  %v5043_v3 = vadd.f32 %v5004_v30, %v4792_v48 }
 0x668   :  { %5075 = vst [vmem:[%s9488_s9 + $0x48] sm:$0xff] %v5043_v3 }
 0x66b   :  { %v4955_v39 = vpop.f32.mrf.mxu3 }
 0x66c   :  { %v5042_v57 = vadd.f32 %v4955_v39, %v4791_v25  ;;  %v4716_v33 = vpop.f32.mrf.mxu1  ;;  %v4768_v49 = vpop.f32.mrf.mxu2 }
 0x66d   :  { %v5006_v53 = vpop.f32.mrf.mxu0  ;;  %v4801_v63 = vadd.f32 %v4716_v33, %v9312_v56  ;;  %v4804_v18 = vadd.f32 %v4768_v49, %v9315_v37 }
 0x66e   :  { %5074 = vst [vmem:[%s9488_s9 + $0x40] sm:$0xff] %v5042_v57  ;;  %v5045_v45 = vadd.f32 %v5006_v53, %v4794_v5 }
 0x670   :  { %5077 = vst [vmem:[%s9488_s9 + $0x58] sm:$0xff] %v5045_v45 }
 0x673   :  { %v4957_v26 = vpop.f32.mrf.mxu3 }
 0x674   :  { %v5044_v32 = vadd.f32 %v4957_v26, %v4793_v44  ;;  %v4719_v8 = vpop.f32.mrf.mxu1  ;;  %v4770_v19 = vpop.f32.mrf.mxu2 }
 0x675   :  { %v5009_v50 = vpop.f32.mrf.mxu0  ;;  %v4803_v48 = vadd.f32 %v4719_v8, %v9318_v40  ;;  %v4806_v56 = vadd.f32 %v4770_v19, %v9321_v46 }
 0x676   :  { %5076 = vst [vmem:[%s9488_s9 + $0x50] sm:$0xff] %v5044_v32  ;;  %v5047_v10 = vadd.f32 %v5009_v50, %v4796_v52 }
 0x678   :  { %5079 = vst [vmem:[%s9488_s9 + $0x68] sm:$0xff] %v5047_v10 }
 0x67b   :  { %v4960_v27 = vpop.f32.mrf.mxu3 }
 0x67c   :  { %v5046_v9 = vadd.f32 %v4960_v27, %v4795_v43  ;;  %v4721_v6 = vpop.f32.mrf.mxu1  ;;  %v4773_v42 = vpop.f32.mrf.mxu2 }
 0x67d   :  { %v5011_v62 = vpop.f32.mrf.mxu0  ;;  %v4805_v25 = vadd.f32 %v4721_v6, %v9324_v34  ;;  %v4808_v40 = vadd.f32 %v4773_v42, %v9327_v21 }
 0x67e   :  { %5078 = vst [vmem:[%s9488_s9 + $0x60] sm:$0xff] %v5046_v9  ;;  %v5049_v22 = vadd.f32 %v5011_v62, %v4798_v54 }
 0x680   :  { %5081 = vst [vmem:[%s9488_s9 + $0x78] sm:$0xff] %v5049_v22 }
 0x683   :  { %v4962_v28 = vpop.f32.mrf.mxu3 }
 0x684   :  { %v5048_v7 = vadd.f32 %v4962_v28, %v4797_v31  ;;  %v4724_v20 = vpop.f32.mrf.mxu1  ;;  %v4775_v57 = vpop.f32.mrf.mxu2 }
 0x685   :  { %v5014_v41 = vpop.f32.mrf.mxu0  ;;  %v4807_v45 = vadd.f32 %v4724_v20, %v9330_v16  ;;  %v4810_v34 = vadd.f32 %v4775_v57, %v9333_v23 }
 0x686   :  { %5080 = vst [vmem:[%s9488_s9 + $0x70] sm:$0xff] %v5048_v7  ;;  %v5051_v15 = vadd.f32 %v5014_v41, %v4800_v4 }
 0x688   :  { %5083 = vst [vmem:[%s9488_s9 + $0x88] sm:$0xff] %v5051_v15 }
 0x68b   :  { %v4965_v61 = vpop.f32.mrf.mxu3 }
 0x68c   :  { %v5050_v14 = vadd.f32 %v4965_v61, %v4799_v2  ;;  %v4726_v0 = vpop.f32.mrf.mxu1  ;;  %v4778_v52 = vpop.f32.mrf.mxu2 }
 0x68d   :  { %v5016_v24 = vpop.f32.mrf.mxu0  ;;  %v4809_v32 = vadd.f32 %v4726_v0, %v9336_v29  ;;  %v4812_v16 = vadd.f32 %v4778_v52, %v9340_v51 }
 0x68e   :  { %5082 = vst [vmem:[%s9488_s9 + $0x80] sm:$0xff] %v5050_v14  ;;  %v5053_v60 = vadd.f32 %v5016_v24, %v4802_v36 }
 0x690   :  { %5085 = vst [vmem:[%s9488_s9 + $0x98] sm:$0xff] %v5053_v60 }
 0x693   :  { %v4967_v55 = vpop.f32.mrf.mxu3 }
 0x694   :  { %v5052_v38 = vadd.f32 %v4967_v55, %v4801_v63  ;;  %v4729_v47 = vpop.f32.mrf.mxu1  ;;  %v4780_v27 = vpop.f32.mrf.mxu2 }
 0x695   :  { %v5019_v17 = vpop.f32.mrf.mxu0  ;;  %v4811_v54 = vadd.f32 %v4729_v47, %v9343_v13  ;;  %v4814_v29 = vadd.f32 %v4780_v27, %v9346_v1 }
 0x696   :  { %5084 = vst [vmem:[%s9488_s9 + $0x90] sm:$0xff] %v5052_v38  ;;  %v5055_v59 = vadd.f32 %v5019_v17, %v4804_v18 }
 0x698   :  { %5087 = vst [vmem:[%s9488_s9 + $0xa8] sm:$0xff] %v5055_v59 }
 0x69b   :  { %v4970_v11 = vpop.f32.mrf.mxu3 }
 0x69c   :  { %v5054_v30 = vadd.f32 %v4970_v11, %v4803_v48  ;;  %v4731_v22 = vpop.f32.mrf.mxu1 }
 0x69d   :  { %v5021_v37 = vpop.f32.mrf.mxu0  ;;  %v4813_v31 = vadd.f32 %v4731_v22, %v9350_v35 }
 0x69e   :  { %5086 = vst [vmem:[%s9488_s9 + $0xa0] sm:$0xff] %v5054_v30  ;;  %v5057_v3 = vadd.f32 %v5021_v37, %v4806_v56 }
 0x6a0   :  { %5089 = vst [vmem:[%s9488_s9 + $0xb8] sm:$0xff] %v5057_v3 }
 0x6a3   :  { %v4972_v39 = vpop.f32.mrf.mxu3 }
 0x6a4   :  { %v5056_v5 = vadd.f32 %v4972_v39, %v4805_v25 }
 0x6a5   :  { %v5024_v46 = vpop.f32.mrf.mxu0 }
 0x6a6   :  { %5088 = vst [vmem:[%s9488_s9 + $0xb0] sm:$0xff] %v5056_v5  ;;  %v5059_v53 = vadd.f32 %v5024_v46, %v4808_v40 }
 0x6a8   :  { %5091 = vst [vmem:[%s9488_s9 + $0xc8] sm:$0xff] %v5059_v53 }
 0x6ab   :  { %v4975_v44 = vpop.f32.mrf.mxu3 }
 0x6ac   :  { %v5058_v58 = vadd.f32 %v4975_v44, %v4807_v45 }
 0x6ad   :  { %v5026_v21 = vpop.f32.mrf.mxu0 }
 0x6ae   :  { %5090 = vst [vmem:[%s9488_s9 + $0xc0] sm:$0xff] %v5058_v58  ;;  %v5061_v26 = vadd.f32 %v5026_v21, %v4810_v34 }
 0x6b0   :  { %5093 = vst [vmem:[%s9488_s9 + $0xd8] sm:$0xff] %v5061_v26 }
 0x6b3   :  { %v4977_v50 = vpop.f32.mrf.mxu3 }
 0x6b4   :  { %v5060_v10 = vadd.f32 %v4977_v50, %v4809_v32 }
 0x6b5   :  { %v5029_v23 = vpop.f32.mrf.mxu0 }
 0x6b6   :  { %5092 = vst [vmem:[%s9488_s9 + $0xd0] sm:$0xff] %v5060_v10  ;;  %v5063_v43 = vadd.f32 %v5029_v23, %v4812_v16 }
 0x6b8   :  { %5095 = vst [vmem:[%s9488_s9 + $0xe8] sm:$0xff] %v5063_v43 }
 0x6bb   :  { %v4980_v9 = vpop.f32.mrf.mxu3 }
 0x6bc   :  { %v5062_v12 = vadd.f32 %v4980_v9, %v4811_v54 }
 0x6bd   :  { %v5031_v51 = vpop.f32.mrf.mxu0 }
 0x6be   :  { %5094 = vst [vmem:[%s9488_s9 + $0xe0] sm:$0xff] %v5062_v12  ;;  %v5065_v62 = vadd.f32 %v5031_v51, %v4814_v29 }
 0x6c0   :  { %5097 = vst [vmem:[%s9488_s9 + $0xf8] sm:$0xff] %v5065_v62 }
 0x6c3   :  { %v4982_v33 = vpop.f32.mrf.mxu3 }
 0x6c4   :  { %v5064_v28 = vadd.f32 %v4982_v33, %v4813_v31 }
 0x6c6   :  { %5096 = vst [vmem:[%s9488_s9 + $0xf0] sm:$0xff] %v5064_v28 }

</bundles_post_ra>
